<compile_context>
chip_gen: v6e
topology: v6e:2x2x1
jax: 0.10.0
libtpu: 0.0.40
codegen_flags: <defaults>
</compile_context>

<pallas_src>
import functools
import math

import jax
import jax.numpy as jnp
from jax.experimental import pallas as pl
from jax.experimental.pallas import tpu as pltpu


def _build_sb1_easpp_kernel(*, gc, k, dilations, H, W):
    """Builds the fused kernel for one (batch, group) grid step + geometry."""
    KK = k * k
    cc = k // 2
    P = max(dilations) * cc                    # one halo big enough for all branches
    Hp, Wp = H + 2 * P, W + 2 * P
    PT = Hp * Wp                               # flattened padded plane (lane axis)
    M = ((P * Wp + P + 127) // 128) * 128      # 128-aligned margin >= max |tap offset|
    L = PT + 2 * M                             # canvas length incl. slice margins

    def tap_offset(t, d):
        i, j = t // k, t % k
        return M + (i - cc) * d * Wp + (j - cc) * d

    def kernel(mask_ref, x_ref, w1_ref, b1_ref, w2_ref, b2_ref, wf_ref, bf_ref,
               o_ref, hc_ref, a_ref):
        # mask_ref: (1, PT)            1.0 on image pixels, 0.0 on the halo ring
        # x_ref   : (1, gc, L)         input canvas of this (batch, group)
        # w*_ref  : (1, nb, gc, KK*gc) packed grouped-conv weights
        # b*_ref  : (1, nb, gc, 1)     biases
        # wf_ref  : (1, gc, nb*gc)     GroupChannelFuse 1x1 weights
        # bf_ref  : (1, gc, 1)         fuse bias
        # o_ref   : (1, gc, PT)        padded-plane output (halo cropped outside)
        # hc_ref  : (gc, L)            VMEM canvas holding relu(conv1(x))
        # a_ref   : (KK*gc, PT)        VMEM im2col matrix
        mask = mask_ref[...]                          # (1, PT)
        hc_ref[...] = jnp.zeros_like(hc_ref)          # margins / halo must read 0
        x_int = x_ref[0, :, M:M + PT]                 # (gc, PT) padded-plane x

        fuse_acc = jnp.zeros((gc, PT), jnp.float32)
        for br, d in enumerate(dilations):
            # ---- conv1: dilated grouped 3x3 as one MXU matmul over im2col rows.
            for t in range(KK):
                off = tap_offset(t, d)
                a_ref[t * gc:(t + 1) * gc, :] = x_ref[0, :, off:off + PT]
            h = jnp.dot(w1_ref[0, br], a_ref[...],
                        preferred_element_type=jnp.float32)
            h = jnp.maximum(h + b1_ref[0, br], 0.0) * mask   # bias + ReLU, re-zero halo
            hc_ref[:, M:M + PT] = h                          # re-pad entirely in VMEM

            # ---- conv2 (+ fused ResBlock residual add).
            for t in range(KK):
                off = tap_offset(t, d)
                a_ref[t * gc:(t + 1) * gc, :] = hc_ref[:, off:off + PT]
            y = jnp.dot(w2_ref[0, br], a_ref[...],
                        preferred_element_type=jnp.float32)
            y = y + b2_ref[0, br] + x_int

            # ---- GroupChannelFuse: this branch's slice of the per-group 1x1 conv.
            wfb = wf_ref[0, :, br * gc:(br + 1) * gc]        # (gc, gc)
            fuse_acc = fuse_acc + jnp.dot(wfb, y,
                                          preferred_element_type=jnp.float32)

        # SB1_easpp output: x + convFuse(y1, y2, y3)
        o_ref[0, :, :] = x_int + fuse_acc + bf_ref[0]

    geo = dict(KK=KK, P=P, Hp=Hp, Wp=Wp, PT=PT, M=M, L=L)
    return kernel, geo


def sb1_easpp_forward(params, x, *, n_subs, kernel_size=3, dilations=(1, 4, 8)):
    N, C, H, W = x.shape                      # all static Python ints under jit
    assert C % n_subs == 0
    gc = C // n_subs
    assert gc % 8 == 0, "per-group channel count must be a multiple of 8 for this blocking"
    nb = len(dilations)
    k = kernel_size
    kernel, geo = _build_sb1_easpp_kernel(gc=gc, k=k, dilations=dilations, H=H, W=W)
    KK, P, Hp, Wp, PT, M, L = (geo[s] for s in ("KK", "P", "Hp", "Wp", "PT", "M", "L"))
    G = n_subs

    # One-time layout plumbing in XLA on the small network input: zero-pad the
    # halo, flatten (Hp, Wp) into a lane-dense last dim, add flat slice margins.
    xc = jnp.pad(jnp.pad(x, ((0, 0), (0, 0), (P, P), (P, P))).reshape(N, C, PT),
                 ((0, 0), (0, 0), (M, M)))                                # (N, C, L)
    mask = jnp.pad(jnp.ones((H, W), jnp.float32),
                   ((P, P), (P, P))).reshape(1, PT)

    out_flat = pl.pallas_call(
        kernel,
        out_shape=jax.ShapeDtypeStruct((N, C, PT), jnp.float32),
        grid=(N, G),
        in_specs=[
            pl.BlockSpec((1, PT), lambda n, g: (0, 0)),                      # mask
            pl.BlockSpec((1, gc, L), lambda n, g: (n, g, 0)),                # x canvas
            pl.BlockSpec((1, nb, gc, KK * gc), lambda n, g: (g, 0, 0, 0)),   # w1
            pl.BlockSpec((1, nb, gc, 1), lambda n, g: (g, 0, 0, 0)),         # b1
            pl.BlockSpec((1, nb, gc, KK * gc), lambda n, g: (g, 0, 0, 0)),   # w2
            pl.BlockSpec((1, nb, gc, 1), lambda n, g: (g, 0, 0, 0)),         # b2
            pl.BlockSpec((1, gc, nb * gc), lambda n, g: (g, 0, 0)),          # wf
            pl.BlockSpec((1, gc, 1), lambda n, g: (g, 0, 0)),                # bf
        ],
        out_specs=pl.BlockSpec((1, gc, PT), lambda n, g: (n, g, 0)),
        scratch_shapes=[
            pltpu.VMEM((gc, L), jnp.float32),          # padded canvas for relu(conv1)
            pltpu.VMEM((KK * gc, PT), jnp.float32),    # im2col matrix
        ],
        compiler_params=pltpu.CompilerParams(
            dimension_semantics=("parallel", "parallel")),
    )(mask, xc, params["w1"], params["b1"], params["w2"], params["b2"],
      params["wf"], params["bf"])

    # Crop the halo ring off the padded-plane output (final, tiny XLA slice).
    return out_flat.reshape(N, C, Hp, Wp)[:, :, P:P + H, P:P + W]


def init_sb1_easpp_params(key, n_feats, n_subs, kernel_size=3, dilations=(1, 4, 8)):
    """Deterministic random parameters in the packed layouts the kernel expects."""
    G = n_subs
    gc = n_feats // n_subs
    k = kernel_size
    KK = k * k
    nb = len(dilations)
    keys = jax.random.split(key, 4 * nb + 2)

    def grouped_conv_w(kk):
        # PyTorch per-group layout (cout_g, cin_g, k, k), packed to the im2col
        # row order used in the kernel: row = (i*k + j) * gc + ci.
        w = jax.random.normal(kk, (G, gc, gc, k, k), jnp.float32) / math.sqrt(gc * KK)
        return jnp.transpose(w, (0, 1, 3, 4, 2)).reshape(G, gc, KK * gc)

    def bias(kk, shape):
        return jax.random.normal(kk, shape, jnp.float32) * 0.01

    w1 = jnp.stack([grouped_conv_w(keys[4 * i + 0]) for i in range(nb)], axis=1)
    b1 = jnp.stack([bias(keys[4 * i + 1], (G, gc, 1)) for i in range(nb)], axis=1)
    w2 = jnp.stack([grouped_conv_w(keys[4 * i + 2]) for i in range(nb)], axis=1)
    b2 = jnp.stack([bias(keys[4 * i + 3], (G, gc, 1)) for i in range(nb)], axis=1)
    wf = jax.random.normal(keys[4 * nb], (G, gc, nb * gc),
                           jnp.float32) / math.sqrt(nb * gc)
    bf = bias(keys[4 * nb + 1], (G, gc, 1))
    return {"w1": w1, "b1": b1, "w2": w2, "b2": b2, "wf": wf, "bf": bf}


if __name__ == "__main__":
    n_feats, n_subs, kernel_size = 32, 4, 3      # gc = 8 channels per group
    res_scale = 1.0  # TODO(synk): res_scale semantics of ResBlock_st1 unknown; unused.
    B, H, W = 2, 16, 16

    key = jax.random.PRNGKey(0)
    kp, kx = jax.random.split(key)
    params = init_sb1_easpp_params(kp, n_feats, n_subs, kernel_size)
    x = jax.random.normal(kx, (B, n_feats, H, W), jnp.float32)

    fwd = jax.jit(functools.partial(sb1_easpp_forward, n_subs=n_subs,
                                    kernel_size=kernel_size))
    out = fwd(params, x)
    out = jax.block_until_ready(out)
    assert out.shape == (B, n_feats, H, W), out.shape
    assert bool(jnp.all(jnp.isfinite(out)))
    print("KERNEL_OK")
</pallas_src>

<mosaic_0001>
module attributes {stable_mosaic.version = 11 : i64} {
  func.func @kernel(%arg0: i32, %arg1: i32, %arg2: memref<1x1024xf32, #tpu.memory_space<vmem>>, %arg3: memref<1x8x1792xf32, #tpu.memory_space<vmem>>, %arg4: memref<1x3x8x72xf32, #tpu.memory_space<vmem>>, %arg5: memref<1x3x8x1xf32, #tpu.memory_space<vmem>>, %arg6: memref<1x3x8x72xf32, #tpu.memory_space<vmem>>, %arg7: memref<1x3x8x1xf32, #tpu.memory_space<vmem>>, %arg8: memref<1x8x24xf32, #tpu.memory_space<vmem>>, %arg9: memref<1x8x1xf32, #tpu.memory_space<vmem>>, %arg10: memref<1x8x1024xf32, #tpu.memory_space<vmem>>, %arg11: memref<8x1792xf32, #tpu.memory_space<vmem>>, %arg12: memref<72x1024xf32, #tpu.memory_space<vmem>>) attributes {dimension_semantics = [#tpu.dimension_semantics<parallel>, #tpu.dimension_semantics<parallel>], iteration_bounds = array<i64: 2, 4>, scalar_prefetch = 0 : i64, scratch_operands = 2 : i64, tpu.core_type = #tpu.core_type<tc>, window_params = [{pipeline_mode = #tpu.pipeline_mode<synchronous>, transform_indices = @transform_0, window_bounds = array<i64: 1, 1024>}, {transform_indices = @transform_1, window_bounds = array<i64: 1, 8, 1792>}, {transform_indices = @transform_2, window_bounds = array<i64: 1, 3, 8, 72>}, {transform_indices = @transform_3, window_bounds = array<i64: 1, 3, 8, 1>}, {transform_indices = @transform_4, window_bounds = array<i64: 1, 3, 8, 72>}, {transform_indices = @transform_5, window_bounds = array<i64: 1, 3, 8, 1>}, {transform_indices = @transform_6, window_bounds = array<i64: 1, 8, 24>}, {transform_indices = @transform_7, window_bounds = array<i64: 1, 8, 1>}, {transform_indices = @transform_8, window_bounds = array<i64: 1, 8, 1024>}]} {
    %c0 = arith.constant 0 : index
    %c0_0 = arith.constant 0 : index
    %0 = vector.load %arg2[%c0, %c0_0] : memref<1x1024xf32, #tpu.memory_space<vmem>>, vector<1x1024xf32>
    %cst = arith.constant 0.000000e+00 : f32
    %1 = vector.broadcast %cst : f32 to vector<8x1792xf32>
    %c0_1 = arith.constant 0 : index
    %c0_2 = arith.constant 0 : index
    %2 = vector.load %arg11[%c0_1, %c0_2] : memref<8x1792xf32, #tpu.memory_space<vmem>>, vector<8x1792xf32>
    tpu.vector_store %arg11[%c0_1, %c0_2], %1 {strides = array<i32>} : memref<8x1792xf32, #tpu.memory_space<vmem>>, vector<8x1792xf32>,
    %c0_3 = arith.constant 0 : index
    %c0_4 = arith.constant 0 : index
    %c384 = arith.constant 384 : index
    %3 = vector.load %arg3[%c0_3, %c0_4, %c384] : memref<1x8x1792xf32, #tpu.memory_space<vmem>>, vector<1x8x1024xf32>
    %4 = vector.shape_cast %3 : vector<1x8x1024xf32> to vector<8x1024xf32>
    %cst_5 = arith.constant 0.000000e+00 : f32
    %5 = vector.broadcast %cst_5 : f32 to vector<8x1024xf32>
    %c0_6 = arith.constant 0 : index
    %c0_7 = arith.constant 0 : index
    %c351 = arith.constant 351 : index
    %6 = vector.load %arg3[%c0_6, %c0_7, %c351] : memref<1x8x1792xf32, #tpu.memory_space<vmem>>, vector<1x8x1024xf32>
    %7 = vector.shape_cast %6 : vector<1x8x1024xf32> to vector<8x1024xf32>
    %c0_8 = arith.constant 0 : index
    %c0_9 = arith.constant 0 : index
    %8 = vector.load %arg12[%c0_8, %c0_9] : memref<72x1024xf32, #tpu.memory_space<vmem>>, vector<8x1024xf32>
    tpu.vector_store %arg12[%c0_8, %c0_9], %7 {strides = array<i32>} : memref<72x1024xf32, #tpu.memory_space<vmem>>, vector<8x1024xf32>,
    %c0_10 = arith.constant 0 : index
    %c0_11 = arith.constant 0 : index
    %c352 = arith.constant 352 : index
    %9 = vector.load %arg3[%c0_10, %c0_11, %c352] : memref<1x8x1792xf32, #tpu.memory_space<vmem>>, vector<1x8x1024xf32>
    %10 = vector.shape_cast %9 : vector<1x8x1024xf32> to vector<8x1024xf32>
    %c8 = arith.constant 8 : index
    %c0_12 = arith.constant 0 : index
    %11 = vector.load %arg12[%c8, %c0_12] : memref<72x1024xf32, #tpu.memory_space<vmem>>, vector<8x1024xf32>
    tpu.vector_store %arg12[%c8, %c0_12], %10 {strides = array<i32>} : memref<72x1024xf32, #tpu.memory_space<vmem>>, vector<8x1024xf32>,
    %c0_13 = arith.constant 0 : index
    %c0_14 = arith.constant 0 : index
    %c353 = arith.constant 353 : index
    %12 = vector.load %arg3[%c0_13, %c0_14, %c353] : memref<1x8x1792xf32, #tpu.memory_space<vmem>>, vector<1x8x1024xf32>
    %13 = vector.shape_cast %12 : vector<1x8x1024xf32> to vector<8x1024xf32>
    %c16 = arith.constant 16 : index
    %c0_15 = arith.constant 0 : index
    %14 = vector.load %arg12[%c16, %c0_15] : memref<72x1024xf32, #tpu.memory_space<vmem>>, vector<8x1024xf32>
    tpu.vector_store %arg12[%c16, %c0_15], %13 {strides = array<i32>} : memref<72x1024xf32, #tpu.memory_space<vmem>>, vector<8x1024xf32>,
    %c0_16 = arith.constant 0 : index
    %c0_17 = arith.constant 0 : index
    %c383 = arith.constant 383 : index
    %15 = vector.load %arg3[%c0_16, %c0_17, %c383] : memref<1x8x1792xf32, #tpu.memory_space<vmem>>, vector<1x8x1024xf32>
    %16 = vector.shape_cast %15 : vector<1x8x1024xf32> to vector<8x1024xf32>
    %c24 = arith.constant 24 : index
    %c0_18 = arith.constant 0 : index
    %17 = vector.load %arg12[%c24, %c0_18] : memref<72x1024xf32, #tpu.memory_space<vmem>>, vector<8x1024xf32>
    tpu.vector_store %arg12[%c24, %c0_18], %16 {strides = array<i32>} : memref<72x1024xf32, #tpu.memory_space<vmem>>, vector<8x1024xf32>,
    %c0_19 = arith.constant 0 : index
    %c0_20 = arith.constant 0 : index
    %c384_21 = arith.constant 384 : index
    %18 = vector.load %arg3[%c0_19, %c0_20, %c384_21] : memref<1x8x1792xf32, #tpu.memory_space<vmem>>, vector<1x8x1024xf32>
    %19 = vector.shape_cast %18 : vector<1x8x1024xf32> to vector<8x1024xf32>
    %c32 = arith.constant 32 : index
    %c0_22 = arith.constant 0 : index
    %20 = vector.load %arg12[%c32, %c0_22] : memref<72x1024xf32, #tpu.memory_space<vmem>>, vector<8x1024xf32>
    tpu.vector_store %arg12[%c32, %c0_22], %19 {strides = array<i32>} : memref<72x1024xf32, #tpu.memory_space<vmem>>, vector<8x1024xf32>,
    %c0_23 = arith.constant 0 : index
    %c0_24 = arith.constant 0 : index
    %c385 = arith.constant 385 : index
    %21 = vector.load %arg3[%c0_23, %c0_24, %c385] : memref<1x8x1792xf32, #tpu.memory_space<vmem>>, vector<1x8x1024xf32>
    %22 = vector.shape_cast %21 : vector<1x8x1024xf32> to vector<8x1024xf32>
    %c40 = arith.constant 40 : index
    %c0_25 = arith.constant 0 : index
    %23 = vector.load %arg12[%c40, %c0_25] : memref<72x1024xf32, #tpu.memory_space<vmem>>, vector<8x1024xf32>
    tpu.vector_store %arg12[%c40, %c0_25], %22 {strides = array<i32>} : memref<72x1024xf32, #tpu.memory_space<vmem>>, vector<8x1024xf32>,
    %c0_26 = arith.constant 0 : index
    %c0_27 = arith.constant 0 : index
    %c415 = arith.constant 415 : index
    %24 = vector.load %arg3[%c0_26, %c0_27, %c415] : memref<1x8x1792xf32, #tpu.memory_space<vmem>>, vector<1x8x1024xf32>
    %25 = vector.shape_cast %24 : vector<1x8x1024xf32> to vector<8x1024xf32>
    %c48 = arith.constant 48 : index
    %c0_28 = arith.constant 0 : index
    %26 = vector.load %arg12[%c48, %c0_28] : memref<72x1024xf32, #tpu.memory_space<vmem>>, vector<8x1024xf32>
    tpu.vector_store %arg12[%c48, %c0_28], %25 {strides = array<i32>} : memref<72x1024xf32, #tpu.memory_space<vmem>>, vector<8x1024xf32>,
    %c0_29 = arith.constant 0 : index
    %c0_30 = arith.constant 0 : index
    %c416 = arith.constant 416 : index
    %27 = vector.load %arg3[%c0_29, %c0_30, %c416] : memref<1x8x1792xf32, #tpu.memory_space<vmem>>, vector<1x8x1024xf32>
    %28 = vector.shape_cast %27 : vector<1x8x1024xf32> to vector<8x1024xf32>
    %c56 = arith.constant 56 : index
    %c0_31 = arith.constant 0 : index
    %29 = vector.load %arg12[%c56, %c0_31] : memref<72x1024xf32, #tpu.memory_space<vmem>>, vector<8x1024xf32>
    tpu.vector_store %arg12[%c56, %c0_31], %28 {strides = array<i32>} : memref<72x1024xf32, #tpu.memory_space<vmem>>, vector<8x1024xf32>,
    %c0_32 = arith.constant 0 : index
    %c0_33 = arith.constant 0 : index
    %c417 = arith.constant 417 : index
    %30 = vector.load %arg3[%c0_32, %c0_33, %c417] : memref<1x8x1792xf32, #tpu.memory_space<vmem>>, vector<1x8x1024xf32>
    %31 = vector.shape_cast %30 : vector<1x8x1024xf32> to vector<8x1024xf32>
    %c64 = arith.constant 64 : index
    %c0_34 = arith.constant 0 : index
    %32 = vector.load %arg12[%c64, %c0_34] : memref<72x1024xf32, #tpu.memory_space<vmem>>, vector<8x1024xf32>
    tpu.vector_store %arg12[%c64, %c0_34], %31 {strides = array<i32>} : memref<72x1024xf32, #tpu.memory_space<vmem>>, vector<8x1024xf32>,
    %c0_35 = arith.constant 0 : index
    %c0_36 = arith.constant 0 : index
    %c0_37 = arith.constant 0 : index
    %c0_38 = arith.constant 0 : index
    %33 = vector.load %arg4[%c0_35, %c0_36, %c0_37, %c0_38] : memref<1x3x8x72xf32, #tpu.memory_space<vmem>>, vector<1x1x8x72xf32>
    %34 = vector.shape_cast %33 : vector<1x1x8x72xf32> to vector<8x72xf32>
    %c0_39 = arith.constant 0 : index
    %c0_40 = arith.constant 0 : index
    %35 = vector.load %arg12[%c0_39, %c0_40] : memref<72x1024xf32, #tpu.memory_space<vmem>>, vector<72x1024xf32>
    %cst_41 = arith.constant dense<0.000000e+00> : vector<8x1024xf32>
    %36 = tpu.matmul %34, %35, %cst_41 {dimension_numbers = #tpu.dot_dimension_numbers<[1], [0], [0], [1], [0, 0, 1, 1], [], []>} : vector<8x72xf32>, vector<72x1024xf32>, vector<8x1024xf32> -> vector<8x1024xf32>
    %c0_42 = arith.constant 0 : index
    %c0_43 = arith.constant 0 : index
    %c0_44 = arith.constant 0 : index
    %c0_45 = arith.constant 0 : index
    %37 = vector.load %arg5[%c0_42, %c0_43, %c0_44, %c0_45] : memref<1x3x8x1xf32, #tpu.memory_space<vmem>>, vector<1x1x8x1xf32>
    %38 = vector.shape_cast %37 : vector<1x1x8x1xf32> to vector<8x1xf32>
    %39 = vector.broadcast %38 : vector<8x1xf32> to vector<8x1024xf32>
    %40 = arith.addf %36, %39 : vector<8x1024xf32>
    %cst_46 = arith.constant 0.000000e+00 : f32
    %41 = vector.broadcast %cst_46 : f32 to vector<8x1024xf32>
    %42 = arith.maximumf %40, %41 : vector<8x1024xf32>
    %43 = vector.broadcast %0 : vector<1x1024xf32> to vector<8x1024xf32>
    %44 = arith.mulf %42, %43 : vector<8x1024xf32>
    %c0_47 = arith.constant 0 : index
    %c384_48 = arith.constant 384 : index
    %45 = vector.load %arg11[%c0_47, %c384_48] : memref<8x1792xf32, #tpu.memory_space<vmem>>, vector<8x1024xf32>
    tpu.vector_store %arg11[%c0_47, %c384_48], %44 {strides = array<i32>} : memref<8x1792xf32, #tpu.memory_space<vmem>>, vector<8x1024xf32>,
    %c0_49 = arith.constant 0 : index
    %c351_50 = arith.constant 351 : index
    %46 = vector.load %arg11[%c0_49, %c351_50] : memref<8x1792xf32, #tpu.memory_space<vmem>>, vector<8x1024xf32>
    %c0_51 = arith.constant 0 : index
    %c0_52 = arith.constant 0 : index
    %47 = vector.load %arg12[%c0_51, %c0_52] : memref<72x1024xf32, #tpu.memory_space<vmem>>, vector<8x1024xf32>
    tpu.vector_store %arg12[%c0_51, %c0_52], %46 {strides = array<i32>} : memref<72x1024xf32, #tpu.memory_space<vmem>>, vector<8x1024xf32>,
    %c0_53 = arith.constant 0 : index
    %c352_54 = arith.constant 352 : index
    %48 = vector.load %arg11[%c0_53, %c352_54] : memref<8x1792xf32, #tpu.memory_space<vmem>>, vector<8x1024xf32>
    %c8_55 = arith.constant 8 : index
    %c0_56 = arith.constant 0 : index
    %49 = vector.load %arg12[%c8_55, %c0_56] : memref<72x1024xf32, #tpu.memory_space<vmem>>, vector<8x1024xf32>
    tpu.vector_store %arg12[%c8_55, %c0_56], %48 {strides = array<i32>} : memref<72x1024xf32, #tpu.memory_space<vmem>>, vector<8x1024xf32>,
    %c0_57 = arith.constant 0 : index
    %c353_58 = arith.constant 353 : index
    %50 = vector.load %arg11[%c0_57, %c353_58] : memref<8x1792xf32, #tpu.memory_space<vmem>>, vector<8x1024xf32>
    %c16_59 = arith.constant 16 : index
    %c0_60 = arith.constant 0 : index
    %51 = vector.load %arg12[%c16_59, %c0_60] : memref<72x1024xf32, #tpu.memory_space<vmem>>, vector<8x1024xf32>
    tpu.vector_store %arg12[%c16_59, %c0_60], %50 {strides = array<i32>} : memref<72x1024xf32, #tpu.memory_space<vmem>>, vector<8x1024xf32>,
    %c0_61 = arith.constant 0 : index
    %c383_62 = arith.constant 383 : index
    %52 = vector.load %arg11[%c0_61, %c383_62] : memref<8x1792xf32, #tpu.memory_space<vmem>>, vector<8x1024xf32>
    %c24_63 = arith.constant 24 : index
    %c0_64 = arith.constant 0 : index
    %53 = vector.load %arg12[%c24_63, %c0_64] : memref<72x1024xf32, #tpu.memory_space<vmem>>, vector<8x1024xf32>
    tpu.vector_store %arg12[%c24_63, %c0_64], %52 {strides = array<i32>} : memref<72x1024xf32, #tpu.memory_space<vmem>>, vector<8x1024xf32>,
    %c0_65 = arith.constant 0 : index
    %c384_66 = arith.constant 384 : index
    %54 = vector.load %arg11[%c0_65, %c384_66] : memref<8x1792xf32, #tpu.memory_space<vmem>>, vector<8x1024xf32>
    %c32_67 = arith.constant 32 : index
    %c0_68 = arith.constant 0 : index
    %55 = vector.load %arg12[%c32_67, %c0_68] : memref<72x1024xf32, #tpu.memory_space<vmem>>, vector<8x1024xf32>
    tpu.vector_store %arg12[%c32_67, %c0_68], %54 {strides = array<i32>} : memref<72x1024xf32, #tpu.memory_space<vmem>>, vector<8x1024xf32>,
    %c0_69 = arith.constant 0 : index
    %c385_70 = arith.constant 385 : index
    %56 = vector.load %arg11[%c0_69, %c385_70] : memref<8x1792xf32, #tpu.memory_space<vmem>>, vector<8x1024xf32>
    %c40_71 = arith.constant 40 : index
    %c0_72 = arith.constant 0 : index
    %57 = vector.load %arg12[%c40_71, %c0_72] : memref<72x1024xf32, #tpu.memory_space<vmem>>, vector<8x1024xf32>
    tpu.vector_store %arg12[%c40_71, %c0_72], %56 {strides = array<i32>} : memref<72x1024xf32, #tpu.memory_space<vmem>>, vector<8x1024xf32>,
    %c0_73 = arith.constant 0 : index
    %c415_74 = arith.constant 415 : index
    %58 = vector.load %arg11[%c0_73, %c415_74] : memref<8x1792xf32, #tpu.memory_space<vmem>>, vector<8x1024xf32>
    %c48_75 = arith.constant 48 : index
    %c0_76 = arith.constant 0 : index
    %59 = vector.load %arg12[%c48_75, %c0_76] : memref<72x1024xf32, #tpu.memory_space<vmem>>, vector<8x1024xf32>
    tpu.vector_store %arg12[%c48_75, %c0_76], %58 {strides = array<i32>} : memref<72x1024xf32, #tpu.memory_space<vmem>>, vector<8x1024xf32>,
    %c0_77 = arith.constant 0 : index
    %c416_78 = arith.constant 416 : index
    %60 = vector.load %arg11[%c0_77, %c416_78] : memref<8x1792xf32, #tpu.memory_space<vmem>>, vector<8x1024xf32>
    %c56_79 = arith.constant 56 : index
    %c0_80 = arith.constant 0 : index
    %61 = vector.load %arg12[%c56_79, %c0_80] : memref<72x1024xf32, #tpu.memory_space<vmem>>, vector<8x1024xf32>
    tpu.vector_store %arg12[%c56_79, %c0_80], %60 {strides = array<i32>} : memref<72x1024xf32, #tpu.memory_space<vmem>>, vector<8x1024xf32>,
    %c0_81 = arith.constant 0 : index
    %c417_82 = arith.constant 417 : index
    %62 = vector.load %arg11[%c0_81, %c417_82] : memref<8x1792xf32, #tpu.memory_space<vmem>>, vector<8x1024xf32>
    %c64_83 = arith.constant 64 : index
    %c0_84 = arith.constant 0 : index
    %63 = vector.load %arg12[%c64_83, %c0_84] : memref<72x1024xf32, #tpu.memory_space<vmem>>, vector<8x1024xf32>
    tpu.vector_store %arg12[%c64_83, %c0_84], %62 {strides = array<i32>} : memref<72x1024xf32, #tpu.memory_space<vmem>>, vector<8x1024xf32>,
    %c0_85 = arith.constant 0 : index
    %c0_86 = arith.constant 0 : index
    %c0_87 = arith.constant 0 : index
    %c0_88 = arith.constant 0 : index
    %64 = vector.load %arg6[%c0_85, %c0_86, %c0_87, %c0_88] : memref<1x3x8x72xf32, #tpu.memory_space<vmem>>, vector<1x1x8x72xf32>
    %65 = vector.shape_cast %64 : vector<1x1x8x72xf32> to vector<8x72xf32>
    %c0_89 = arith.constant 0 : index
    %c0_90 = arith.constant 0 : index
    %66 = vector.load %arg12[%c0_89, %c0_90] : memref<72x1024xf32, #tpu.memory_space<vmem>>, vector<72x1024xf32>
    %cst_91 = arith.constant dense<0.000000e+00> : vector<8x1024xf32>
    %67 = tpu.matmul %65, %66, %cst_91 {dimension_numbers = #tpu.dot_dimension_numbers<[1], [0], [0], [1], [0, 0, 1, 1], [], []>} : vector<8x72xf32>, vector<72x1024xf32>, vector<8x1024xf32> -> vector<8x1024xf32>
    %c0_92 = arith.constant 0 : index
    %c0_93 = arith.constant 0 : index
    %c0_94 = arith.constant 0 : index
    %c0_95 = arith.constant 0 : index
    %68 = vector.load %arg7[%c0_92, %c0_93, %c0_94, %c0_95] : memref<1x3x8x1xf32, #tpu.memory_space<vmem>>, vector<1x1x8x1xf32>
    %69 = vector.shape_cast %68 : vector<1x1x8x1xf32> to vector<8x1xf32>
    %70 = vector.broadcast %69 : vector<8x1xf32> to vector<8x1024xf32>
    %71 = arith.addf %67, %70 : vector<8x1024xf32>
    %72 = arith.addf %71, %4 : vector<8x1024xf32>
    %c0_96 = arith.constant 0 : index
    %c0_97 = arith.constant 0 : index
    %c0_98 = arith.constant 0 : index
    %73 = vector.load %arg8[%c0_96, %c0_97, %c0_98] : memref<1x8x24xf32, #tpu.memory_space<vmem>>, vector<1x8x8xf32>
    %74 = vector.shape_cast %73 : vector<1x8x8xf32> to vector<8x8xf32>
    %cst_99 = arith.constant dense<0.000000e+00> : vector<8x1024xf32>
    %75 = tpu.matmul %74, %72, %cst_99 {dimension_numbers = #tpu.dot_dimension_numbers<[1], [0], [0], [1], [0, 0, 1, 1], [], []>} : vector<8x8xf32>, vector<8x1024xf32>, vector<8x1024xf32> -> vector<8x1024xf32>
    %76 = arith.addf %5, %75 : vector<8x1024xf32>
    %c0_100 = arith.constant 0 : index
    %c0_101 = arith.constant 0 : index
    %c252 = arith.constant 252 : index
    %77 = vector.load %arg3[%c0_100, %c0_101, %c252] : memref<1x8x1792xf32, #tpu.memory_space<vmem>>, vector<1x8x1024xf32>
    %78 = vector.shape_cast %77 : vector<1x8x1024xf32> to vector<8x1024xf32>
    %c0_102 = arith.constant 0 : index
    %c0_103 = arith.constant 0 : index
    %79 = vector.load %arg12[%c0_102, %c0_103] : memref<72x1024xf32, #tpu.memory_space<vmem>>, vector<8x1024xf32>
    tpu.vector_store %arg12[%c0_102, %c0_103], %78 {strides = array<i32>} : memref<72x1024xf32, #tpu.memory_space<vmem>>, vector<8x1024xf32>,
    %c0_104 = arith.constant 0 : index
    %c0_105 = arith.constant 0 : index
    %c256 = arith.constant 256 : index
    %80 = vector.load %arg3[%c0_104, %c0_105, %c256] : memref<1x8x1792xf32, #tpu.memory_space<vmem>>, vector<1x8x1024xf32>
    %81 = vector.shape_cast %80 : vector<1x8x1024xf32> to vector<8x1024xf32>
    %c8_106 = arith.constant 8 : index
    %c0_107 = arith.constant 0 : index
    %82 = vector.load %arg12[%c8_106, %c0_107] : memref<72x1024xf32, #tpu.memory_space<vmem>>, vector<8x1024xf32>
    tpu.vector_store %arg12[%c8_106, %c0_107], %81 {strides = array<i32>} : memref<72x1024xf32, #tpu.memory_space<vmem>>, vector<8x1024xf32>,
    %c0_108 = arith.constant 0 : index
    %c0_109 = arith.constant 0 : index
    %c260 = arith.constant 260 : index
    %83 = vector.load %arg3[%c0_108, %c0_109, %c260] : memref<1x8x1792xf32, #tpu.memory_space<vmem>>, vector<1x8x1024xf32>
    %84 = vector.shape_cast %83 : vector<1x8x1024xf32> to vector<8x1024xf32>
    %c16_110 = arith.constant 16 : index
    %c0_111 = arith.constant 0 : index
    %85 = vector.load %arg12[%c16_110, %c0_111] : memref<72x1024xf32, #tpu.memory_space<vmem>>, vector<8x1024xf32>
    tpu.vector_store %arg12[%c16_110, %c0_111], %84 {strides = array<i32>} : memref<72x1024xf32, #tpu.memory_space<vmem>>, vector<8x1024xf32>,
    %c0_112 = arith.constant 0 : index
    %c0_113 = arith.constant 0 : index
    %c380 = arith.constant 380 : index
    %86 = vector.load %arg3[%c0_112, %c0_113, %c380] : memref<1x8x1792xf32, #tpu.memory_space<vmem>>, vector<1x8x1024xf32>
    %87 = vector.shape_cast %86 : vector<1x8x1024xf32> to vector<8x1024xf32>
    %c24_114 = arith.constant 24 : index
    %c0_115 = arith.constant 0 : index
    %88 = vector.load %arg12[%c24_114, %c0_115] : memref<72x1024xf32, #tpu.memory_space<vmem>>, vector<8x1024xf32>
    tpu.vector_store %arg12[%c24_114, %c0_115], %87 {strides = array<i32>} : memref<72x1024xf32, #tpu.memory_space<vmem>>, vector<8x1024xf32>,
    %c0_116 = arith.constant 0 : index
    %c0_117 = arith.constant 0 : index
    %c384_118 = arith.constant 384 : index
    %89 = vector.load %arg3[%c0_116, %c0_117, %c384_118] : memref<1x8x1792xf32, #tpu.memory_space<vmem>>, vector<1x8x1024xf32>
    %90 = vector.shape_cast %89 : vector<1x8x1024xf32> to vector<8x1024xf32>
    %c32_119 = arith.constant 32 : index
    %c0_120 = arith.constant 0 : index
    %91 = vector.load %arg12[%c32_119, %c0_120] : memref<72x1024xf32, #tpu.memory_space<vmem>>, vector<8x1024xf32>
    tpu.vector_store %arg12[%c32_119, %c0_120], %90 {strides = array<i32>} : memref<72x1024xf32, #tpu.memory_space<vmem>>, vector<8x1024xf32>,
    %c0_121 = arith.constant 0 : index
    %c0_122 = arith.constant 0 : index
    %c388 = arith.constant 388 : index
    %92 = vector.load %arg3[%c0_121, %c0_122, %c388] : memref<1x8x1792xf32, #tpu.memory_space<vmem>>, vector<1x8x1024xf32>
    %93 = vector.shape_cast %92 : vector<1x8x1024xf32> to vector<8x1024xf32>
    %c40_123 = arith.constant 40 : index
    %c0_124 = arith.constant 0 : index
    %94 = vector.load %arg12[%c40_123, %c0_124] : memref<72x1024xf32, #tpu.memory_space<vmem>>, vector<8x1024xf32>
    tpu.vector_store %arg12[%c40_123, %c0_124], %93 {strides = array<i32>} : memref<72x1024xf32, #tpu.memory_space<vmem>>, vector<8x1024xf32>,
    %c0_125 = arith.constant 0 : index
    %c0_126 = arith.constant 0 : index
    %c508 = arith.constant 508 : index
    %95 = vector.load %arg3[%c0_125, %c0_126, %c508] : memref<1x8x1792xf32, #tpu.memory_space<vmem>>, vector<1x8x1024xf32>
    %96 = vector.shape_cast %95 : vector<1x8x1024xf32> to vector<8x1024xf32>
    %c48_127 = arith.constant 48 : index
    %c0_128 = arith.constant 0 : index
    %97 = vector.load %arg12[%c48_127, %c0_128] : memref<72x1024xf32, #tpu.memory_space<vmem>>, vector<8x1024xf32>
    tpu.vector_store %arg12[%c48_127, %c0_128], %96 {strides = array<i32>} : memref<72x1024xf32, #tpu.memory_space<vmem>>, vector<8x1024xf32>,
    %c0_129 = arith.constant 0 : index
    %c0_130 = arith.constant 0 : index
    %c512 = arith.constant 512 : index
    %98 = vector.load %arg3[%c0_129, %c0_130, %c512] : memref<1x8x1792xf32, #tpu.memory_space<vmem>>, vector<1x8x1024xf32>
    %99 = vector.shape_cast %98 : vector<1x8x1024xf32> to vector<8x1024xf32>
    %c56_131 = arith.constant 56 : index
    %c0_132 = arith.constant 0 : index
    %100 = vector.load %arg12[%c56_131, %c0_132] : memref<72x1024xf32, #tpu.memory_space<vmem>>, vector<8x1024xf32>
    tpu.vector_store %arg12[%c56_131, %c0_132], %99 {strides = array<i32>} : memref<72x1024xf32, #tpu.memory_space<vmem>>, vector<8x1024xf32>,
    %c0_133 = arith.constant 0 : index
    %c0_134 = arith.constant 0 : index
    %c516 = arith.constant 516 : index
    %101 = vector.load %arg3[%c0_133, %c0_134, %c516] : memref<1x8x1792xf32, #tpu.memory_space<vmem>>, vector<1x8x1024xf32>
    %102 = vector.shape_cast %101 : vector<1x8x1024xf32> to vector<8x1024xf32>
    %c64_135 = arith.constant 64 : index
    %c0_136 = arith.constant 0 : index
    %103 = vector.load %arg12[%c64_135, %c0_136] : memref<72x1024xf32, #tpu.memory_space<vmem>>, vector<8x1024xf32>
    tpu.vector_store %arg12[%c64_135, %c0_136], %102 {strides = array<i32>} : memref<72x1024xf32, #tpu.memory_space<vmem>>, vector<8x1024xf32>,
    %c0_137 = arith.constant 0 : index
    %c1 = arith.constant 1 : index
    %c0_138 = arith.constant 0 : index
    %c0_139 = arith.constant 0 : index
    %104 = vector.load %arg4[%c0_137, %c1, %c0_138, %c0_139] : memref<1x3x8x72xf32, #tpu.memory_space<vmem>>, vector<1x1x8x72xf32>
    %105 = vector.shape_cast %104 : vector<1x1x8x72xf32> to vector<8x72xf32>
    %c0_140 = arith.constant 0 : index
    %c0_141 = arith.constant 0 : index
    %106 = vector.load %arg12[%c0_140, %c0_141] : memref<72x1024xf32, #tpu.memory_space<vmem>>, vector<72x1024xf32>
    %cst_142 = arith.constant dense<0.000000e+00> : vector<8x1024xf32>
    %107 = tpu.matmul %105, %106, %cst_142 {dimension_numbers = #tpu.dot_dimension_numbers<[1], [0], [0], [1], [0, 0, 1, 1], [], []>} : vector<8x72xf32>, vector<72x1024xf32>, vector<8x1024xf32> -> vector<8x1024xf32>
    %c0_143 = arith.constant 0 : index
    %c1_144 = arith.constant 1 : index
    %c0_145 = arith.constant 0 : index
    %c0_146 = arith.constant 0 : index
    %108 = vector.load %arg5[%c0_143, %c1_144, %c0_145, %c0_146] : memref<1x3x8x1xf32, #tpu.memory_space<vmem>>, vector<1x1x8x1xf32>
    %109 = vector.shape_cast %108 : vector<1x1x8x1xf32> to vector<8x1xf32>
    %110 = vector.broadcast %109 : vector<8x1xf32> to vector<8x1024xf32>
    %111 = arith.addf %107, %110 : vector<8x1024xf32>
    %cst_147 = arith.constant 0.000000e+00 : f32
    %112 = vector.broadcast %cst_147 : f32 to vector<8x1024xf32>
    %113 = arith.maximumf %111, %112 : vector<8x1024xf32>
    %114 = vector.broadcast %0 : vector<1x1024xf32> to vector<8x1024xf32>
    %115 = arith.mulf %113, %114 : vector<8x1024xf32>
    %c0_148 = arith.constant 0 : index
    %c384_149 = arith.constant 384 : index
    %116 = vector.load %arg11[%c0_148, %c384_149] : memref<8x1792xf32, #tpu.memory_space<vmem>>, vector<8x1024xf32>
    tpu.vector_store %arg11[%c0_148, %c384_149], %115 {strides = array<i32>} : memref<8x1792xf32, #tpu.memory_space<vmem>>, vector<8x1024xf32>,
    %c0_150 = arith.constant 0 : index
    %c252_151 = arith.constant 252 : index
    %117 = vector.load %arg11[%c0_150, %c252_151] : memref<8x1792xf32, #tpu.memory_space<vmem>>, vector<8x1024xf32>
    %c0_152 = arith.constant 0 : index
    %c0_153 = arith.constant 0 : index
    %118 = vector.load %arg12[%c0_152, %c0_153] : memref<72x1024xf32, #tpu.memory_space<vmem>>, vector<8x1024xf32>
    tpu.vector_store %arg12[%c0_152, %c0_153], %117 {strides = array<i32>} : memref<72x1024xf32, #tpu.memory_space<vmem>>, vector<8x1024xf32>,
    %c0_154 = arith.constant 0 : index
    %c256_155 = arith.constant 256 : index
    %119 = vector.load %arg11[%c0_154, %c256_155] : memref<8x1792xf32, #tpu.memory_space<vmem>>, vector<8x1024xf32>
    %c8_156 = arith.constant 8 : index
    %c0_157 = arith.constant 0 : index
    %120 = vector.load %arg12[%c8_156, %c0_157] : memref<72x1024xf32, #tpu.memory_space<vmem>>, vector<8x1024xf32>
    tpu.vector_store %arg12[%c8_156, %c0_157], %119 {strides = array<i32>} : memref<72x1024xf32, #tpu.memory_space<vmem>>, vector<8x1024xf32>,
    %c0_158 = arith.constant 0 : index
    %c260_159 = arith.constant 260 : index
    %121 = vector.load %arg11[%c0_158, %c260_159] : memref<8x1792xf32, #tpu.memory_space<vmem>>, vector<8x1024xf32>
    %c16_160 = arith.constant 16 : index
    %c0_161 = arith.constant 0 : index
    %122 = vector.load %arg12[%c16_160, %c0_161] : memref<72x1024xf32, #tpu.memory_space<vmem>>, vector<8x1024xf32>
    tpu.vector_store %arg12[%c16_160, %c0_161], %121 {strides = array<i32>} : memref<72x1024xf32, #tpu.memory_space<vmem>>, vector<8x1024xf32>,
    %c0_162 = arith.constant 0 : index
    %c380_163 = arith.constant 380 : index
    %123 = vector.load %arg11[%c0_162, %c380_163] : memref<8x1792xf32, #tpu.memory_space<vmem>>, vector<8x1024xf32>
    %c24_164 = arith.constant 24 : index
    %c0_165 = arith.constant 0 : index
    %124 = vector.load %arg12[%c24_164, %c0_165] : memref<72x1024xf32, #tpu.memory_space<vmem>>, vector<8x1024xf32>
    tpu.vector_store %arg12[%c24_164, %c0_165], %123 {strides = array<i32>} : memref<72x1024xf32, #tpu.memory_space<vmem>>, vector<8x1024xf32>,
    %c0_166 = arith.constant 0 : index
    %c384_167 = arith.constant 384 : index
    %125 = vector.load %arg11[%c0_166, %c384_167] : memref<8x1792xf32, #tpu.memory_space<vmem>>, vector<8x1024xf32>
    %c32_168 = arith.constant 32 : index
    %c0_169 = arith.constant 0 : index
    %126 = vector.load %arg12[%c32_168, %c0_169] : memref<72x1024xf32, #tpu.memory_space<vmem>>, vector<8x1024xf32>
    tpu.vector_store %arg12[%c32_168, %c0_169], %125 {strides = array<i32>} : memref<72x1024xf32, #tpu.memory_space<vmem>>, vector<8x1024xf32>,
    %c0_170 = arith.constant 0 : index
    %c388_171 = arith.constant 388 : index
    %127 = vector.load %arg11[%c0_170, %c388_171] : memref<8x1792xf32, #tpu.memory_space<vmem>>, vector<8x1024xf32>
    %c40_172 = arith.constant 40 : index
    %c0_173 = arith.constant 0 : index
    %128 = vector.load %arg12[%c40_172, %c0_173] : memref<72x1024xf32, #tpu.memory_space<vmem>>, vector<8x1024xf32>
    tpu.vector_store %arg12[%c40_172, %c0_173], %127 {strides = array<i32>} : memref<72x1024xf32, #tpu.memory_space<vmem>>, vector<8x1024xf32>,
    %c0_174 = arith.constant 0 : index
    %c508_175 = arith.constant 508 : index
    %129 = vector.load %arg11[%c0_174, %c508_175] : memref<8x1792xf32, #tpu.memory_space<vmem>>, vector<8x1024xf32>
    %c48_176 = arith.constant 48 : index
    %c0_177 = arith.constant 0 : index
    %130 = vector.load %arg12[%c48_176, %c0_177] : memref<72x1024xf32, #tpu.memory_space<vmem>>, vector<8x1024xf32>
    tpu.vector_store %arg12[%c48_176, %c0_177], %129 {strides = array<i32>} : memref<72x1024xf32, #tpu.memory_space<vmem>>, vector<8x1024xf32>,
    %c0_178 = arith.constant 0 : index
    %c512_179 = arith.constant 512 : index
    %131 = vector.load %arg11[%c0_178, %c512_179] : memref<8x1792xf32, #tpu.memory_space<vmem>>, vector<8x1024xf32>
    %c56_180 = arith.constant 56 : index
    %c0_181 = arith.constant 0 : index
    %132 = vector.load %arg12[%c56_180, %c0_181] : memref<72x1024xf32, #tpu.memory_space<vmem>>, vector<8x1024xf32>
    tpu.vector_store %arg12[%c56_180, %c0_181], %131 {strides = array<i32>} : memref<72x1024xf32, #tpu.memory_space<vmem>>, vector<8x1024xf32>,
    %c0_182 = arith.constant 0 : index
    %c516_183 = arith.constant 516 : index
    %133 = vector.load %arg11[%c0_182, %c516_183] : memref<8x1792xf32, #tpu.memory_space<vmem>>, vector<8x1024xf32>
    %c64_184 = arith.constant 64 : index
    %c0_185 = arith.constant 0 : index
    %134 = vector.load %arg12[%c64_184, %c0_185] : memref<72x1024xf32, #tpu.memory_space<vmem>>, vector<8x1024xf32>
    tpu.vector_store %arg12[%c64_184, %c0_185], %133 {strides = array<i32>} : memref<72x1024xf32, #tpu.memory_space<vmem>>, vector<8x1024xf32>,
    %c0_186 = arith.constant 0 : index
    %c1_187 = arith.constant 1 : index
    %c0_188 = arith.constant 0 : index
    %c0_189 = arith.constant 0 : index
    %135 = vector.load %arg6[%c0_186, %c1_187, %c0_188, %c0_189] : memref<1x3x8x72xf32, #tpu.memory_space<vmem>>, vector<1x1x8x72xf32>
    %136 = vector.shape_cast %135 : vector<1x1x8x72xf32> to vector<8x72xf32>
    %c0_190 = arith.constant 0 : index
    %c0_191 = arith.constant 0 : index
    %137 = vector.load %arg12[%c0_190, %c0_191] : memref<72x1024xf32, #tpu.memory_space<vmem>>, vector<72x1024xf32>
    %cst_192 = arith.constant dense<0.000000e+00> : vector<8x1024xf32>
    %138 = tpu.matmul %136, %137, %cst_192 {dimension_numbers = #tpu.dot_dimension_numbers<[1], [0], [0], [1], [0, 0, 1, 1], [], []>} : vector<8x72xf32>, vector<72x1024xf32>, vector<8x1024xf32> -> vector<8x1024xf32>
    %c0_193 = arith.constant 0 : index
    %c1_194 = arith.constant 1 : index
    %c0_195 = arith.constant 0 : index
    %c0_196 = arith.constant 0 : index
    %139 = vector.load %arg7[%c0_193, %c1_194, %c0_195, %c0_196] : memref<1x3x8x1xf32, #tpu.memory_space<vmem>>, vector<1x1x8x1xf32>
    %140 = vector.shape_cast %139 : vector<1x1x8x1xf32> to vector<8x1xf32>
    %141 = vector.broadcast %140 : vector<8x1xf32> to vector<8x1024xf32>
    %142 = arith.addf %138, %141 : vector<8x1024xf32>
    %143 = arith.addf %142, %4 : vector<8x1024xf32>
    %c0_197 = arith.constant 0 : index
    %c0_198 = arith.constant 0 : index
    %c8_199 = arith.constant 8 : index
    %144 = vector.load %arg8[%c0_197, %c0_198, %c8_199] : memref<1x8x24xf32, #tpu.memory_space<vmem>>, vector<1x8x8xf32>
    %145 = vector.shape_cast %144 : vector<1x8x8xf32> to vector<8x8xf32>
    %cst_200 = arith.constant dense<0.000000e+00> : vector<8x1024xf32>
    %146 = tpu.matmul %145, %143, %cst_200 {dimension_numbers = #tpu.dot_dimension_numbers<[1], [0], [0], [1], [0, 0, 1, 1], [], []>} : vector<8x8xf32>, vector<8x1024xf32>, vector<8x1024xf32> -> vector<8x1024xf32>
    %147 = arith.addf %76, %146 : vector<8x1024xf32>
    %c0_201 = arith.constant 0 : index
    %c0_202 = arith.constant 0 : index
    %c120 = arith.constant 120 : index
    %148 = vector.load %arg3[%c0_201, %c0_202, %c120] : memref<1x8x1792xf32, #tpu.memory_space<vmem>>, vector<1x8x1024xf32>
    %149 = vector.shape_cast %148 : vector<1x8x1024xf32> to vector<8x1024xf32>
    %c0_203 = arith.constant 0 : index
    %c0_204 = arith.constant 0 : index
    %150 = vector.load %arg12[%c0_203, %c0_204] : memref<72x1024xf32, #tpu.memory_space<vmem>>, vector<8x1024xf32>
    tpu.vector_store %arg12[%c0_203, %c0_204], %149 {strides = array<i32>} : memref<72x1024xf32, #tpu.memory_space<vmem>>, vector<8x1024xf32>,
    %c0_205 = arith.constant 0 : index
    %c0_206 = arith.constant 0 : index
    %c128 = arith.constant 128 : index
    %151 = vector.load %arg3[%c0_205, %c0_206, %c128] : memref<1x8x1792xf32, #tpu.memory_space<vmem>>, vector<1x8x1024xf32>
    %152 = vector.shape_cast %151 : vector<1x8x1024xf32> to vector<8x1024xf32>
    %c8_207 = arith.constant 8 : index
    %c0_208 = arith.constant 0 : index
    %153 = vector.load %arg12[%c8_207, %c0_208] : memref<72x1024xf32, #tpu.memory_space<vmem>>, vector<8x1024xf32>
    tpu.vector_store %arg12[%c8_207, %c0_208], %152 {strides = array<i32>} : memref<72x1024xf32, #tpu.memory_space<vmem>>, vector<8x1024xf32>,
    %c0_209 = arith.constant 0 : index
    %c0_210 = arith.constant 0 : index
    %c136 = arith.constant 136 : index
    %154 = vector.load %arg3[%c0_209, %c0_210, %c136] : memref<1x8x1792xf32, #tpu.memory_space<vmem>>, vector<1x8x1024xf32>
    %155 = vector.shape_cast %154 : vector<1x8x1024xf32> to vector<8x1024xf32>
    %c16_211 = arith.constant 16 : index
    %c0_212 = arith.constant 0 : index
    %156 = vector.load %arg12[%c16_211, %c0_212] : memref<72x1024xf32, #tpu.memory_space<vmem>>, vector<8x1024xf32>
    tpu.vector_store %arg12[%c16_211, %c0_212], %155 {strides = array<i32>} : memref<72x1024xf32, #tpu.memory_space<vmem>>, vector<8x1024xf32>,
    %c0_213 = arith.constant 0 : index
    %c0_214 = arith.constant 0 : index
    %c376 = arith.constant 376 : index
    %157 = vector.load %arg3[%c0_213, %c0_214, %c376] : memref<1x8x1792xf32, #tpu.memory_space<vmem>>, vector<1x8x1024xf32>
    %158 = vector.shape_cast %157 : vector<1x8x1024xf32> to vector<8x1024xf32>
    %c24_215 = arith.constant 24 : index
    %c0_216 = arith.constant 0 : index
    %159 = vector.load %arg12[%c24_215, %c0_216] : memref<72x1024xf32, #tpu.memory_space<vmem>>, vector<8x1024xf32>
    tpu.vector_store %arg12[%c24_215, %c0_216], %158 {strides = array<i32>} : memref<72x1024xf32, #tpu.memory_space<vmem>>, vector<8x1024xf32>,
    %c0_217 = arith.constant 0 : index
    %c0_218 = arith.constant 0 : index
    %c384_219 = arith.constant 384 : index
    %160 = vector.load %arg3[%c0_217, %c0_218, %c384_219] : memref<1x8x1792xf32, #tpu.memory_space<vmem>>, vector<1x8x1024xf32>
    %161 = vector.shape_cast %160 : vector<1x8x1024xf32> to vector<8x1024xf32>
    %c32_220 = arith.constant 32 : index
    %c0_221 = arith.constant 0 : index
    %162 = vector.load %arg12[%c32_220, %c0_221] : memref<72x1024xf32, #tpu.memory_space<vmem>>, vector<8x1024xf32>
    tpu.vector_store %arg12[%c32_220, %c0_221], %161 {strides = array<i32>} : memref<72x1024xf32, #tpu.memory_space<vmem>>, vector<8x1024xf32>,
    %c0_222 = arith.constant 0 : index
    %c0_223 = arith.constant 0 : index
    %c392 = arith.constant 392 : index
    %163 = vector.load %arg3[%c0_222, %c0_223, %c392] : memref<1x8x1792xf32, #tpu.memory_space<vmem>>, vector<1x8x1024xf32>
    %164 = vector.shape_cast %163 : vector<1x8x1024xf32> to vector<8x1024xf32>
    %c40_224 = arith.constant 40 : index
    %c0_225 = arith.constant 0 : index
    %165 = vector.load %arg12[%c40_224, %c0_225] : memref<72x1024xf32, #tpu.memory_space<vmem>>, vector<8x1024xf32>
    tpu.vector_store %arg12[%c40_224, %c0_225], %164 {strides = array<i32>} : memref<72x1024xf32, #tpu.memory_space<vmem>>, vector<8x1024xf32>,
    %c0_226 = arith.constant 0 : index
    %c0_227 = arith.constant 0 : index
    %c632 = arith.constant 632 : index
    %166 = vector.load %arg3[%c0_226, %c0_227, %c632] : memref<1x8x1792xf32, #tpu.memory_space<vmem>>, vector<1x8x1024xf32>
    %167 = vector.shape_cast %166 : vector<1x8x1024xf32> to vector<8x1024xf32>
    %c48_228 = arith.constant 48 : index
    %c0_229 = arith.constant 0 : index
    %168 = vector.load %arg12[%c48_228, %c0_229] : memref<72x1024xf32, #tpu.memory_space<vmem>>, vector<8x1024xf32>
    tpu.vector_store %arg12[%c48_228, %c0_229], %167 {strides = array<i32>} : memref<72x1024xf32, #tpu.memory_space<vmem>>, vector<8x1024xf32>,
    %c0_230 = arith.constant 0 : index
    %c0_231 = arith.constant 0 : index
    %c640 = arith.constant 640 : index
    %169 = vector.load %arg3[%c0_230, %c0_231, %c640] : memref<1x8x1792xf32, #tpu.memory_space<vmem>>, vector<1x8x1024xf32>
    %170 = vector.shape_cast %169 : vector<1x8x1024xf32> to vector<8x1024xf32>
    %c56_232 = arith.constant 56 : index
    %c0_233 = arith.constant 0 : index
    %171 = vector.load %arg12[%c56_232, %c0_233] : memref<72x1024xf32, #tpu.memory_space<vmem>>, vector<8x1024xf32>
    tpu.vector_store %arg12[%c56_232, %c0_233], %170 {strides = array<i32>} : memref<72x1024xf32, #tpu.memory_space<vmem>>, vector<8x1024xf32>,
    %c0_234 = arith.constant 0 : index
    %c0_235 = arith.constant 0 : index
    %c648 = arith.constant 648 : index
    %172 = vector.load %arg3[%c0_234, %c0_235, %c648] : memref<1x8x1792xf32, #tpu.memory_space<vmem>>, vector<1x8x1024xf32>
    %173 = vector.shape_cast %172 : vector<1x8x1024xf32> to vector<8x1024xf32>
    %c64_236 = arith.constant 64 : index
    %c0_237 = arith.constant 0 : index
    %174 = vector.load %arg12[%c64_236, %c0_237] : memref<72x1024xf32, #tpu.memory_space<vmem>>, vector<8x1024xf32>
    tpu.vector_store %arg12[%c64_236, %c0_237], %173 {strides = array<i32>} : memref<72x1024xf32, #tpu.memory_space<vmem>>, vector<8x1024xf32>,
    %c0_238 = arith.constant 0 : index
    %c2 = arith.constant 2 : index
    %c0_239 = arith.constant 0 : index
    %c0_240 = arith.constant 0 : index
    %175 = vector.load %arg4[%c0_238, %c2, %c0_239, %c0_240] : memref<1x3x8x72xf32, #tpu.memory_space<vmem>>, vector<1x1x8x72xf32>
    %176 = vector.shape_cast %175 : vector<1x1x8x72xf32> to vector<8x72xf32>
    %c0_241 = arith.constant 0 : index
    %c0_242 = arith.constant 0 : index
    %177 = vector.load %arg12[%c0_241, %c0_242] : memref<72x1024xf32, #tpu.memory_space<vmem>>, vector<72x1024xf32>
    %cst_243 = arith.constant dense<0.000000e+00> : vector<8x1024xf32>
    %178 = tpu.matmul %176, %177, %cst_243 {dimension_numbers = #tpu.dot_dimension_numbers<[1], [0], [0], [1], [0, 0, 1, 1], [], []>} : vector<8x72xf32>, vector<72x1024xf32>, vector<8x1024xf32> -> vector<8x1024xf32>
    %c0_244 = arith.constant 0 : index
    %c2_245 = arith.constant 2 : index
    %c0_246 = arith.constant 0 : index
    %c0_247 = arith.constant 0 : index
    %179 = vector.load %arg5[%c0_244, %c2_245, %c0_246, %c0_247] : memref<1x3x8x1xf32, #tpu.memory_space<vmem>>, vector<1x1x8x1xf32>
    %180 = vector.shape_cast %179 : vector<1x1x8x1xf32> to vector<8x1xf32>
    %181 = vector.broadcast %180 : vector<8x1xf32> to vector<8x1024xf32>
    %182 = arith.addf %178, %181 : vector<8x1024xf32>
    %cst_248 = arith.constant 0.000000e+00 : f32
    %183 = vector.broadcast %cst_248 : f32 to vector<8x1024xf32>
    %184 = arith.maximumf %182, %183 : vector<8x1024xf32>
    %185 = vector.broadcast %0 : vector<1x1024xf32> to vector<8x1024xf32>
    %186 = arith.mulf %184, %185 : vector<8x1024xf32>
    %c0_249 = arith.constant 0 : index
    %c384_250 = arith.constant 384 : index
    %187 = vector.load %arg11[%c0_249, %c384_250] : memref<8x1792xf32, #tpu.memory_space<vmem>>, vector<8x1024xf32>
    tpu.vector_store %arg11[%c0_249, %c384_250], %186 {strides = array<i32>} : memref<8x1792xf32, #tpu.memory_space<vmem>>, vector<8x1024xf32>,
    %c0_251 = arith.constant 0 : index
    %c120_252 = arith.constant 120 : index
    %188 = vector.load %arg11[%c0_251, %c120_252] : memref<8x1792xf32, #tpu.memory_space<vmem>>, vector<8x1024xf32>
    %c0_253 = arith.constant 0 : index
    %c0_254 = arith.constant 0 : index
    %189 = vector.load %arg12[%c0_253, %c0_254] : memref<72x1024xf32, #tpu.memory_space<vmem>>, vector<8x1024xf32>
    tpu.vector_store %arg12[%c0_253, %c0_254], %188 {strides = array<i32>} : memref<72x1024xf32, #tpu.memory_space<vmem>>, vector<8x1024xf32>,
    %c0_255 = arith.constant 0 : index
    %c128_256 = arith.constant 128 : index
    %190 = vector.load %arg11[%c0_255, %c128_256] : memref<8x1792xf32, #tpu.memory_space<vmem>>, vector<8x1024xf32>
    %c8_257 = arith.constant 8 : index
    %c0_258 = arith.constant 0 : index
    %191 = vector.load %arg12[%c8_257, %c0_258] : memref<72x1024xf32, #tpu.memory_space<vmem>>, vector<8x1024xf32>
    tpu.vector_store %arg12[%c8_257, %c0_258], %190 {strides = array<i32>} : memref<72x1024xf32, #tpu.memory_space<vmem>>, vector<8x1024xf32>,
    %c0_259 = arith.constant 0 : index
    %c136_260 = arith.constant 136 : index
    %192 = vector.load %arg11[%c0_259, %c136_260] : memref<8x1792xf32, #tpu.memory_space<vmem>>, vector<8x1024xf32>
    %c16_261 = arith.constant 16 : index
    %c0_262 = arith.constant 0 : index
    %193 = vector.load %arg12[%c16_261, %c0_262] : memref<72x1024xf32, #tpu.memory_space<vmem>>, vector<8x1024xf32>
    tpu.vector_store %arg12[%c16_261, %c0_262], %192 {strides = array<i32>} : memref<72x1024xf32, #tpu.memory_space<vmem>>, vector<8x1024xf32>,
    %c0_263 = arith.constant 0 : index
    %c376_264 = arith.constant 376 : index
    %194 = vector.load %arg11[%c0_263, %c376_264] : memref<8x1792xf32, #tpu.memory_space<vmem>>, vector<8x1024xf32>
    %c24_265 = arith.constant 24 : index
    %c0_266 = arith.constant 0 : index
    %195 = vector.load %arg12[%c24_265, %c0_266] : memref<72x1024xf32, #tpu.memory_space<vmem>>, vector<8x1024xf32>
    tpu.vector_store %arg12[%c24_265, %c0_266], %194 {strides = array<i32>} : memref<72x1024xf32, #tpu.memory_space<vmem>>, vector<8x1024xf32>,
    %c0_267 = arith.constant 0 : index
    %c384_268 = arith.constant 384 : index
    %196 = vector.load %arg11[%c0_267, %c384_268] : memref<8x1792xf32, #tpu.memory_space<vmem>>, vector<8x1024xf32>
    %c32_269 = arith.constant 32 : index
    %c0_270 = arith.constant 0 : index
    %197 = vector.load %arg12[%c32_269, %c0_270] : memref<72x1024xf32, #tpu.memory_space<vmem>>, vector<8x1024xf32>
    tpu.vector_store %arg12[%c32_269, %c0_270], %196 {strides = array<i32>} : memref<72x1024xf32, #tpu.memory_space<vmem>>, vector<8x1024xf32>,
    %c0_271 = arith.constant 0 : index
    %c392_272 = arith.constant 392 : index
    %198 = vector.load %arg11[%c0_271, %c392_272] : memref<8x1792xf32, #tpu.memory_space<vmem>>, vector<8x1024xf32>
    %c40_273 = arith.constant 40 : index
    %c0_274 = arith.constant 0 : index
    %199 = vector.load %arg12[%c40_273, %c0_274] : memref<72x1024xf32, #tpu.memory_space<vmem>>, vector<8x1024xf32>
    tpu.vector_store %arg12[%c40_273, %c0_274], %198 {strides = array<i32>} : memref<72x1024xf32, #tpu.memory_space<vmem>>, vector<8x1024xf32>,
    %c0_275 = arith.constant 0 : index
    %c632_276 = arith.constant 632 : index
    %200 = vector.load %arg11[%c0_275, %c632_276] : memref<8x1792xf32, #tpu.memory_space<vmem>>, vector<8x1024xf32>
    %c48_277 = arith.constant 48 : index
    %c0_278 = arith.constant 0 : index
    %201 = vector.load %arg12[%c48_277, %c0_278] : memref<72x1024xf32, #tpu.memory_space<vmem>>, vector<8x1024xf32>
    tpu.vector_store %arg12[%c48_277, %c0_278], %200 {strides = array<i32>} : memref<72x1024xf32, #tpu.memory_space<vmem>>, vector<8x1024xf32>,
    %c0_279 = arith.constant 0 : index
    %c640_280 = arith.constant 640 : index
    %202 = vector.load %arg11[%c0_279, %c640_280] : memref<8x1792xf32, #tpu.memory_space<vmem>>, vector<8x1024xf32>
    %c56_281 = arith.constant 56 : index
    %c0_282 = arith.constant 0 : index
    %203 = vector.load %arg12[%c56_281, %c0_282] : memref<72x1024xf32, #tpu.memory_space<vmem>>, vector<8x1024xf32>
    tpu.vector_store %arg12[%c56_281, %c0_282], %202 {strides = array<i32>} : memref<72x1024xf32, #tpu.memory_space<vmem>>, vector<8x1024xf32>,
    %c0_283 = arith.constant 0 : index
    %c648_284 = arith.constant 648 : index
    %204 = vector.load %arg11[%c0_283, %c648_284] : memref<8x1792xf32, #tpu.memory_space<vmem>>, vector<8x1024xf32>
    %c64_285 = arith.constant 64 : index
    %c0_286 = arith.constant 0 : index
    %205 = vector.load %arg12[%c64_285, %c0_286] : memref<72x1024xf32, #tpu.memory_space<vmem>>, vector<8x1024xf32>
    tpu.vector_store %arg12[%c64_285, %c0_286], %204 {strides = array<i32>} : memref<72x1024xf32, #tpu.memory_space<vmem>>, vector<8x1024xf32>,
    %c0_287 = arith.constant 0 : index
    %c2_288 = arith.constant 2 : index
    %c0_289 = arith.constant 0 : index
    %c0_290 = arith.constant 0 : index
    %206 = vector.load %arg6[%c0_287, %c2_288, %c0_289, %c0_290] : memref<1x3x8x72xf32, #tpu.memory_space<vmem>>, vector<1x1x8x72xf32>
    %207 = vector.shape_cast %206 : vector<1x1x8x72xf32> to vector<8x72xf32>
    %c0_291 = arith.constant 0 : index
    %c0_292 = arith.constant 0 : index
    %208 = vector.load %arg12[%c0_291, %c0_292] : memref<72x1024xf32, #tpu.memory_space<vmem>>, vector<72x1024xf32>
    %cst_293 = arith.constant dense<0.000000e+00> : vector<8x1024xf32>
    %209 = tpu.matmul %207, %208, %cst_293 {dimension_numbers = #tpu.dot_dimension_numbers<[1], [0], [0], [1], [0, 0, 1, 1], [], []>} : vector<8x72xf32>, vector<72x1024xf32>, vector<8x1024xf32> -> vector<8x1024xf32>
    %c0_294 = arith.constant 0 : index
    %c2_295 = arith.constant 2 : index
    %c0_296 = arith.constant 0 : index
    %c0_297 = arith.constant 0 : index
    %210 = vector.load %arg7[%c0_294, %c2_295, %c0_296, %c0_297] : memref<1x3x8x1xf32, #tpu.memory_space<vmem>>, vector<1x1x8x1xf32>
    %211 = vector.shape_cast %210 : vector<1x1x8x1xf32> to vector<8x1xf32>
    %212 = vector.broadcast %211 : vector<8x1xf32> to vector<8x1024xf32>
    %213 = arith.addf %209, %212 : vector<8x1024xf32>
    %214 = arith.addf %213, %4 : vector<8x1024xf32>
    %c0_298 = arith.constant 0 : index
    %c0_299 = arith.constant 0 : index
    %c16_300 = arith.constant 16 : index
    %215 = vector.load %arg8[%c0_298, %c0_299, %c16_300] : memref<1x8x24xf32, #tpu.memory_space<vmem>>, vector<1x8x8xf32>
    %216 = vector.shape_cast %215 : vector<1x8x8xf32> to vector<8x8xf32>
    %cst_301 = arith.constant dense<0.000000e+00> : vector<8x1024xf32>
    %217 = tpu.matmul %216, %214, %cst_301 {dimension_numbers = #tpu.dot_dimension_numbers<[1], [0], [0], [1], [0, 0, 1, 1], [], []>} : vector<8x8xf32>, vector<8x1024xf32>, vector<8x1024xf32> -> vector<8x1024xf32>
    %218 = arith.addf %147, %217 : vector<8x1024xf32>
    %219 = arith.addf %4, %218 : vector<8x1024xf32>
    %c0_302 = arith.constant 0 : index
    %c0_303 = arith.constant 0 : index
    %c0_304 = arith.constant 0 : index
    %220 = vector.load %arg9[%c0_302, %c0_303, %c0_304] : memref<1x8x1xf32, #tpu.memory_space<vmem>>, vector<1x8x1xf32>
    %221 = vector.shape_cast %220 : vector<1x8x1xf32> to vector<8x1xf32>
    %222 = vector.broadcast %221 : vector<8x1xf32> to vector<8x1024xf32>
    %223 = arith.addf %219, %222 : vector<8x1024xf32>
    %c0_305 = arith.constant 0 : index
    %c0_306 = arith.constant 0 : index
    %c0_307 = arith.constant 0 : index
    %224 = vector.load %arg10[%c0_305, %c0_306, %c0_307] : memref<1x8x1024xf32, #tpu.memory_space<vmem>>, vector<1x8x1024xf32>
    %225 = vector.shape_cast %224 : vector<1x8x1024xf32> to vector<8x1024xf32>
    %226 = vector.shape_cast %223 : vector<8x1024xf32> to vector<1x8x1024xf32>
    tpu.vector_store %arg10[%c0_305, %c0_306, %c0_307], %226 {strides = array<i32>} : memref<1x8x1024xf32, #tpu.memory_space<vmem>>, vector<1x8x1024xf32>,
    return
  }
  func.func @transform_0(%arg0: i32, %arg1: i32) -> (i32, i32) {
    %c0_i32 = arith.constant 0 : i32
    %c0_i32_0 = arith.constant 0 : i32
    %c0_i32_1 = arith.constant 0 : i32
    return %c0_i32, %c0_i32_0 : i32, i32
  }
  func.func @transform_1(%arg0: i32, %arg1: i32) -> (i32, i32, i32) {
    %c0_i32 = arith.constant 0 : i32
    %c0_i32_0 = arith.constant 0 : i32
    return %arg0, %arg1, %c0_i32 : i32, i32, i32
  }
  func.func @transform_2(%arg0: i32, %arg1: i32) -> (i32, i32, i32, i32) {
    %c0_i32 = arith.constant 0 : i32
    %c0_i32_0 = arith.constant 0 : i32
    %c0_i32_1 = arith.constant 0 : i32
    %c0_i32_2 = arith.constant 0 : i32
    return %arg1, %c0_i32, %c0_i32_0, %c0_i32_1 : i32, i32, i32, i32
  }
  func.func @transform_3(%arg0: i32, %arg1: i32) -> (i32, i32, i32, i32) {
    %c0_i32 = arith.constant 0 : i32
    %c0_i32_0 = arith.constant 0 : i32
    %c0_i32_1 = arith.constant 0 : i32
    %c0_i32_2 = arith.constant 0 : i32
    return %arg1, %c0_i32, %c0_i32_0, %c0_i32_1 : i32, i32, i32, i32
  }
  func.func @transform_4(%arg0: i32, %arg1: i32) -> (i32, i32, i32, i32) {
    %c0_i32 = arith.constant 0 : i32
    %c0_i32_0 = arith.constant 0 : i32
    %c0_i32_1 = arith.constant 0 : i32
    %c0_i32_2 = arith.constant 0 : i32
    return %arg1, %c0_i32, %c0_i32_0, %c0_i32_1 : i32, i32, i32, i32
  }
  func.func @transform_5(%arg0: i32, %arg1: i32) -> (i32, i32, i32, i32) {
    %c0_i32 = arith.constant 0 : i32
    %c0_i32_0 = arith.constant 0 : i32
    %c0_i32_1 = arith.constant 0 : i32
    %c0_i32_2 = arith.constant 0 : i32
    return %arg1, %c0_i32, %c0_i32_0, %c0_i32_1 : i32, i32, i32, i32
  }
  func.func @transform_6(%arg0: i32, %arg1: i32) -> (i32, i32, i32) {
    %c0_i32 = arith.constant 0 : i32
    %c0_i32_0 = arith.constant 0 : i32
    %c0_i32_1 = arith.constant 0 : i32
    return %arg1, %c0_i32, %c0_i32_0 : i32, i32, i32
  }
  func.func @transform_7(%arg0: i32, %arg1: i32) -> (i32, i32, i32) {
    %c0_i32 = arith.constant 0 : i32
    %c0_i32_0 = arith.constant 0 : i32
    %c0_i32_1 = arith.constant 0 : i32
    return %arg1, %c0_i32, %c0_i32_0 : i32, i32, i32
  }
  func.func @transform_8(%arg0: i32, %arg1: i32) -> (i32, i32, i32) {
    %c0_i32 = arith.constant 0 : i32
    %c0_i32_0 = arith.constant 0 : i32
    return %arg0, %arg1, %c0_i32 : i32, i32, i32
  }
}

</mosaic_0001>

<bundles_post_ra>
// kernel: sb1_easpp_forward.1
= control target key start
LH: loop header
LB: loop body
LE: loop exit
PB: predicated region body
PF: predicated region fallthrough
CT: control target
= control target key end

     0   :  { %s6809_s27 = smov 0   ;;  %s6811_s28 = smov 0   ;;  %s9216_s0 = inlined_call_operand.vmem [shape: f32[1,1024], index: 0, kind: input, shape index: {}]   ;;  %s9217_s1 = inlined_call_operand.vmem [shape: f32[2,32,1792], index: 1, kind: input, shape index: {}]   ;;  %s9218_s2 = inlined_call_operand.vmem [shape: f32[4,3,8,72], index: 2, kind: input, shape index: {}]   ;;  %s9219_s3 = inlined_call_operand.vmem [shape: f32[4,3,8,1], index: 3, kind: input, shape index: {}]   ;;  %s9220_s4 = inlined_call_operand.vmem [shape: f32[4,3,8,72], index: 4, kind: input, shape index: {}]   ;;  %s9221_s5 = inlined_call_operand.vmem [shape: f32[4,3,8,1], index: 5, kind: input, shape index: {}]   ;;  %s9222_s6 = inlined_call_operand.vmem [shape: f32[4,8,24], index: 6, kind: input, shape index: {}]   ;;  %s9223_s7 = inlined_call_operand.vmem [shape: f32[4,8,1], index: 7, kind: input, shape index: {}]   ;;  %s9224_s8 = inlined_call_operand.vmem [shape: f32[2,32,1024], index: 8, kind: output, shape index: {}]  }
   0x1   :  { %s6813_s29 = smov 0   ;;  %s6815_s30 = smov 0  }
   0x2   :  { %s6817_s9 = smov 0  }
   0x3 LB: > { %s27_s10 = sadd.s32 1, %s6739_s29  ;;  %s30_s11 = sadd.s32 1, %s6743_s30  ;;  %s6747_s9 = sphi %s6817_s9, %s18_s9   ;;  %s6743_s30 = sphi %s6815_s30, %s9393_s30   ;;  %s6739_s29 = sphi %s6813_s29, %s9392_s29   ;;  %s6735_s28 = sphi %s6811_s28, %s9391_s28   ;;  %s6731_s27 = sphi %s6809_s27, %s9390_s27  }
   0x4   : > { %p28_p0 = scmp.ge.s32.totalorder %s27_s10, 4  ;;  %p6526_p1 = scmp.ge.s32.totalorder %s6747_s9, 1 }
   0x5   : > { %p340_p2 = scmp.lt.s32.totalorder %s6747_s9, 9 }
   0x6   : > { %s9395_s10 = smov (%p28_p0, %s27_s10), 0  ;;  %s9397_s11 = smov (!%p28_p0, %s30_s11), %s6743_s30 }
   0x7   : > { %p341_p3 = pnand %p6526_p1, %p340_p2  ;;  %p32_p4 = scmp.ge.s32.totalorder %s9397_s11, 2 }
   0x9   : > { %s9399_s11 = smov (%p32_p4, %s9397_s11), 0  ;;  %344 = sbr.rel (%p341_p3) target bundleno = 2104 (0x838), region = 52 }
   0xe   : > { %p410_p5 = scmp.lt.s32.totalorder %s6735_s28, 1  ;;  %p412_p6 = scmp.lt.s32.totalorder %s6731_s27, 3  ;;  %v9227_v6 = vmov 0.0   ;;  %vm950_vm0 = vcmask 777216   ;;  %vm889_vm1 = vcmask 785408   ;;  %vm828_vm2 = vcmask 793600  }
   0xf   : > { %s6749_s19 = smov 95   ;;  %s6750_s20 = smov 96   ;;  %1122 = vmatprep.mubr.f32.mxu0 %v9227_v6  ;;  %1193 = vmatprep.mubr.f32.mxu1 %v9227_v6  ;;  %v6758_v28 = vmov 0   ;;  %vm767_vm3 = vcmask 1039360   ;;  %vm690_vm4 = vcmask 7168   ;;  %vm629_vm5 = vcmask 252928  }
  0x10   : > { %s9401_s28 = smov (!%p410_p5, %s6735_s28), 1  ;;  %s9403_s27 = smov (!%p412_p6, %s6731_s27), 3  ;;  %6641 = vset.pattern.permute.xlu0 %v6758_v28  ;;  %6662 = vset.pattern.permute.xlu1 %v6758_v28  ;;  %vm568_vm6 = vcmask 261120   ;;  %vm507_vm7 = vcmask 269312   ;;  %vm1054_vm8 = vcmask 588800   ;;  %vm2391_vm9 = vcmask 1014784  }
  0x11   : > { %s6584_s12 = smul.u32 56, %s9401_s28  ;;  %s6751_s21 = smov 97   ;;  %vm2314_vm10 = vcmask 31744   ;;  %vm3868_vm11 = vcmask 64512   ;;  %vm4554_vm12 = vcmask 982016  }
  0x12   : > { %s6583_s13 = smul.u32 14, %s9403_s27  ;;  %s6752_s22 = smov 127  }
  0x13   : > { %s6753_s23 = smov 1   ;;  %s6754_s24 = smov 31  }
  0x14   : > { %s416_s14 = sadd.s32 %s6584_s12, %s6583_s13  ;;  %s6755_s25 = smov 32  }
  0x15   : > { %s6527_s15 = sshll.u32 %s416_s14, 3  ;;  %s9225_s26 = smov 33  }
  0x16   : > { %s6848_s18 = scalar_lea.vmem %s9217_s1, %s6527_s15  ;;  %s7032_s12 = smul.u32 24, %s9403_s27 }
  0x17   : > { %v6851_v0 = vld [vmem:[%s6848_s18 + $0x20] sm:$0xff]  ;;  %v6854_v1 = vld [vmem:[%s6848_s18 + $0x18] sm:$0xff]  ;;  %v6861_v2 = vld [vmem:[%s6848_s18 + $0x28] sm:$0xff]  ;;  %s6759_s16 = smov 124   ;;  %s6760_s17 = smov 4  }
  0x18   : > { %934 = vrot.lane.b32.xlu0 %v6851_v0, %s6749_s19  ;;  %932 = vrot.lane.b32.xlu1 %v6854_v1, %s6749_s19  ;;  %v6868_v3 = vld [vmem:[%s6848_s18 + $0x30] sm:$0xff]  ;;  %v6875_v4 = vld [vmem:[%s6848_s18 + $0x38] sm:$0xff]  ;;  %s7039_s15 = scalar_lea.vmem %s9219_s3, %s7032_s12  ;;  %s9291_s13 = smov 33  }
  0x19   : > { %v6910_v5 = vld [vmem:[%s6848_s18 + $0x10] sm:$0xff]  ;;  %v6951_v7 = vld [vmem:[%s6848_s18 + $0x40] sm:$0xff]  ;;  %v6954_v8 = vld [vmem:[%s6848_s18 + $0x48] sm:$0xff] }
  0x1a   : > { %v6965_v9 = vld [vmem:[%s6848_s18 + $0x50] sm:$0xff]  ;;  %v922_v10 = vld [vmem:[%s6848_s18 + $0x58] sm:$0xff]  ;;  %v1048_v38 = vld [vmem:[%s7039_s15] sm:$0xff] }
  0x1c   : > { %936 = vrot.lane.b32.xlu0 %v6861_v2, %s6749_s19  ;;  %873 = vrot.lane.b32.xlu1 %v6851_v0, %s6750_s20 }
  0x20   : > { %875 = vrot.lane.b32.xlu0 %v6861_v2, %s6750_s20  ;;  %938 = vrot.lane.b32.xlu1 %v6868_v3, %s6749_s19 }
  0x24   : > { %940 = vrot.lane.b32.xlu0 %v6875_v4, %s6749_s19  ;;  %871 = vrot.lane.b32.xlu1 %v6854_v1, %s6750_s20 }
  0x28   : > { %814 = vrot.lane.b32.xlu1 %v6861_v2, %s6751_s21  ;;  %812 = vrot.lane.b32.xlu0 %v6851_v0, %s6751_s21 }
  0x2c   : > { %879 = vrot.lane.b32.xlu1 %v6875_v4, %s6750_s20  ;;  %877 = vrot.lane.b32.xlu0 %v6868_v3, %s6750_s20 }
  0x30   : > { %810 = vrot.lane.b32.xlu0 %v6854_v1, %s6751_s21  ;;  %751 = vrot.lane.b32.xlu1 %v6851_v0, %s6752_s22 }
  0x34   : > { %753 = vrot.lane.b32.xlu0 %v6861_v2, %s6752_s22  ;;  %816 = vrot.lane.b32.xlu1 %v6868_v3, %s6751_s21 }
  0x38   : > { %818 = vrot.lane.b32.xlu0 %v6875_v4, %s6751_s21  ;;  %749 = vrot.lane.b32.xlu1 %v6854_v1, %s6752_s22 }
  0x3c   : > { %755 = vrot.lane.b32.xlu0 %v6868_v3, %s6752_s22  ;;  %757 = vrot.lane.b32.xlu1 %v6875_v4, %s6752_s22 }
  0x40   : > { %676 = vrot.lane.b32.xlu1 %v6851_v0, %s6753_s23  ;;  %674 = vrot.lane.b32.xlu0 %v6854_v1, %s6753_s23 }
  0x44   : > { %672 = vrot.lane.b32.xlu0 %v6910_v5, %s6753_s23  ;;  %613 = vrot.lane.b32.xlu1 %v6854_v1, %s6754_s24 }
  0x48   : > { %615 = vrot.lane.b32.xlu0 %v6851_v0, %s6754_s24  ;;  %678 = vrot.lane.b32.xlu1 %v6861_v2, %s6753_s23 }
  0x4c   : > { %680 = vrot.lane.b32.xlu0 %v6868_v3, %s6753_s23  ;;  %611 = vrot.lane.b32.xlu1 %v6910_v5, %s6754_s24 }
  0x50   : > { %554 = vrot.lane.b32.xlu1 %v6851_v0, %s6755_s25  ;;  %552 = vrot.lane.b32.xlu0 %v6854_v1, %s6755_s25 }
  0x54   : > { %619 = vrot.lane.b32.xlu1 %v6868_v3, %s6754_s24  ;;  %617 = vrot.lane.b32.xlu0 %v6861_v2, %s6754_s24 }
  0x58   : > { %550 = vrot.lane.b32.xlu0 %v6910_v5, %s6755_s25  ;;  %491 = vrot.lane.b32.xlu1 %v6854_v1, %s9225_s26 }
  0x5c   : > { %493 = vrot.lane.b32.xlu0 %v6851_v0, %s9225_s26  ;;  %556 = vrot.lane.b32.xlu1 %v6861_v2, %s6755_s25 }
  0x60   : > { %558 = vrot.lane.b32.xlu0 %v6868_v3, %s6755_s25  ;;  %489 = vrot.lane.b32.xlu1 %v6910_v5, %s9225_s26 }
  0x64   : > { %495 = vrot.lane.b32.xlu0 %v6861_v2, %s9225_s26  ;;  %497 = vrot.lane.b32.xlu1 %v6868_v3, %s9225_s26 }
  0x68   : > { %942 = vrot.lane.b32.xlu0 %v6951_v7, %s6749_s19  ;;  %944 = vrot.lane.b32.xlu1 %v6954_v8, %s6749_s19 }
  0x6c   : > { %881 = vrot.lane.b32.xlu0 %v6951_v7, %s6750_s20  ;;  %883 = vrot.lane.b32.xlu1 %v6954_v8, %s6750_s20 }
  0x70   : > { %946 = vrot.lane.b32.xlu0 %v6965_v9, %s6749_s19  ;;  %948 = vrot.lane.b32.xlu1 %v922_v10, %s6749_s19 }
  0x74   : > { %820 = vrot.lane.b32.xlu0 %v6951_v7, %s6751_s21  ;;  %822 = vrot.lane.b32.xlu1 %v6954_v8, %s6751_s21 }
  0x78   : > { %885 = vrot.lane.b32.xlu0 %v6965_v9, %s6750_s20  ;;  %887 = vrot.lane.b32.xlu1 %v922_v10, %s6750_s20 }
  0x7c   : > { %759 = vrot.lane.b32.xlu0 %v6951_v7, %s6752_s22  ;;  %761 = vrot.lane.b32.xlu1 %v6954_v8, %s6752_s22 }
  0x80   : > { %824 = vrot.lane.b32.xlu0 %v6965_v9, %s6751_s21  ;;  %826 = vrot.lane.b32.xlu1 %v922_v10, %s6751_s21 }
  0x84   : > { %763 = vrot.lane.b32.xlu0 %v6965_v9, %s6752_s22  ;;  %765 = vrot.lane.b32.xlu1 %v922_v10, %s6752_s22 }
  0x88   : > { %682 = vrot.lane.b32.xlu0 %v6875_v4, %s6753_s23  ;;  %684 = vrot.lane.b32.xlu1 %v6951_v7, %s6753_s23 }
  0x8a   : > { %v935_v11 = vpop.permute.xlu0 %934  ;;  %v933_v12 = vpop.permute.xlu1 %932 }
  0x8b   : > { %v951_v16 = vsel %vm950_vm0, %v933_v12, %v935_v11 }
  0x8c   : > { %621 = vrot.lane.b32.xlu0 %v6875_v4, %s6754_s24  ;;  %623 = vrot.lane.b32.xlu1 %v6951_v7, %s6754_s24 }
  0x8e   : > { %v937_v13 = vpop.permute.xlu0 %936  ;;  %v874_v14 = vpop.permute.xlu1 %873 }
  0x8f   : > { %v952_v15 = vsel %vm950_vm0, %v935_v11, %v937_v13 }
  0x90   : > { %1072 = vmatprep.subr.mxu0 %v952_v15  ;;  %686 = vrot.lane.b32.xlu0 %v6954_v8, %s6753_s23 }
  0x91   : > { %688 = vrot.lane.b32.xlu1 %v6965_v9, %s6753_s23  ;;  %1073 = vmatpush1.msra.mxu0 %v951_v16 }
  0x92   : > { %v876_v17 = vpop.permute.xlu0 %875  ;;  %v939_v18 = vpop.permute.xlu1 %938 }
  0x93   : > { %v891_v19 = vsel %vm889_vm1, %v874_v14, %v876_v17  ;;  %v953_v24 = vsel %vm950_vm0, %v937_v13, %v939_v18 }
  0x94   : > { %1074 = vmatprep.subr.mxu0 %v891_v19  ;;  %560 = vrot.lane.b32.xlu0 %v6875_v4, %s6755_s25 }
  0x95   : > { %562 = vrot.lane.b32.xlu1 %v6951_v7, %s6755_s25 }
  0x96   : > { %v7007_v20 = vpop.permute.xlu0 %940  ;;  %v872_v21 = vpop.permute.xlu1 %871 }
  0x97   : > { %v890_v22 = vsel %vm889_vm1, %v872_v21, %v874_v14  ;;  %v954_v23 = vsel %vm950_vm0, %v939_v18, %v7007_v20 }
  0x98   : > { %1075 = vmatpush1.msra.mxu0 %v890_v22  ;;  %1143 = vmatprep.subr.mxu1 %v954_v23 }
  0x99   : > { %625 = vrot.lane.b32.xlu0 %v6954_v8, %s6754_s24  ;;  %627 = vrot.lane.b32.xlu1 %v6965_v9, %s6754_s24 }
  0x9a   : > { %1144 = vmatpush1.msra.mxu1 %v953_v24  ;;  %v815_v25 = vpop.permute.xlu1 %814  ;;  %v813_v26 = vpop.permute.xlu0 %812 }
  0x9b   : > { %v830_v27 = vsel %vm828_vm2, %v813_v26, %v815_v25 }
  0x9c   : > { %1076 = vmatprep.subr.mxu0 %v830_v27 }
  0x9d   : > { %499 = vrot.lane.b32.xlu0 %v6875_v4, %s9225_s26  ;;  %501 = vrot.lane.b32.xlu1 %v6951_v7, %s9225_s26 }
  0x9e   : > { %v7022_v29 = vpop.permute.xlu1 %879  ;;  %v878_v30 = vpop.permute.xlu0 %877 }
  0x9f   : > { %v893_v31 = vsel %vm889_vm1, %v878_v30, %v7022_v29  ;;  %v892_v32 = vsel %vm889_vm1, %v876_v17, %v878_v30 }
  0xa0   : > { %1145 = vmatprep.subr.mxu1 %v893_v31 }
  0xa1   : > { %564 = vrot.lane.b32.xlu0 %v6954_v8, %s6755_s25  ;;  %566 = vrot.lane.b32.xlu1 %v6965_v9, %s6755_s25 }
  0xa2   : > { %1146 = vmatpush1.msra.mxu1 %v892_v32  ;;  %v811_v33 = vpop.permute.xlu0 %810  ;;  %v752_v34 = vpop.permute.xlu1 %751 }
  0xa3   : > { %v829_v35 = vsel %vm828_vm2, %v811_v33, %v813_v26 }
  0xa4   : > { %1077 = vmatpush1.msra.mxu0 %v829_v35 }
  0xa5   : > { %503 = vrot.lane.b32.xlu0 %v6954_v8, %s9225_s26  ;;  %505 = vrot.lane.b32.xlu1 %v6965_v9, %s9225_s26 }
  0xa6   : > { %v754_v36 = vpop.permute.xlu0 %753  ;;  %v817_v37 = vpop.permute.xlu1 %816 }
  0xa7   : > { %v769_v39 = vsel %vm767_vm3, %v752_v34, %v754_v36  ;;  %v831_v44 = vsel %vm828_vm2, %v815_v25, %v817_v37 }
  0xa8   : > { %1078 = vmatprep.subr.mxu0 %v769_v39 }
  0xa9   : > { %1051 = vperm.xlu0 %6641, %v1048_v38   ;;  %1545 = vrot.lane.b32.xlu1 %v9227_v6, %s6754_s24 }
  0xaa   : > { %v7049_v40 = vpop.permute.xlu0 %818  ;;  %v750_v41 = vpop.permute.xlu1 %749 }
  0xab   : > { %v768_v42 = vsel %vm767_vm3, %v750_v41, %v752_v34  ;;  %v832_v43 = vsel %vm828_vm2, %v817_v37, %v7049_v40  ;;  %v2278_v37 = vld [vmem:[%s6848_s18 + $0x8] sm:$0xff] }
  0xac   : > { %1079 = vmatpush1.msra.mxu0 %v768_v42  ;;  %1147 = vmatprep.subr.mxu1 %v832_v43 }
  0xad   : > { %1148 = vmatpush1.msra.mxu1 %v831_v44  ;;  %1080 = vmatprep.subr.mxu0 %v6851_v0 }
  0xae   : > { %v756_v45 = vpop.permute.xlu0 %755  ;;  %v7056_v46 = vpop.permute.xlu1 %757  ;;  %1081 = vmatpush1.msra.mxu0 %v6854_v1  ;;  %1605 = vrot.lane.b32.xlu0 %v9227_v6, %s6753_s23 }
  0xaf   : > { %v771_v47 = vsel %vm767_vm3, %v756_v45, %v7056_v46  ;;  %v770_v48 = vsel %vm767_vm3, %v754_v36, %v756_v45  ;;  %1425 = vrot.lane.b32.xlu1 %v9227_v6, %s9225_s26  ;;  %s7119_s26 = scalar_lea.vmem %s9218_s2, %s7032_s12 }
  0xb0   : > { %1149 = vmatprep.subr.mxu1 %v771_v47  ;;  %v7126_v25 = vld [vmem:[%s7119_s26] sm:$0xff] }
  0xb1   : > { %1150 = vmatpush1.msra.mxu1 %v770_v48 }
  0xb2   : > { %v677_v49 = vpop.permute.xlu1 %676  ;;  %v675_v50 = vpop.permute.xlu0 %674  ;;  %1151 = vmatprep.subr.mxu1 %v6868_v3  ;;  %1485 = vrot.lane.b32.xlu0 %v9227_v6, %s6755_s25 }
  0xb3   : > { %v692_v51 = vsel %vm690_vm4, %v675_v50, %v677_v49  ;;  %1152 = vmatpush1.msra.mxu1 %v6861_v2  ;;  %1877 = vrot.lane.b32.xlu1 %v9227_v6, %s6749_s19 }
  0xb4   : > { %1082 = vmatprep.subr.mxu0 %v692_v51 }
  0xb6   : > { %v673_v52 = vpop.permute.xlu0 %672  ;;  %v614_v53 = vpop.permute.xlu1 %613  ;;  %2648 = vrot.lane.b32.xlu0 %v6861_v2, %s6759_s16 }
  0xb7   : > { %v691_v54 = vsel %vm690_vm4, %v673_v52, %v675_v50  ;;  %1817 = vrot.lane.b32.xlu1 %v9227_v6, %s6750_s20 }
  0xb8   : > { %1083 = vmatpush1.msra.mxu0 %v691_v54 }
  0xba   : > { %v616_v55 = vpop.permute.xlu0 %615  ;;  %v679_v56 = vpop.permute.xlu1 %678  ;;  %2646 = vrot.lane.b32.xlu0 %v6851_v0, %s6759_s16 }
  0xbb   : > { %v631_v57 = vsel %vm629_vm5, %v614_v53, %v616_v55  ;;  %2650 = vrot.lane.b32.xlu1 %v6868_v3, %s6759_s16  ;;  %v693_v62 = vsel %vm690_vm4, %v677_v49, %v679_v56 }
  0xbc   : > { %1084 = vmatprep.subr.mxu0 %v631_v57 }
  0xbe   : > { %v7083_v58 = vpop.permute.xlu0 %680  ;;  %v612_v59 = vpop.permute.xlu1 %611  ;;  %1757 = vrot.lane.b32.xlu0 %v9227_v6, %s6751_s21 }
  0xbf   : > { %v630_v60 = vsel %vm629_vm5, %v612_v59, %v614_v53  ;;  %v694_v61 = vsel %vm690_vm4, %v679_v56, %v7083_v58  ;;  %2572 = vrot.lane.b32.xlu1 %v6851_v0, %s6760_s17 }
  0xc0   : > { %1085 = vmatpush1.msra.mxu0 %v630_v60  ;;  %1153 = vmatprep.subr.mxu1 %v694_v61 }
  0xc1   : > { %1154 = vmatpush1.msra.mxu1 %v693_v62 }
  0xc2   : > { %v555_v63 = vpop.permute.xlu1 %554  ;;  %v553_v10 = vpop.permute.xlu0 %552  ;;  %1697 = vrot.lane.b32.xlu0 %v9227_v6, %s6752_s22 }
  0xc3   : > { %v570_v11 = vsel %vm568_vm6, %v553_v10, %v555_v63  ;;  %2570 = vrot.lane.b32.xlu1 %v6854_v1, %s6760_s17 }
  0xc4   : > { %1086 = vmatprep.subr.mxu0 %v570_v11 }
  0xc6   : > { %v7098_v12 = vpop.permute.xlu1 %619  ;;  %v618_v13 = vpop.permute.xlu0 %617  ;;  %2574 = vrot.lane.b32.xlu0 %v6861_v2, %s6760_s17 }
  0xc7   : > { %v633_v14 = vsel %vm629_vm5, %v618_v13, %v7098_v12  ;;  %v632_v15 = vsel %vm629_vm5, %v616_v55, %v618_v13  ;;  %2514 = vrot.lane.b32.xlu1 %v6861_v2, %s6759_s16 }
  0xc8   : > { %1155 = vmatprep.subr.mxu1 %v633_v14 }
  0xc9   : > { %1156 = vmatpush1.msra.mxu1 %v632_v15 }
  0xca   : > { %v551_v16 = vpop.permute.xlu0 %550  ;;  %v492_v17 = vpop.permute.xlu1 %491  ;;  %2512 = vrot.lane.b32.xlu0 %v6851_v0, %s6759_s16 }
  0xcb   : > { %v569_v18 = vsel %vm568_vm6, %v551_v16, %v553_v10  ;;  %2436 = vrot.lane.b32.xlu1 %v6854_v1, %s6760_s17 }
  0xcc   : > { %1087 = vmatpush1.msra.mxu0 %v569_v18 }
  0xce   : > { %v494_v19 = vpop.permute.xlu0 %493  ;;  %v557_v21 = vpop.permute.xlu1 %556  ;;  %2510 = vrot.lane.b32.xlu0 %v6854_v1, %s6759_s16 }
  0xcf   : > { %v509_v22 = vsel %vm507_vm7, %v492_v17, %v494_v19  ;;  %2434 = vrot.lane.b32.xlu1 %v6910_v5, %s6760_s17  ;;  %v571_v28 = vsel %vm568_vm6, %v555_v63, %v557_v21 }
  0xd0   : > { %1088 = vmatprep.subr.mxu0 %v509_v22 }
  0xd2   : > { %v7123_v23 = vpop.permute.xlu0 %558  ;;  %v490_v24 = vpop.permute.xlu1 %489  ;;  %2438 = vrot.lane.b32.xlu0 %v6851_v0, %s6760_s17 }
  0xd3   : > { %v508_v26 = vsel %vm507_vm7, %v490_v24, %v492_v17  ;;  %v572_v27 = vsel %vm568_vm6, %v557_v21, %v7123_v23  ;;  %2377 = vrot.lane.b32.xlu1 %v6851_v0, %s6759_s16 }
  0xd4   : > { %1089 = vmatpush1.msra.mxu0 %v508_v26  ;;  %1157 = vmatprep.subr.mxu1 %v572_v27 }
  0xd5   : > { %1158 = vmatpush1.msra.mxu1 %v571_v28  ;;  %6537 = vmatmul.mubr.msk.f32.vlgmr.msra.gmra.mxu0 %vm1054_vm8, %v7126_v25 }
  0xd6   : > { %v496_v30 = vpop.permute.xlu0 %495  ;;  %v7138_v31 = vpop.permute.xlu1 %497  ;;  %1264 = vmatprep.mubr.f32.mxu0 %v9227_v6  ;;  %2375 = vrot.lane.b32.xlu0 %v6854_v1, %s6759_s16 }
  0xd7   : > { %v511_v0 = vsel %vm507_vm7, %v496_v30, %v7138_v31  ;;  %v510_v32 = vsel %vm507_vm7, %v494_v19, %v496_v30  ;;  %2298 = vrot.lane.b32.xlu1 %v6910_v5, %s6760_s17 }
  0xd8   : > { %1159 = vmatprep.subr.mxu1 %v511_v0 }
  0xd9   : > { %1160 = vmatpush1.msra.mxu1 %v510_v32 }
  0xda   : > { %v943_v33 = vpop.permute.xlu0 %942  ;;  %6538 = vmatmul.mubr.msk.f32.vlgmr.msra.gmra.mxu1 %vm1054_vm8, %v7126_v25  ;;  %v945_v34 = vpop.permute.xlu1 %944  ;;  %2373 = vrot.lane.b32.xlu0 %v6910_v5, %s6759_s16 }
  0xdb   : > { %v956_v35 = vsel %vm950_vm0, %v943_v33, %v945_v34  ;;  %v955_v36 = vsel %vm950_vm0, %v7007_v20, %v943_v33  ;;  %1335 = vmatprep.mubr.f32.mxu1 %v9227_v6  ;;  %2652 = vrot.lane.b32.xlu1 %v6875_v4, %s6759_s16 }
  0xdc   : > { %1214 = vmatprep.subr.mxu0 %v956_v35 }
  0xdd   : > { %1215 = vmatpush1.msra.mxu0 %v955_v36  ;;  %v1351_v36 = vlaneseq }
  0xde   : > { %v882_v38 = vpop.permute.xlu0 %881  ;;  %v884_v39 = vpop.permute.xlu1 %883  ;;  %2300 = vrot.lane.b32.xlu0 %v6854_v1, %s6760_s17 }
  0xdf   : > { %v895_v5 = vsel %vm889_vm1, %v882_v38, %v884_v39  ;;  %v894_v41 = vsel %vm889_vm1, %v7022_v29, %v882_v38  ;;  %2296 = vrot.lane.b32.xlu1 %v2278_v37, %s6760_s17  ;;  %v7235_v37 = vshrl.u32 %v1351_v36, 7 }
  0xe0   : > { %1216 = vmatprep.subr.mxu0 %v895_v5  ;;  %v7243_v5 = vld [vmem:[%s9216_s0] sm:$0xff] }
  0xe1   : > { %1217 = vmatpush1.msra.mxu0 %v894_v41  ;;  %v1353_v38 = vsub.s32 0, %v7235_v37 }
  0xe2   : > { %v947_v20 = vpop.permute.xlu0 %946  ;;  %v949_v42 = vpop.permute.xlu1 %948  ;;  %2654 = vrot.lane.b32.xlu0 %v6951_v7, %s6759_s16 }
  0xe3   : > { %v958_v43 = vsel %vm950_vm0, %v947_v20, %v949_v42  ;;  %v957_v44 = vsel %vm950_vm0, %v945_v34, %v947_v20  ;;  %2658 = vrot.lane.b32.xlu1 %v6965_v9, %s6759_s16  ;;  %v7247_v42 = vrot.slane %v7243_v5, %v1353_v38 }
  0xe4   : > { %1285 = vmatprep.subr.mxu1 %v958_v43 }
  0xe5   : > { %1286 = vmatpush1.msra.mxu1 %v957_v44  ;;  %9288 = vst [vmem:[#allocation4_spill] sm:$0xff] %v7247_v42 }
  0xe6   : > { %v821_v1 = vpop.permute.xlu0 %820  ;;  %v823_v29 = vpop.permute.xlu1 %822  ;;  %2656 = vrot.lane.b32.xlu0 %v6954_v8, %s6759_s16 }
  0xe7   : > { %v834_v45 = vsel %vm828_vm2, %v821_v1, %v823_v29  ;;  %v833_v47 = vsel %vm828_vm2, %v7049_v40, %v821_v1  ;;  %2578 = vrot.lane.b32.xlu1 %v6875_v4, %s6760_s17 }
  0xe8   : > { %1218 = vmatprep.subr.mxu0 %v834_v45 }
  0xe9   : > { %1219 = vmatpush1.msra.mxu0 %v833_v47 }
  0xea   : > { %v886_v48 = vpop.permute.xlu0 %885  ;;  %v888_v49 = vpop.permute.xlu1 %887  ;;  %2576 = vrot.lane.b32.xlu0 %v6868_v3, %s6760_s17 }
  0xeb   : > { %v897_v50 = vsel %vm889_vm1, %v886_v48, %v888_v49  ;;  %v896_v51 = vsel %vm889_vm1, %v884_v39, %v886_v48  ;;  %2518 = vrot.lane.b32.xlu1 %v6875_v4, %s6759_s16 }
  0xec   : > { %1287 = vmatprep.subr.mxu1 %v897_v50 }
  0xed   : > { %1288 = vmatpush1.msra.mxu1 %v896_v51 }
  0xee   : > { %v760_v40 = vpop.permute.xlu0 %759  ;;  %v762_v52 = vpop.permute.xlu1 %761  ;;  %2516 = vrot.lane.b32.xlu0 %v6868_v3, %s6759_s16 }
  0xef   : > { %v773_v53 = vsel %vm767_vm3, %v760_v40, %v762_v52  ;;  %v772_v54 = vsel %vm767_vm3, %v7056_v46, %v760_v40  ;;  %2582 = vrot.lane.b32.xlu1 %v6954_v8, %s6760_s17 }
  0xf0   : > { %1220 = vmatprep.subr.mxu0 %v773_v53 }
  0xf1   : > { %1221 = vmatpush1.msra.mxu0 %v772_v54 }
  0xf2   : > { %v825_v55 = vpop.permute.xlu0 %824  ;;  %v827_v56 = vpop.permute.xlu1 %826  ;;  %1222 = vmatprep.subr.mxu0 %v6951_v7  ;;  %2580 = vrot.lane.b32.xlu0 %v6951_v7, %s6760_s17 }
  0xf3   : > { %v836_v57 = vsel %vm828_vm2, %v825_v55, %v827_v56  ;;  %v835_v59 = vsel %vm828_vm2, %v823_v29, %v825_v55  ;;  %1223 = vmatpush1.msra.mxu0 %v6875_v4  ;;  %2522 = vrot.lane.b32.xlu1 %v6954_v8, %s6759_s16 }
  0xf4   : > { %1289 = vmatprep.subr.mxu1 %v836_v57  ;;  %v1357_v57 = vsub.s32 1, %v7235_v37 }
  0xf5   : > { %1290 = vmatpush1.msra.mxu1 %v835_v59 }
  0xf6   : > { %v764_v46 = vpop.permute.xlu0 %763  ;;  %v766_v60 = vpop.permute.xlu1 %765  ;;  %2520 = vrot.lane.b32.xlu0 %v6951_v7, %s6759_s16 }
  0xf7   : > { %v775_v61 = vsel %vm767_vm3, %v764_v46, %v766_v60  ;;  %v774_v62 = vsel %vm767_vm3, %v762_v52, %v764_v46  ;;  %2442 = vrot.lane.b32.xlu1 %v6868_v3, %s6760_s17 }
  0xf8   : > { %1291 = vmatprep.subr.mxu1 %v775_v61  ;;  %v7303_v61 = vrot.slane %v7243_v5, %v1357_v57 }
  0xf9   : > { %1292 = vmatpush1.msra.mxu1 %v774_v62 }
  0xfa   : > { %v683_v4 = vpop.permute.xlu0 %682  ;;  %v685_v63 = vpop.permute.xlu1 %684  ;;  %1293 = vmatprep.subr.mxu1 %v6965_v9  ;;  %2440 = vrot.lane.b32.xlu0 %v6861_v2, %s6760_s17  ;;  %9290 = vst [vmem:[#allocation6_spill] sm:$0xff] %v7303_v61 }
  0xfb   : > { %v696_v10 = vsel %vm690_vm4, %v683_v4, %v685_v63  ;;  %v695_v7 = vsel %vm690_vm4, %v7083_v58, %v683_v4  ;;  %1294 = vmatpush1.msra.mxu1 %v6954_v8 }
  0xfc   : > { %1224 = vmatprep.subr.mxu0 %v696_v10 }
  0xfd   : > { %1225 = vmatpush1.msra.mxu0 %v695_v7 }
  0xfe   : > { %v622_v11 = vpop.permute.xlu0 %621  ;;  %v624_v3 = vpop.permute.xlu1 %623 }
  0xff   : > { %v635_v13 = vsel %vm629_vm5, %v622_v11, %v624_v3  ;;  %v634_v14 = vsel %vm629_vm5, %v7098_v12, %v622_v11 }
 0x100   : > { %1226 = vmatprep.subr.mxu0 %v635_v13  ;;  %v1365_v13 = vsub.s32 3, %v7235_v37 }
 0x101   : > { %1227 = vmatpush1.msra.mxu0 %v634_v14 }
 0x102   : > { %v687_v9 = vpop.permute.xlu0 %686 }
 0x103   : > { %v689_v2 = vpop.permute.xlu1 %688  ;;  %v697_v15 = vsel %vm690_vm4, %v685_v63, %v687_v9 }
 0x104   : > { %v698_v16 = vsel %vm690_vm4, %v687_v9, %v689_v2 }
 0x105   : > { %1295 = vmatprep.subr.mxu1 %v698_v16 }
 0x106   : > { %1296 = vmatpush1.msra.mxu1 %v697_v15  ;;  %v561_v8 = vpop.permute.xlu0 %560  ;;  %v7343_v15 = vrot.slane %v7243_v5, %v1365_v13 }
 0x107   : > { %v563_v58 = vpop.permute.xlu1 %562  ;;  %v573_v17 = vsel %vm568_vm6, %v7123_v23, %v561_v8 }
 0x108   : > { %v574_v18 = vsel %vm568_vm6, %v561_v8, %v563_v58  ;;  %9292 = vst [vmem:[#allocation7_spill] sm:$0xff] %v7343_v15 }
 0x109   : > { %1228 = vmatprep.subr.mxu0 %v574_v18 }
 0x10a   : > { %1229 = vmatpush1.msra.mxu0 %v573_v17 }
 0x10b   : > { %v626_v12 = vpop.permute.xlu0 %625  ;;  %v628_v19 = vpop.permute.xlu1 %627 }
 0x10c   : > { %v637_v21 = vsel %vm629_vm5, %v626_v12, %v628_v19  ;;  %v636_v22 = vsel %vm629_vm5, %v624_v3, %v626_v12  ;;  %v1369_v19 = vsub.s32 4, %v7235_v37 }
 0x10d   : > { %1297 = vmatprep.subr.mxu1 %v637_v21 }
 0x10e   : > { %1298 = vmatpush1.msra.mxu1 %v636_v22 }
 0x10f   : > { %v500_v24 = vpop.permute.xlu0 %499  ;;  %v502_v26 = vpop.permute.xlu1 %501 }
 0x110   : > { %v513_v27 = vsel %vm507_vm7, %v500_v24, %v502_v26  ;;  %v512_v28 = vsel %vm507_vm7, %v7138_v31, %v500_v24 }
 0x111   : > { %1230 = vmatprep.subr.mxu0 %v513_v27  ;;  %v7379_v27 = vrot.slane %v7243_v5, %v1369_v19 }
 0x112   : > { %1231 = vmatpush1.msra.mxu0 %v512_v28 }
 0x113   : > { %v565_v23 = vpop.permute.xlu0 %564  ;;  %6539 = vmatmul.mubr.msk.f32.vlgmr.msra.gmra.mxu0 %vm1054_vm8, %v7126_v25  ;;  %v567_v30 = vpop.permute.xlu1 %566  ;;  %9293 = vst [vmem:[#allocation8_spill] sm:$0xff] %v7379_v27 }
 0x114   : > { %v576_v0 = vsel %vm568_vm6, %v565_v23, %v567_v30  ;;  %v575_v32 = vsel %vm568_vm6, %v563_v58, %v565_v23  ;;  %2049 = vmatprep.mubr.f32.mxu0 %v9227_v6 }
 0x115   : > { %1299 = vmatprep.subr.mxu1 %v576_v0  ;;  %v1377_v0 = vsub.s32 6, %v7235_v37 }
 0x116   : > { %1300 = vmatpush1.msra.mxu1 %v575_v32 }
 0x117   : > { %v504_v33 = vpop.permute.xlu0 %503  ;;  %v506_v34 = vpop.permute.xlu1 %505 }
 0x118   : > { %v515_v35 = vsel %vm507_vm7, %v504_v33, %v506_v34  ;;  %v514_v31 = vsel %vm507_vm7, %v502_v26, %v504_v33 }
 0x119   : > { %1301 = vmatprep.subr.mxu1 %v515_v35  ;;  %v7399_v35 = vrot.slane %v7243_v5, %v1377_v0  ;;  %v7477_v0 = vld [vmem:[%s6848_s18 + $0x28] sm:$0xff] }
 0x11a   : > { %1302 = vmatpush1.msra.mxu1 %v514_v31 }
 0x11b   : > { %6540 = vmatmul.mubr.msk.f32.vlgmr.msra.gmra.mxu1 %vm1054_vm8, %v7126_v25  ;;  %v1361_v25 = vsub.s32 2, %v7235_v37  ;;  %v7264_v50 = vpop.permute.xlu1 %1545  ;;  %9294 = vst [vmem:[#allocation9_spill] sm:$0xff] %v7399_v35 }
 0x11c   : > { %2120 = vmatprep.mubr.f32.mxu1 %v9227_v6 }
 0x11d   : > { %v7257_v47 = vrot.slane %v7243_v5, %v1361_v25 }
 0x11f   : > { %9289 = vst [vmem:[#allocation5_spill] sm:$0xff] %v7257_v47 }
 0x121   : > { %v7276_v40 = vpop.permute.xlu1 %1425 }
 0x124   : > { %v7238_v39 = vpop.permute.xlu0 %1051 }
 0x125   : > { %v7284_v53 = vpop.permute.xlu1 %1877 }
 0x128   : > { %v7253_v29 = vpop.permute.xlu0 %1605 }
 0x129   : > { %v7294_v59 = vpop.permute.xlu1 %1817 }
 0x12c   : > { %v7266_v51 = vpop.permute.xlu0 %1485 }
 0x12d   : > { %v7312_v4 = vpop.permute.xlu1 %2650 }
 0x130   : > { %v7278_v52 = vpop.permute.xlu0 %2648 }
 0x131   : > { %v7320_v10 = vpop.permute.xlu1 %2572 }
 0x134   : > { %v7286_v55 = vpop.permute.xlu0 %2646 }
 0x135   : > { %v7334_v14 = vpop.permute.xlu1 %2570 }
 0x138   : > { %v7300_v46 = vpop.permute.xlu0 %1757 }
 0x139   : > { %v7345_v16 = vpop.permute.xlu1 %2514 }
 0x13c   : > { %v7314_v63 = vpop.permute.xlu0 %1697 }
 0x13d   : > { %v7360_v17 = vpop.permute.xlu1 %2436 }
 0x140   : > { %v7326_v7 = vpop.permute.xlu0 %2574 }
 0x141   : > { %v7370_v22 = vpop.permute.xlu1 %2434 }
 0x144   : > { %v7336_v9 = vpop.permute.xlu0 %2512 }
 0x145   : > { %v7385_v28 = vpop.permute.xlu1 %2377 }
 0x148   : > { %v7351_v8 = vpop.permute.xlu0 %2510 }
 0x149   : > { %v7401_v31 = vpop.permute.xlu1 %2298 }
 0x14c   : > { %v7362_v18 = vpop.permute.xlu0 %2438 }
 0x150   : > { %v7376_v24 = vpop.permute.xlu0 %2375 }
 0x154   : > { %v7391_v32 = vpop.permute.xlu0 %2373 }
 0x158   : > { %v7407_v36 = vpop.permute.xlu0 %2300 }
 0x195   : > { %v1124_v41 = vpop.f32.mrf.mxu0 }
 0x196   : > { %v1125_v20 = vadd.f32 %v1124_v41, %v7238_v39  ;;  %v7416_v41 = vpop.permute.xlu1 %2652 }
 0x197   : > { %v1126_v54 = vpop.f32.mrf.mxu0  ;;  %9295 = vst [vmem:[#allocation10_spill] sm:$0xff] %v7416_v41 }
 0x198   : > { %v1342_v43 = vmax.f32 %v1125_v20, 0.0  ;;  %v1127_v56 = vadd.f32 %v1126_v54, %v7238_v39  ;;  %v7418_v20 = vpop.permute.xlu0 %2654 }
 0x199   : > { %9296 = vst [vmem:[#allocation11_spill] sm:$0xff] %v7418_v20 }
 0x19a   : > { %v7251_v44 = vmul.f32 %v7247_v42, %v1342_v43  ;;  %v1195_v1 = vpop.f32.mrf.mxu1  ;;  %v1343_v60 = vmax.f32 %v1127_v56, 0.0  ;;  %v7549_v42 = vld [vmem:[%s6848_s18 + $0x40] sm:$0xff] }
 0x19b   : > { %v1196_v45 = vadd.f32 %v1195_v1, %v7238_v39  ;;  %v1373_v1 = vsub.s32 5, %v7235_v37  ;;  %9313 = vst [vmem:[#allocation28_spill] sm:$0xff] %v7549_v42 }
 0x19c   : > { %1861 = vrot.lane.b32.xlu0 %v7251_v44, %s6749_s19  ;;  %v7310_v62 = vmul.f32 %v7303_v61, %v1343_v60  ;;  %v1197_v11 = vpop.f32.mrf.mxu1 }
 0x19d   : > { %v1344_v48 = vmax.f32 %v1196_v45, 0.0  ;;  %v1198_v3 = vadd.f32 %v1197_v11, %v7238_v39  ;;  %v7426_v45 = vpop.permute.xlu1 %2296  ;;  %v7435_v56 = vrot.slane %v7243_v5, %v1373_v1 }
 0x19f   : > { %v7262_v49 = vmul.f32 %v7257_v47, %v1344_v48  ;;  %v1345_v2 = vmax.f32 %v1198_v3, 0.0  ;;  %v7432_v48 = vpop.permute.xlu0 %2656  ;;  %9298 = vst [vmem:[#allocation13_spill] sm:$0xff] %v7435_v56 }
 0x1a0   : > { %9297 = vst [vmem:[#allocation12_spill] sm:$0xff] %v7432_v48 }
 0x1a1   : > { %1805 = vrot.lane.b32.xlu0 %v7262_v49, %s6750_s20  ;;  %1865 = vrot.lane.b32.xlu1 %v7262_v49, %s6749_s19  ;;  %v7354_v58 = vmul.f32 %v7343_v15, %v1345_v2  ;;  %v7437_v57 = vpop.permute.xlu1 %2658  ;;  %v7540_v15 = vld [vmem:[%s6848_s18 + $0x20] sm:$0xff] }
 0x1a2   : > { %9299 = vst [vmem:[#allocation14_spill] sm:$0xff] %v7437_v57 }
 0x1a3   : > { %v7446_v11 = vpop.permute.xlu0 %2576 }
 0x1a4   : > { %9300 = vst [vmem:[#allocation15_spill] sm:$0xff] %v7446_v11 }
 0x1a5   : > { %1741 = vrot.lane.b32.xlu0 %v7251_v44, %s6751_s21  ;;  %1801 = vrot.lane.b32.xlu1 %v7251_v44, %s6750_s20  ;;  %v7452_v3 = vpop.permute.xlu1 %2578 }
 0x1a6   : > { %9301 = vst [vmem:[#allocation16_spill] sm:$0xff] %v7452_v3 }
 0x1a7   : > { %v7458_v13 = vpop.permute.xlu0 %2516 }
 0x1a8   : > { %9302 = vst [vmem:[#allocation17_spill] sm:$0xff] %v7458_v13 }
 0x1a9   : > { %1685 = vrot.lane.b32.xlu0 %v7262_v49, %s6752_s22  ;;  %1745 = vrot.lane.b32.xlu1 %v7262_v49, %s6751_s21  ;;  %v7460_v2 = vpop.permute.xlu1 %2518 }
 0x1aa   : > { %9303 = vst [vmem:[#allocation18_spill] sm:$0xff] %v7460_v2 }
 0x1ab   : > { %v7466_v19 = vpop.permute.xlu0 %2580 }
 0x1ac   : > { %9304 = vst [vmem:[#allocation19_spill] sm:$0xff] %v7466_v19 }
 0x1ad   : > { %1607 = vrot.lane.b32.xlu0 %v7251_v44, %s6753_s23  ;;  %1681 = vrot.lane.b32.xlu1 %v7251_v44, %s6752_s22 }
 0x1b1   : > { %1487 = vrot.lane.b32.xlu0 %v7251_v44, %s6755_s25  ;;  %1547 = vrot.lane.b32.xlu1 %v7251_v44, %s6754_s24 }
 0x1b5   : > { %1611 = vrot.lane.b32.xlu0 %v7262_v49, %s6753_s23  ;;  %1427 = vrot.lane.b32.xlu1 %v7251_v44, %s9291_s13 }
 0x1b9   : > { %1551 = vrot.lane.b32.xlu0 %v7262_v49, %s6754_s24  ;;  %1863 = vrot.lane.b32.xlu1 %v7310_v62, %s6749_s19 }
 0x1bd   : > { %1491 = vrot.lane.b32.xlu0 %v7262_v49, %s6755_s25  ;;  %1803 = vrot.lane.b32.xlu1 %v7310_v62, %s6750_s20 }
 0x1c1   : > { %1431 = vrot.lane.b32.xlu0 %v7262_v49, %s9291_s13  ;;  %1683 = vrot.lane.b32.xlu1 %v7310_v62, %s6752_s22 }
 0x1c5   : > { %1743 = vrot.lane.b32.xlu0 %v7310_v62, %s6751_s21  ;;  %1609 = vrot.lane.b32.xlu1 %v7310_v62, %s6753_s23 }
 0x1c9   : > { %1549 = vrot.lane.b32.xlu0 %v7310_v62, %s6754_s24  ;;  %1489 = vrot.lane.b32.xlu1 %v7310_v62, %s6755_s25 }
 0x1cd   : > { %1429 = vrot.lane.b32.xlu0 %v7310_v62, %s9291_s13  ;;  %1867 = vrot.lane.b32.xlu1 %v7354_v58, %s6749_s19 }
 0x1d1   : > { %1807 = vrot.lane.b32.xlu0 %v7354_v58, %s6750_s20  ;;  %1613 = vrot.lane.b32.xlu1 %v7354_v58, %s6753_s23 }
 0x1d3   : > { %v1266_v12 = vpop.f32.mrf.mxu0 }
 0x1d4   : > { %v1267_v21 = vadd.f32 %v1266_v12, %v7238_v39 }
 0x1d5   : > { %1747 = vrot.lane.b32.xlu0 %v7354_v58, %s6751_s21  ;;  %1553 = vrot.lane.b32.xlu1 %v7354_v58, %s6754_s24  ;;  %v1268_v25 = vpop.f32.mrf.mxu0 }
 0x1d6   : > { %v1346_v26 = vmax.f32 %v1267_v21, 0.0  ;;  %v1269_v43 = vadd.f32 %v1268_v25, %v7238_v39  ;;  %v7482_v25 = vpop.permute.xlu0 %2520 }
 0x1d7   : > { %9307 = vst [vmem:[#allocation22_spill] sm:$0xff] %v7482_v25  ;;  %v7560_v25 = vld [vmem:[%s6848_s18 + $0x58] sm:$0xff] }
 0x1d8   : > { %v7388_v23 = vmul.f32 %v7379_v27, %v1346_v26  ;;  %v1347_v54 = vmax.f32 %v1269_v43, 0.0  ;;  %v1381_v26 = vsub.s32 7, %v7235_v37  ;;  %9314 = vst [vmem:[#allocation29_spill] sm:$0xff] %v7560_v25 }
 0x1d9   : > { %1687 = vrot.lane.b32.xlu0 %v7354_v58, %s6752_s22  ;;  %1493 = vrot.lane.b32.xlu1 %v7354_v58, %s6755_s25 }
 0x1da   : > { %v7444_v60 = vmul.f32 %v7435_v56, %v1347_v54  ;;  %v7506_v54 = vld [vmem:[%s6848_s18 + $0x38] sm:$0xff] }
 0x1db   : > { %v1337_v30 = vpop.f32.mrf.mxu1  ;;  %9311 = vst [vmem:[#allocation26_spill] sm:$0xff] %v7506_v54 }
 0x1dc   : > { %v1338_v33 = vadd.f32 %v1337_v30, %v7238_v39  ;;  %v7474_v30 = vpop.permute.xlu1 %2582 }
 0x1dd   : > { %1433 = vrot.lane.b32.xlu1 %v7354_v58, %s9291_s13  ;;  %1869 = vrot.lane.b32.xlu0 %v7388_v23, %s6749_s19  ;;  %v1339_v12 = vpop.f32.mrf.mxu1  ;;  %9305 = vst [vmem:[#allocation20_spill] sm:$0xff] %v7474_v30  ;;  %v7572_v30 = vld [vmem:[%s6848_s18 + $0x50] sm:$0xff] }
 0x1de   : > { %v1348_v34 = vmax.f32 %v1338_v33, 0.0  ;;  %v1340_v21 = vadd.f32 %v1339_v12, %v7238_v39  ;;  %9315 = vst [vmem:[#allocation30_spill] sm:$0xff] %v7572_v30 }
 0x1e0   : > { %v7410_v38 = vmul.f32 %v7399_v35, %v1348_v34  ;;  %v1349_v33 = vmax.f32 %v1340_v21, 0.0  ;;  %v7480_v34 = vrot.slane %v7243_v5, %v1381_v26  ;;  %v7491_v39 = vpop.permute.xlu1 %2522  ;;  %v7497_v5 = vpop.permute.xlu0 %2440  ;;  %v7533_v35 = vld [vmem:[%s6848_s18 + $0x30] sm:$0xff] }
 0x1e1   : > { %1809 = vrot.lane.b32.xlu1 %v7388_v23, %s6750_s20  ;;  %1615 = vrot.lane.b32.xlu0 %v7388_v23, %s6753_s23  ;;  %9308 = vst [vmem:[#allocation23_spill] sm:$0xff] %v7491_v39  ;;  %9309 = vst [vmem:[#allocation24_spill] sm:$0xff] %v7497_v5 }
 0x1e2   : > { %9306 = vst [vmem:[#allocation21_spill] sm:$0xff] %v7480_v34  ;;  %v7489_v37 = vmul.f32 %v7480_v34, %v1349_v33  ;;  %9312 = vst [vmem:[#allocation27_spill] sm:$0xff] %v7533_v35 }
 0x1e4   : > { %v7503_v43 = vpop.permute.xlu1 %2442 }
 0x1e5   : > { %1555 = vrot.lane.b32.xlu0 %v7388_v23, %s6754_s24  ;;  %1873 = vrot.lane.b32.xlu1 %v7410_v38, %s6749_s19  ;;  %9310 = vst [vmem:[#allocation25_spill] sm:$0xff] %v7503_v43 }
 0x1e9   : > { %1495 = vrot.lane.b32.xlu0 %v7388_v23, %s6755_s25  ;;  %1749 = vrot.lane.b32.xlu1 %v7388_v23, %s6751_s21 }
 0x1ed   : > { %1435 = vrot.lane.b32.xlu0 %v7388_v23, %s9291_s13  ;;  %1813 = vrot.lane.b32.xlu1 %v7410_v38, %s6750_s20 }
 0x1f1   : > { %1499 = vrot.lane.b32.xlu0 %v7410_v38, %s6755_s25  ;;  %1689 = vrot.lane.b32.xlu1 %v7388_v23, %s6752_s22 }
 0x1f5   : > { %1871 = vrot.lane.b32.xlu0 %v7444_v60, %s6749_s19  ;;  %1753 = vrot.lane.b32.xlu1 %v7410_v38, %s6751_s21 }
 0x1f9   : > { %1811 = vrot.lane.b32.xlu0 %v7444_v60, %s6750_s20  ;;  %1693 = vrot.lane.b32.xlu1 %v7410_v38, %s6752_s22 }
 0x1fd   : > { %1751 = vrot.lane.b32.xlu0 %v7444_v60, %s6751_s21  ;;  %1619 = vrot.lane.b32.xlu1 %v7410_v38, %s6753_s23 }
 0x201   : > { %1691 = vrot.lane.b32.xlu0 %v7444_v60, %s6752_s22  ;;  %1559 = vrot.lane.b32.xlu1 %v7410_v38, %s6754_s24 }
 0x205   : > { %2379 = vrot.lane.b32.xlu0 %v7477_v0, %s6759_s16  ;;  %1439 = vrot.lane.b32.xlu1 %v7410_v38, %s9291_s13 }
 0x209   : > { %1875 = vrot.lane.b32.xlu0 %v7489_v37, %s6749_s19  ;;  %1617 = vrot.lane.b32.xlu1 %v7444_v60, %s6753_s23  ;;  %s6763_s19 = smov 112  }
 0x20d   : > { %1815 = vrot.lane.b32.xlu0 %v7489_v37, %s6750_s20  ;;  %1557 = vrot.lane.b32.xlu1 %v7444_v60, %s6754_s24  ;;  %s6535_s20 = sshll.u32 %s9401_s28, 5 }
 0x20e   : > { %v1862_v1 = vpop.permute.xlu0 %1861 }
 0x211   : > { %2444 = vrot.lane.b32.xlu0 %v7506_v54, %s6760_s17  ;;  %1497 = vrot.lane.b32.xlu1 %v7444_v60, %s6755_s25 }
 0x213   : > { %v7512_v12 = vpop.permute.xlu0 %1805  ;;  %v7514_v21 = vpop.permute.xlu1 %1865 }
 0x215   : > { %1621 = vrot.lane.b32.xlu0 %v7489_v37, %s6753_s23  ;;  %1437 = vrot.lane.b32.xlu1 %v7444_v60, %s9291_s13 }
 0x217   : > { %v1742_v26 = vpop.permute.xlu0 %1741  ;;  %v1802_v33 = vpop.permute.xlu1 %1801 }
 0x219   : > { %1561 = vrot.lane.b32.xlu0 %v7489_v37, %s6754_s24  ;;  %1755 = vrot.lane.b32.xlu1 %v7489_v37, %s6751_s21  ;;  %s7633_s21 = scalar_lea.vmem %s9220_s4, %s7032_s12  ;;  %s8159_s24 = scalar_lea.vmem %s9221_s5, %s7032_s12 }
 0x21a   : > { %s8170_s12 = sshll.u32 %s9403_s27, 3  ;;  %s6762_s27 = smov 8  }
 0x21b   : > { %v7524_v6 = vpop.permute.xlu0 %1685  ;;  %v7526_v34 = vpop.permute.xlu1 %1745 }
 0x21d   : > { %1441 = vrot.lane.b32.xlu0 %v7489_v37, %s9291_s13  ;;  %1695 = vrot.lane.b32.xlu1 %v7489_v37, %s6752_s22  ;;  %s446_s13 = scalar_lea.vmem %s9223_s7, %s8170_s12 }
 0x21f   : > { %v1608_v56 = vpop.permute.xlu0 %1607  ;;  %v1682_v27 = vpop.permute.xlu1 %1681 }
 0x221   : > { %2383 = vrot.lane.b32.xlu0 %v7506_v54, %s6759_s16  ;;  %2381 = vrot.lane.b32.xlu1 %v7533_v35, %s6759_s16 }
 0x223   : > { %v7542_v47 = vpop.permute.xlu0 %1487  ;;  %v1548_v61 = vpop.permute.xlu1 %1547 }
 0x225   : > { %2302 = vrot.lane.b32.xlu0 %v7540_v15, %s6760_s17  ;;  %1501 = vrot.lane.b32.xlu1 %v7489_v37, %s6755_s25  ;;  %s6761_s25 = smov 120  }
 0x227   : > { %v7551_v5 = vpop.permute.xlu0 %1611  ;;  %v7553_v43 = vpop.permute.xlu1 %1427 }
 0x229   : > { %2306 = vrot.lane.b32.xlu0 %v7533_v35, %s6760_s17  ;;  %2446 = vrot.lane.b32.xlu1 %v7549_v42, %s6760_s17 }
 0x22b   : > { %v7562_v39 = vpop.permute.xlu0 %1551  ;;  %v1864_v13 = vpop.permute.xlu1 %1863 }
 0x22c   : > { %v1880_v2 = vsel %vm950_vm0, %v1864_v13, %v7514_v21  ;;  %v1879_v19 = vsel %vm950_vm0, %v1862_v1, %v1864_v13 }
 0x22d   : > { %2660 = vrot.lane.b32.xlu0 %v7560_v25, %s6759_s16  ;;  %2385 = vrot.lane.b32.xlu1 %v7549_v42, %s6759_s16 }
 0x22e   : > { %1999 = vmatprep.subr.mxu0 %v1880_v2 }
 0x22f   : > { %2000 = vmatpush1.msra.mxu0 %v1879_v19  ;;  %v7574_v11 = vpop.permute.xlu0 %1491  ;;  %v1804_v3 = vpop.permute.xlu1 %1803  ;;  %v7590_v19 = vld [vmem:[%s6848_s18 + $0x48] sm:$0xff] }
 0x230   : > { %v1820_v35 = vsel %vm889_vm1, %v1804_v3, %v7512_v12  ;;  %v1819_v13 = vsel %vm889_vm1, %v1802_v33, %v1804_v3  ;;  %9316 = vst [vmem:[#allocation31_spill] sm:$0xff] %v7590_v19  ;;  %v2636_v3 = vld [vmem:[%s6848_s18 + $0x60] sm:$0xff] }
 0x231   : > { %2584 = vrot.lane.b32.xlu0 %v7572_v30, %s6760_s17  ;;  %2304 = vrot.lane.b32.xlu1 %v7477_v0, %s6760_s17 }
 0x232   : > { %2001 = vmatprep.subr.mxu0 %v1820_v35 }
 0x233   : > { %2002 = vmatpush1.msra.mxu0 %v1819_v13  ;;  %v7583_v2 = vpop.permute.xlu0 %1431  ;;  %v1684_v1 = vpop.permute.xlu1 %1683 }
 0x234   : > { %v1699_v20 = vsel %vm767_vm3, %v1682_v27, %v1684_v1  ;;  %v1623_v27 = vsel %vm690_vm4, %v7253_v29, %v1608_v56 }
 0x235   : > { %2524 = vrot.lane.b32.xlu0 %v7572_v30, %s6759_s16  ;;  %2308 = vrot.lane.b32.xlu1 %v7506_v54, %s6760_s17  ;;  %v1700_v54 = vsel %vm767_vm3, %v1684_v1, %v7524_v6 }
 0x237   : > { %v1744_v33 = vpop.permute.xlu0 %1743  ;;  %v7593_v48 = vpop.permute.xlu1 %1609 }
 0x238   : > { %v1760_v57 = vsel %vm828_vm2, %v1744_v33, %v7526_v34  ;;  %v1759_v35 = vsel %vm828_vm2, %v1742_v26, %v1744_v33  ;;  %v1443_v33 = vsel %vm507_vm7, %v7276_v40, %v7553_v43 }
 0x239   : > { %2448 = vrot.lane.b32.xlu0 %v7590_v19, %s6760_s17  ;;  %2662 = vrot.lane.b32.xlu1 %v2636_v3, %s6759_s16  ;;  %v7647_v3 = vld [vmem:[%s7633_s21] sm:$0xff] }
 0x23a   : > { %2003 = vmatprep.subr.mxu0 %v1760_v57 }
 0x23b   : > { %2004 = vmatpush1.msra.mxu0 %v1759_v35  ;;  %v7601_v13 = vpop.permute.xlu0 %1549  ;;  %v7605_v41 = vpop.permute.xlu1 %1489 }
 0x23c   : > { %2005 = vmatprep.subr.mxu0 %v1700_v54  ;;  %v1624_v54 = vsel %vm690_vm4, %v1608_v56, %v7593_v48  ;;  %v1504_v56 = vsel %vm568_vm6, %v7542_v47, %v7605_v41 }
 0x23d   : > { %2006 = vmatpush1.msra.mxu0 %v1699_v20  ;;  %2387 = vrot.lane.b32.xlu0 %v7590_v19, %s6759_s16  ;;  %v1564_v20 = vsel %vm629_vm5, %v1548_v61, %v7601_v13 }
 0x23e   : > { %2586 = vrot.lane.b32.xlu1 %v7560_v25, %s6760_s17  ;;  %2007 = vmatprep.subr.mxu0 %v7310_v62  ;;  %v6546_v62 = vld [vmem:[%s7039_s15 + $0x8] sm:$0xff] }
 0x23f   : > { %2008 = vmatpush1.msra.mxu0 %v7251_v44  ;;  %v7614_v57 = vpop.permute.xlu0 %1429  ;;  %v1868_v26 = vpop.permute.xlu1 %1867  ;;  %v1563_v44 = vsel %vm629_vm5, %v7264_v50, %v1548_v61  ;;  %v1503_v50 = vsel %vm568_vm6, %v7266_v51, %v7542_v47  ;;  %v9317_v47 = vmov 0.0  }
 0x240   : > { %2009 = vmatprep.subr.mxu0 %v1624_v54  ;;  %v1444_v61 = vsel %vm507_vm7, %v7553_v43, %v7614_v57 }
 0x241   : > { %2010 = vmatpush1.msra.mxu0 %v1623_v27  ;;  %2310 = vrot.lane.b32.xlu0 %v7549_v42, %s6760_s17 }
 0x242   : > { %2526 = vrot.lane.b32.xlu1 %v7560_v25, %s6759_s16  ;;  %2011 = vmatprep.subr.mxu0 %v1564_v20 }
 0x243   : > { %2012 = vmatpush1.msra.mxu0 %v1563_v44  ;;  %v1808_v29 = vpop.permute.xlu0 %1807  ;;  %v7638_v1 = vpop.permute.xlu1 %1613  ;;  %v1881_v44 = vsel %vm950_vm0, %v7514_v21, %v1868_v26 }
 0x244   : > { %2013 = vmatprep.subr.mxu0 %v1504_v56 }
 0x245   : > { %2014 = vmatpush1.msra.mxu0 %v1503_v50  ;;  %2766 = vperm.xlu0 %6641, %v6546_v62  }
 0x246   : > { %2450 = vrot.lane.b32.xlu1 %v7572_v30, %s6760_s17  ;;  %2015 = vmatprep.subr.mxu0 %v1444_v61  ;;  %v1821_v61 = vsel %vm889_vm1, %v7512_v12, %v1808_v29 }
 0x247   : > { %2016 = vmatpush1.msra.mxu0 %v1443_v33  ;;  %v1748_v35 = vpop.permute.xlu0 %1747  ;;  %v7654_v54 = vpop.permute.xlu1 %1553 }
 0x248   : > { %6541 = vmatmul.mubr.msk.f32.vlgmr.msra.gmra.mxu0 %vm1054_vm8, %v7647_v3 }
 0x249   : > { %2191 = vmatprep.mubr.f32.mxu0 %v9317_v47  ;;  %6643 = vrot.lane.b32.xlu0 %v9317_v47, %s6760_s17 }
 0x24a   : > { %2389 = vrot.lane.b32.xlu1 %v7572_v30, %s6759_s16 }
 0x24b   : > { %v1688_v51 = vpop.permute.xlu0 %1687  ;;  %v7661_v27 = vpop.permute.xlu1 %1493 }
 0x24c   : > { %v1701_v42 = vsel %vm767_vm3, %v7524_v6, %v1688_v51  ;;  %v1625_v6 = vsel %vm690_vm4, %v7593_v48, %v7551_v5 }
 0x24d   : > { %6658 = vrot.lane.b32.xlu0 %v9317_v47, %s6759_s16 }
 0x24e   : > { %2312 = vrot.lane.b32.xlu1 %v7590_v19, %s6760_s17 }
 0x24f   : > { %v1870_v20 = vpop.permute.xlu0 %1869  ;;  %v7665_v40 = vpop.permute.xlu1 %1433 }
 0x250   : > { %v1882_v43 = vsel %vm950_vm0, %v1868_v26, %v1870_v20  ;;  %v1761_v26 = vsel %vm828_vm2, %v7526_v34, %v1748_v35  ;;  %v1626_v34 = vsel %vm690_vm4, %v7551_v5, %v7638_v1 }
 0x251   : > { %2070 = vmatprep.subr.mxu1 %v1882_v43 }
 0x252   : > { %2071 = vmatpush1.msra.mxu1 %v1881_v44  ;;  %6648 = vrot.lane.b32.xlu1 %v9317_v47, %s6759_s16 }
 0x253   : > { %v7670_v62 = vpop.permute.xlu0 %1615  ;;  %v1810_v56 = vpop.permute.xlu1 %1809 }
 0x254   : > { %v1822_v50 = vsel %vm889_vm1, %v1808_v29, %v1810_v56 }
 0x255   : > { %2072 = vmatprep.subr.mxu1 %v1822_v50 }
 0x256   : > { %2073 = vmatpush1.msra.mxu1 %v1821_v61  ;;  %6653 = vrot.lane.b32.xlu1 %v9317_v47, %s6760_s17 }
 0x257   : > { %v7675_v33 = vpop.permute.xlu0 %1555  ;;  %v7677_v30 = vpop.permute.xlu1 %1873 }
 0x25b   : > { %v7679_v25 = vpop.permute.xlu0 %1495  ;;  %v1750_v43 = vpop.permute.xlu1 %1749 }
 0x25c   : > { %v1762_v21 = vsel %vm828_vm2, %v1748_v35, %v1750_v43 }
 0x25d   : > { %2074 = vmatprep.subr.mxu1 %v1762_v21 }
 0x25e   : > { %2075 = vmatpush1.msra.mxu1 %v1761_v26 }
 0x25f   : > { %v7684_v44 = vpop.permute.xlu0 %1435  ;;  %v7686_v50 = vpop.permute.xlu1 %1813 }
 0x263   : > { %v7688_v12 = vpop.permute.xlu0 %1499  ;;  %v1690_v29 = vpop.permute.xlu1 %1689 }
 0x264   : > { %v1702_v61 = vsel %vm767_vm3, %v1688_v51, %v1690_v29  ;;  %v1506_v51 = vsel %vm568_vm6, %v7574_v11, %v7661_v27 }
 0x265   : > { %2076 = vmatprep.subr.mxu1 %v1702_v61 }
 0x266   : > { %2077 = vmatpush1.msra.mxu1 %v1701_v42  ;;  %v1566_v42 = vsel %vm629_vm5, %v7562_v39, %v7654_v54 }
 0x267   : > { %v1872_v19 = vpop.permute.xlu0 %1871  ;;  %2078 = vmatprep.subr.mxu1 %v7354_v58  ;;  %v7694_v21 = vpop.permute.xlu1 %1753 }
 0x268   : > { %2079 = vmatpush1.msra.mxu1 %v7262_v49  ;;  %v1884_v35 = vsel %vm950_vm0, %v1872_v19, %v7677_v30  ;;  %v1883_v26 = vsel %vm950_vm0, %v1870_v20, %v1872_v19  ;;  %v1565_v19 = vsel %vm629_vm5, %v7601_v13, %v7562_v39  ;;  %v1505_v20 = vsel %vm568_vm6, %v7605_v41, %v7574_v11 }
 0x269   : > { %2080 = vmatprep.subr.mxu1 %v1626_v34  ;;  %2141 = vmatprep.subr.mxu0 %v1884_v35  ;;  %v1446_v39 = vsel %vm507_vm7, %v7583_v2, %v7665_v40 }
 0x26a   : > { %2081 = vmatpush1.msra.mxu1 %v1625_v6  ;;  %2142 = vmatpush1.msra.mxu0 %v1883_v26 }
 0x26b   : > { %v1812_v49 = vpop.permute.xlu0 %1811  ;;  %2082 = vmatprep.subr.mxu1 %v1566_v42  ;;  %v7709_v58 = vpop.permute.xlu1 %1693 }
 0x26c   : > { %2083 = vmatpush1.msra.mxu1 %v1565_v19  ;;  %v1824_v48 = vsel %vm889_vm1, %v1812_v49, %v7686_v50  ;;  %v1823_v5 = vsel %vm889_vm1, %v1810_v56, %v1812_v49  ;;  %v1445_v56 = vsel %vm507_vm7, %v7614_v57, %v7583_v2 }
 0x26d   : > { %2084 = vmatprep.subr.mxu1 %v1506_v51  ;;  %2143 = vmatprep.subr.mxu0 %v1824_v48 }
 0x26e   : > { %2085 = vmatpush1.msra.mxu1 %v1505_v20  ;;  %2144 = vmatpush1.msra.mxu0 %v1823_v5 }
 0x26f   : > { %v1752_v13 = vpop.permute.xlu0 %1751  ;;  %2086 = vmatprep.subr.mxu1 %v1446_v39  ;;  %v7726_v61 = vpop.permute.xlu1 %1619 }
 0x270   : > { %2087 = vmatpush1.msra.mxu1 %v1445_v56  ;;  %v1764_v34 = vsel %vm828_vm2, %v1752_v13, %v7694_v21  ;;  %v1763_v41 = vsel %vm828_vm2, %v1750_v43, %v1752_v13  ;;  %v2665_v13 = vsel %vm2391_vm9, %v7278_v52, %v7312_v4 }
 0x271   : > { %2145 = vmatprep.subr.mxu0 %v1764_v34  ;;  %6542 = vmatmul.mubr.msk.f32.vlgmr.msra.gmra.mxu1 %vm1054_vm8, %v7647_v3 }
 0x272   : > { %2146 = vmatpush1.msra.mxu0 %v1763_v41  ;;  %2262 = vmatprep.mubr.f32.mxu1 %v9317_v47  ;;  %v2529_v41 = vsel %vm2391_vm9, %v7336_v9, %v7345_v16 }
 0x273   : > { %v1692_v11 = vpop.permute.xlu0 %1691  ;;  %v7737_v35 = vpop.permute.xlu1 %1559 }
 0x274   : > { %v1704_v26 = vsel %vm767_vm3, %v1692_v11, %v7709_v58  ;;  %v1703_v2 = vsel %vm767_vm3, %v1690_v29, %v1692_v11 }
 0x275   : > { %2147 = vmatprep.subr.mxu0 %v1704_v26  ;;  %v2528_v26 = vsel %vm2391_vm9, %v7351_v8, %v7336_v9  ;;  %v2453_v8 = vsel %vm2314_vm10, %v7360_v17, %v7362_v18 }
 0x276   : > { %2148 = vmatpush1.msra.mxu0 %v1703_v2  ;;  %v2393_v2 = vsel %vm2391_vm9, %v7376_v24, %v7385_v28 }
 0x277   : > { %v7742_v57 = vpop.permute.xlu0 %2379  ;;  %2149 = vmatprep.subr.mxu0 %v7444_v60  ;;  %v7745_v43 = vpop.permute.xlu1 %1439  ;;  %v1627_v60 = vsel %vm690_vm4, %v7638_v1, %v7670_v62  ;;  %v1567_v1 = vsel %vm629_vm5, %v7654_v54, %v7675_v33 }
 0x278   : > { %2150 = vmatpush1.msra.mxu0 %v7388_v23 }
 0x27b   : > { %v1876_v6 = vpop.permute.xlu0 %1875  ;;  %v7748_v42 = vpop.permute.xlu1 %1617 }
 0x27c   : > { %v1628_v49 = vsel %vm690_vm4, %v7670_v62, %v7748_v42  ;;  %v1886_v29 = vsel %vm950_vm0, %v1876_v6, %v7284_v53  ;;  %v1885_v19 = vsel %vm950_vm0, %v7677_v30, %v1876_v6  ;;  %v2392_v6 = vsel %vm2391_vm9, %v7391_v32, %v7376_v24 }
 0x27d   : > { %2151 = vmatprep.subr.mxu0 %v1628_v49  ;;  %2212 = vmatprep.subr.mxu1 %v1886_v29  ;;  %v7872_v29 = vld [vmem:[%s7119_s26 + $0x8] sm:$0xff] }
 0x27e   : > { %2152 = vmatpush1.msra.mxu0 %v1627_v60  ;;  %2213 = vmatpush1.msra.mxu1 %v1885_v19  ;;  %v2315_v19 = vsel %vm2314_vm10, %v7426_v45, %v7401_v31  ;;  %v9321_v45 = vld [vmem:[#allocation12_spill] sm:$0xff] }
 0x27f   : > { %v1816_v23 = vpop.permute.xlu0 %1815  ;;  %v7760_v51 = vpop.permute.xlu1 %1557 }
 0x280   : > { %v1568_v48 = vsel %vm629_vm5, %v7675_v33, %v7760_v51  ;;  %v1826_v53 = vsel %vm889_vm1, %v1816_v23, %v7294_v59  ;;  %v1825_v30 = vsel %vm889_vm1, %v7686_v50, %v1816_v23  ;;  %v1507_v59 = vsel %vm568_vm6, %v7661_v27, %v7679_v25  ;;  %v9318_v23 = vld [vmem:[#allocation11_spill] sm:$0xff] }
 0x281   : > { %2153 = vmatprep.subr.mxu0 %v1568_v48  ;;  %2214 = vmatprep.subr.mxu1 %v1826_v53  ;;  %v1447_v33 = vsel %vm507_vm7, %v7665_v40, %v7684_v44 }
 0x282   : > { %2154 = vmatpush1.msra.mxu0 %v1567_v1  ;;  %2215 = vmatpush1.msra.mxu1 %v1825_v30  ;;  %v2668_v1 = vsel %vm2391_vm9, %v9318_v23, %v9321_v45 }
 0x283   : > { %v7772_v62 = vpop.permute.xlu0 %2444  ;;  %v7774_v5 = vpop.permute.xlu1 %1497 }
 0x284   : > { %v1508_v20 = vsel %vm568_vm6, %v7679_v25, %v7774_v5  ;;  %v2664_v25 = vsel %vm2391_vm9, %v7286_v55, %v7278_v52  ;;  %v2589_v52 = vsel %vm2314_vm10, %v7320_v10, %v7326_v7  ;;  %v2588_v55 = vsel %vm2314_vm10, %v7334_v14, %v7320_v10  ;;  %v7822_v10 = vld [vmem:[%s6848_s18 + $0x18] sm:$0xff] }
 0x285   : > { %2155 = vmatprep.subr.mxu0 %v1508_v20  ;;  %v1509_v24 = vsel %vm568_vm6, %v7774_v5, %v7688_v12  ;;  %v9322_v20 = vld [vmem:[#allocation26_spill] sm:$0xff] }
 0x286   : > { %2156 = vmatpush1.msra.mxu0 %v1507_v59  ;;  %v9323_v59 = vld [vmem:[#allocation31_spill] sm:$0xff] }
 0x287   : > { %v1622_v50 = vpop.permute.xlu0 %1621  ;;  %v7782_v39 = vpop.permute.xlu1 %1437 }
 0x288   : > { %v1448_v54 = vsel %vm507_vm7, %v7684_v44, %v7782_v39  ;;  %v1630_v9 = vsel %vm690_vm4, %v7726_v61, %v1622_v50  ;;  %v9324_v50 = vld [vmem:[#allocation27_spill] sm:$0xff] }
 0x289   : > { %2157 = vmatprep.subr.mxu0 %v1448_v54  ;;  %v9327_v54 = vld [vmem:[#allocation15_spill] sm:$0xff] }
 0x28a   : > { %2158 = vmatpush1.msra.mxu0 %v1447_v33  ;;  %v9328_v33 = vld [vmem:[#allocation20_spill] sm:$0xff] }
 0x28b   : > { %v1562_v27 = vpop.permute.xlu0 %1561  ;;  %6543 = vmatmul.mubr.msk.f32.vlgmr.msra.gmra.mxu0 %vm1054_vm8, %v7647_v3  ;;  %2786 = vmatprep.subr.mxu0 %v2665_v13  ;;  %v1756_v56 = vpop.permute.xlu1 %1755  ;;  %v9329_v13 = vld [vmem:[#allocation19_spill] sm:$0xff] }
 0x28c   : > { %2787 = vmatpush1.msra.mxu0 %v2664_v25  ;;  %v1766_v40 = vsel %vm828_vm2, %v1756_v56, %v7300_v46  ;;  %v1765_v44 = vsel %vm828_vm2, %v7694_v21, %v1756_v56  ;;  %2836 = vmatprep.mubr.f32.mxu0 %v9317_v47  ;;  %v2593_v25 = vsel %vm2314_vm10, %v9329_v13, %v9328_v33 }
 0x28d   : > { %2216 = vmatprep.subr.mxu1 %v1766_v40  ;;  %2788 = vmatprep.subr.mxu0 %v7477_v0 }
 0x28e   : > { %2217 = vmatpush1.msra.mxu1 %v1765_v44  ;;  %2789 = vmatpush1.msra.mxu0 %v7540_v15  ;;  %v9330_v44 = vld [vmem:[#allocation18_spill] sm:$0xff] }
 0x28f   : > { %v1442_v46 = vpop.permute.xlu0 %1441  ;;  %2790 = vmatprep.subr.mxu0 %v2589_v52  ;;  %v1696_v21 = vpop.permute.xlu1 %1695  ;;  %v9331_v52 = vld [vmem:[#allocation17_spill] sm:$0xff] }
 0x290   : > { %2791 = vmatpush1.msra.mxu0 %v2588_v55  ;;  %v1706_v34 = vsel %vm767_vm3, %v1696_v21, %v7314_v63  ;;  %v1705_v11 = vsel %vm767_vm3, %v7709_v58, %v1696_v21  ;;  %v1570_v58 = vsel %vm629_vm5, %v7737_v35, %v1562_v27  ;;  %v1450_v32 = vsel %vm507_vm7, %v7745_v43, %v1442_v46  ;;  %v9332_v46 = vld [vmem:[#allocation23_spill] sm:$0xff]  ;;  %v9333_v21 = vld [vmem:[#allocation22_spill] sm:$0xff] }
 0x291   : > { %2218 = vmatprep.subr.mxu1 %v1706_v34  ;;  %2792 = vmatprep.subr.mxu0 %v2529_v41  ;;  %v2590_v27 = vsel %vm2314_vm10, %v7326_v7, %v9327_v54  ;;  %v2531_v55 = vsel %vm2391_vm9, %v9331_v52, %v9330_v44  ;;  %v2533_v34 = vsel %vm2391_vm9, %v9333_v21, %v9332_v46 }
 0x292   : > { %2219 = vmatpush1.msra.mxu1 %v1705_v11  ;;  %2793 = vmatpush1.msra.mxu0 %v2528_v26  ;;  %v2530_v7 = vsel %vm2391_vm9, %v7345_v16, %v9331_v52  ;;  %v2532_v11 = vsel %vm2391_vm9, %v9330_v44, %v9333_v21  ;;  %v9334_v26 = vld [vmem:[#allocation25_spill] sm:$0xff] }
 0x293   : > { %v7824_v14 = vpop.permute.xlu0 %2383  ;;  %2220 = vmatprep.subr.mxu1 %v7489_v37  ;;  %2794 = vmatprep.subr.mxu0 %v7540_v15  ;;  %v7828_v63 = vpop.permute.xlu1 %2381  ;;  %v2452_v37 = vsel %vm2314_vm10, %v7370_v22, %v7360_v17 }
 0x294   : > { %2221 = vmatpush1.msra.mxu1 %v7410_v38  ;;  %2795 = vmatpush1.msra.mxu0 %v7822_v10  ;;  %v1629_v38 = vsel %vm690_vm4, %v7748_v42, %v7726_v61  ;;  %v1569_v61 = vsel %vm629_vm5, %v7760_v51, %v7737_v35  ;;  %v7857_v42 = vld [vmem:[%s6848_s18 + $0x10] sm:$0xff]  ;;  %v2316_v35 = vsel %vm2314_vm10, %v7401_v31, %v7407_v36 }
 0x295   : > { %2222 = vmatprep.subr.mxu1 %v1630_v9  ;;  %2796 = vmatprep.subr.mxu0 %v2453_v8  ;;  %v9319_v51 = vld [vmem:[#allocation10_spill] sm:$0xff]  ;;  %v9335_v9 = vld [vmem:[#allocation24_spill] sm:$0xff] }
 0x296   : > { %2223 = vmatpush1.msra.mxu1 %v1629_v38  ;;  %2797 = vmatpush1.msra.mxu0 %v2452_v37  ;;  %v2667_v48 = vsel %vm2391_vm9, %v9319_v51, %v9318_v23  ;;  %v9320_v31 = vld [vmem:[#allocation14_spill] sm:$0xff]  ;;  %v2455_v8 = vsel %vm2314_vm10, %v9335_v9, %v9334_v26 }
 0x297   : > { %v7851_v17 = vpop.permute.xlu0 %2302  ;;  %2224 = vmatprep.subr.mxu1 %v1570_v58  ;;  %2798 = vmatprep.subr.mxu0 %v2393_v2  ;;  %v1502_v22 = vpop.permute.xlu1 %1501  ;;  %v2669_v30 = vsel %vm2391_vm9, %v9321_v45, %v9320_v31  ;;  %v2454_v58 = vsel %vm2314_vm10, %v7362_v18, %v9335_v9  ;;  %v2456_v2 = vsel %vm2314_vm10, %v9334_v26, %v7772_v62 }
 0x298   : > { %2225 = vmatpush1.msra.mxu1 %v1569_v61  ;;  %2799 = vmatpush1.msra.mxu0 %v2392_v6  ;;  %v1510_v49 = vsel %vm568_vm6, %v7688_v12, %v1502_v22  ;;  %v1449_v12 = vsel %vm507_vm7, %v7782_v39, %v7745_v43  ;;  %v2666_v43 = vsel %vm2391_vm9, %v7312_v4, %v9319_v51  ;;  %v9325_v39 = vld [vmem:[#allocation28_spill] sm:$0xff] }
 0x299   : > { %2226 = vmatprep.subr.mxu1 %v1510_v49  ;;  %2800 = vmatprep.subr.mxu0 %v7822_v10  ;;  %v2395_v22 = vsel %vm2391_vm9, %v7742_v57, %v7828_v63  ;;  %v2394_v61 = vsel %vm2391_vm9, %v7385_v28, %v7742_v57  ;;  %v2396_v18 = vsel %vm2391_vm9, %v7828_v63, %v7824_v14 }
 0x29a   : > { %2227 = vmatpush1.msra.mxu1 %v1509_v24  ;;  %2801 = vmatpush1.msra.mxu0 %v7857_v42  ;;  %v2317_v57 = vsel %vm2314_vm10, %v7407_v36, %v7851_v17 }
 0x29b   : > { %2228 = vmatprep.subr.mxu1 %v1450_v32  ;;  %2802 = vmatprep.subr.mxu0 %v2316_v35  ;;  %v7877_v60 = vpop.permute.xlu1 %2446  ;;  %v7885_v53 = vpop.permute.xlu0 %2306 }
 0x29c   : > { %2229 = vmatpush1.msra.mxu1 %v1449_v12  ;;  %2803 = vmatpush1.msra.mxu0 %v2315_v19  ;;  %v2457_v16 = vsel %vm2314_vm10, %v7772_v62, %v7877_v60  ;;  %v9337_v19 = vld [vmem:[#allocation30_spill] sm:$0xff] }
 0x29d   : > { %6547 = vmatmul.mubr.msk.f32.vlgmr.msra.gmra.mxu0 %vm1054_vm8, %v7872_v29  ;;  %2857 = vmatprep.subr.mxu1 %v2667_v48 }
 0x29e   : > { %2928 = vmatprep.subr.mxu0 %v2669_v30  ;;  %6544 = vmatmul.mubr.msk.f32.vlgmr.msra.gmra.mxu1 %vm1054_vm8, %v7647_v3  ;;  %v9326_v3 = vld [vmem:[#allocation16_spill] sm:$0xff] }
 0x29f   : > { %2858 = vmatpush1.msra.mxu1 %v2666_v43  ;;  %2929 = vmatpush1.msra.mxu0 %v2668_v1  ;;  %v7900_v5 = vpop.permute.xlu1 %2385  ;;  %v2591_v4 = vsel %vm2314_vm10, %v9327_v54, %v9326_v3  ;;  %v2592_v56 = vsel %vm2314_vm10, %v9326_v3, %v9329_v13  ;;  %v2661_v40 = vpop.permute.xlu0 %2660 }
 0x2a0   : > { %2859 = vmatprep.subr.mxu1 %v9322_v20  ;;  %2930 = vmatprep.subr.mxu0 %v9323_v59  ;;  %v2397_v38 = vsel %vm2391_vm9, %v7824_v14, %v7900_v5  ;;  %v2670_v36 = vsel %vm2391_vm9, %v9320_v31, %v2661_v40 }
 0x2a1   : > { %2860 = vmatpush1.msra.mxu1 %v9324_v50  ;;  %2931 = vmatpush1.msra.mxu0 %v9325_v39 }
 0x2a2   : > { %2861 = vmatprep.subr.mxu1 %v2591_v4  ;;  %2932 = vmatprep.subr.mxu0 %v2593_v25 }
 0x2a3   : > { %2862 = vmatpush1.msra.mxu1 %v2590_v27  ;;  %2933 = vmatpush1.msra.mxu0 %v2592_v56  ;;  %v2305_v41 = vpop.permute.xlu1 %2304  ;;  %v2585_v6 = vpop.permute.xlu0 %2584 }
 0x2a4   : > { %2863 = vmatprep.subr.mxu1 %v2531_v55  ;;  %2934 = vmatprep.subr.mxu0 %v2533_v34  ;;  %v2318_v49 = vsel %vm2314_vm10, %v7851_v17, %v2305_v41  ;;  %v2319_v28 = vsel %vm2314_vm10, %v2305_v41, %v7885_v53  ;;  %v9336_v17 = vld [vmem:[#allocation29_spill] sm:$0xff]  ;;  %v2594_v23 = vsel %vm2314_vm10, %v9328_v33, %v2585_v6  ;;  %v9339_v34 = vld [vmem:[#allocation6_spill] sm:$0xff] }
 0x2a5   : > { %2864 = vmatpush1.msra.mxu1 %v2530_v7  ;;  %2935 = vmatpush1.msra.mxu0 %v2532_v11 }
 0x2a6   : > { %2865 = vmatprep.subr.mxu1 %v9324_v50  ;;  %2936 = vmatprep.subr.mxu0 %v9325_v39 }
 0x2a7   : > { %2866 = vmatpush1.msra.mxu1 %v7477_v0  ;;  %2937 = vmatpush1.msra.mxu0 %v9322_v20  ;;  %v7940_v37 = vpop.permute.xlu1 %2308  ;;  %v2525_v14 = vpop.permute.xlu0 %2524 }
 0x2a8   : > { %2867 = vmatprep.subr.mxu1 %v2455_v8  ;;  %2938 = vmatprep.subr.mxu0 %v2457_v16  ;;  %v2320_v24 = vsel %vm2314_vm10, %v7885_v53, %v7940_v37  ;;  %v2534_v51 = vsel %vm2391_vm9, %v9332_v46, %v2525_v14  ;;  %v9340_v16 = vld [vmem:[#allocation5_spill] sm:$0xff] }
 0x2a9   : > { %2868 = vmatpush1.msra.mxu1 %v2454_v58  ;;  %2939 = vmatpush1.msra.mxu0 %v2456_v2 }
 0x2aa   : > { %2869 = vmatprep.subr.mxu1 %v2395_v22  ;;  %2940 = vmatprep.subr.mxu0 %v2397_v38 }
 0x2ab   : > { %2870 = vmatpush1.msra.mxu1 %v2394_v61  ;;  %2941 = vmatpush1.msra.mxu0 %v2396_v18  ;;  %v2663_v62 = vpop.permute.xlu1 %2662  ;;  %v2449_v35 = vpop.permute.xlu0 %2448  ;;  %v9341_v18 = vld [vmem:[#allocation7_spill] sm:$0xff] }
 0x2ac   : > { %2871 = vmatprep.subr.mxu1 %v7477_v0  ;;  %2942 = vmatprep.subr.mxu0 %v9322_v20  ;;  %v2671_v0 = vsel %vm2391_vm9, %v2661_v40, %v2663_v62  ;;  %v2458_v45 = vsel %vm2314_vm10, %v7877_v60, %v2449_v35  ;;  %v9338_v40 = vld [vmem:[#allocation4_spill] sm:$0xff] }
 0x2ad   : > { %2872 = vmatpush1.msra.mxu1 %v7540_v15  ;;  %2943 = vmatpush1.msra.mxu0 %v9324_v50 }
 0x2ae   : > { %2873 = vmatprep.subr.mxu1 %v2318_v49  ;;  %2944 = vmatprep.subr.mxu0 %v2320_v24  ;;  %v9342_v49 = vld [vmem:[#allocation8_spill] sm:$0xff] }
 0x2af   : > { %2874 = vmatpush1.msra.mxu1 %v2317_v57  ;;  %2907 = vmatprep.mubr.f32.mxu1 %v9317_v47  ;;  %v2388_v31 = vpop.permute.xlu0 %2387 }
 0x2b0   : > { %2945 = vmatpush1.msra.mxu0 %v2319_v28  ;;  %2978 = vmatprep.mubr.f32.mxu0 %v9317_v47  ;;  %v2587_v15 = vpop.permute.xlu1 %2586  ;;  %v2398_v1 = vsel %vm2391_vm9, %v7900_v5, %v2388_v31 }
 0x2b1   : > { %6548 = vmatmul.mubr.msk.f32.vlgmr.msra.gmra.mxu1 %vm1054_vm8, %v7872_v29  ;;  %6549 = vmatmul.mubr.msk.f32.vlgmr.msra.gmra.mxu0 %vm1054_vm8, %v7872_v29  ;;  %v2595_v63 = vsel %vm2314_vm10, %v2585_v6, %v2587_v15  ;;  %v9343_v15 = vld [vmem:[#allocation13_spill] sm:$0xff] }
 0x2b2   : > { %2999 = vmatprep.subr.mxu1 %v2671_v0  ;;  %3049 = vmatprep.mubr.f32.mxu1 %v9317_v47 }
 0x2b3   : > { %3000 = vmatpush1.msra.mxu1 %v2670_v36  ;;  %3636 = vmatprep.mubr.f32.mxu0 %v9317_v47  ;;  %v2311_v20 = vpop.permute.xlu0 %2310 }
 0x2b4   : > { %3001 = vmatprep.subr.mxu1 %v9336_v17  ;;  %v2527_v32 = vpop.permute.xlu1 %2526  ;;  %v2321_v54 = vsel %vm2314_vm10, %v7940_v37, %v2311_v20 }
 0x2b5   : > { %3002 = vmatpush1.msra.mxu1 %v9337_v19  ;;  %v2535_v12 = vsel %vm2391_vm9, %v2525_v14, %v2527_v32 }
 0x2b6   : > { %3003 = vmatprep.subr.mxu1 %v2595_v63 }
 0x2b7   : > { %3004 = vmatpush1.msra.mxu1 %v2594_v23 }
 0x2b8   : > { %3005 = vmatprep.subr.mxu1 %v2535_v12  ;;  %v2451_v48 = vpop.permute.xlu1 %2450 }
 0x2b9   : > { %3006 = vmatpush1.msra.mxu1 %v2534_v51  ;;  %v2459_v53 = vsel %vm2314_vm10, %v2449_v35, %v2451_v48  ;;  %v9344_v35 = vld [vmem:[#allocation9_spill] sm:$0xff] }
 0x2ba   : > { %3007 = vmatprep.subr.mxu1 %v9337_v19  ;;  %v9345_v51 = vld [vmem:[#allocation21_spill] sm:$0xff] }
 0x2bb   : > { %3008 = vmatpush1.msra.mxu1 %v9323_v59 }
 0x2bc   : > { %3009 = vmatprep.subr.mxu1 %v2459_v53  ;;  %v2390_v30 = vpop.permute.xlu1 %2389  ;;  %v1976_v53 = vld [vmem:[%s8159_s24] sm:$0xff] }
 0x2bd   : > { %3010 = vmatpush1.msra.mxu1 %v2458_v45  ;;  %v2399_v43 = vsel %vm2391_vm9, %v2388_v31, %v2390_v30  ;;  %v6552_v31 = vld [vmem:[%s8159_s24 + $0x8] sm:$0xff] }
 0x2be   : > { %3011 = vmatprep.subr.mxu1 %v2399_v43  ;;  %v8173_v45 = vld [vmem:[%s6848_s18 + $0x28] sm:$0xff]  ;;  %v8191_v43 = vld [vmem:[%s6848_s18 + $0x38] sm:$0xff] }
 0x2bf   : > { %3012 = vmatpush1.msra.mxu1 %v2398_v1 }
 0x2c0   : > { %3013 = vmatprep.subr.mxu1 %v9323_v59  ;;  %v2313_v3 = vpop.permute.xlu1 %2312  ;;  %v8025_v33 = vpop.permute.xlu0 %2766 }
 0x2c1   : > { %3014 = vmatpush1.msra.mxu1 %v9325_v39  ;;  %v2322_v60 = vsel %vm2314_vm10, %v2311_v20, %v2313_v3  ;;  %v8200_v20 = vld [vmem:[%s6848_s18 + $0x30] sm:$0xff]  ;;  %v8203_v3 = vld [vmem:[%s6848_s18 + $0x40] sm:$0xff] }
 0x2c2   : > { %3015 = vmatprep.subr.mxu1 %v2322_v60  ;;  %v8212_v60 = vld [vmem:[%s6848_s18 + $0x20] sm:$0xff] }
 0x2c3   : > { %3016 = vmatpush1.msra.mxu1 %v2321_v54 }
 0x2c4   : > { %6550 = vmatmul.mubr.msk.f32.vlgmr.msra.gmra.mxu1 %vm1054_vm8, %v7872_v29  ;;  %v8195_v1 = vpop.permute.xlu0 %6643 }
 0x2c5   : > { %3707 = vmatprep.mubr.f32.mxu1 %v9317_v47 }
 0x308   : > { %v8017_v5 = vpop.f32.mrf.mxu0 }
 0x30a   : > { %v8019_v39 = vpop.f32.mrf.mxu0 }
 0x331   : > { %v8036_v55 = vpop.f32.mrf.mxu1 }
 0x333   : > { %v8042_v21 = vpop.f32.mrf.mxu1 }
 0x34b   : > { %v8021_v4 = vpop.f32.mrf.mxu0 }
 0x34d   : > { %v8023_v29 = vpop.f32.mrf.mxu0 }
 0x35d   : > { %v2838_v13 = vpop.f32.mrf.mxu0 }
 0x35e   : > { %v2839_v25 = vadd.f32 %v2838_v13, %v8025_v33  ;;  %v8047_v7 = vpop.f32.mrf.mxu1 }
 0x35f   : > { %v2840_v27 = vpop.f32.mrf.mxu0 }
 0x360   : > { %v3056_v56 = vmax.f32 %v2839_v25, 0.0  ;;  %v2841_v52 = vadd.f32 %v2840_v27, %v8025_v33  ;;  %v8053_v11 = vpop.f32.mrf.mxu1 }
 0x362   : > { %v8029_v44 = vmul.f32 %v3056_v56, %v9338_v40  ;;  %v3057_v46 = vmax.f32 %v2841_v52, 0.0 }
 0x364   : > { %3310 = vrot.lane.b32.xlu1 %v8029_v44, %s6759_s16  ;;  %3370 = vrot.lane.b32.xlu0 %v8029_v44, %s6760_s17  ;;  %v8045_v41 = vmul.f32 %v3057_v46, %v9339_v34 }
 0x368   : > { %3176 = vrot.lane.b32.xlu1 %v8029_v44, %s6759_s16  ;;  %3236 = vrot.lane.b32.xlu0 %v8029_v44, %s6760_s17 }
 0x36c   : > { %3446 = vrot.lane.b32.xlu1 %v8045_v41, %s6759_s16  ;;  %3102 = vrot.lane.b32.xlu0 %v8029_v44, %s6760_s17 }
 0x370   : > { %3312 = vrot.lane.b32.xlu1 %v8045_v41, %s6759_s16  ;;  %3372 = vrot.lane.b32.xlu0 %v8045_v41, %s6760_s17 }
 0x371   : > { %v2909_v26 = vpop.f32.mrf.mxu1  ;;  %v2980_v2 = vpop.f32.mrf.mxu0 }
 0x372   : > { %v2910_v9 = vadd.f32 %v2909_v26, %v8025_v33  ;;  %v2981_v6 = vadd.f32 %v2980_v2, %v8025_v33 }
 0x373   : > { %v2911_v38 = vpop.f32.mrf.mxu1  ;;  %v2982_v28 = vpop.f32.mrf.mxu0 }
 0x374   : > { %v3058_v8 = vmax.f32 %v2910_v9, 0.0  ;;  %3238 = vrot.lane.b32.xlu1 %v8045_v41, %s6760_s17  ;;  %3178 = vrot.lane.b32.xlu0 %v8045_v41, %s6759_s16  ;;  %v2912_v58 = vadd.f32 %v2911_v38, %v8025_v33  ;;  %v3060_v61 = vmax.f32 %v2981_v6, 0.0  ;;  %v2983_v57 = vadd.f32 %v2982_v28, %v8025_v33  ;;  %v8243_v9 = vld [vmem:[%s6848_s18 + $0x18] sm:$0xff] }
 0x376   : > { %v8065_v37 = vmul.f32 %v3058_v8, %v9340_v16  ;;  %v3059_v22 = vmax.f32 %v2912_v58, 0.0  ;;  %v8089_v24 = vmul.f32 %v3060_v61, %v9342_v49  ;;  %v3061_v14 = vmax.f32 %v2983_v57, 0.0  ;;  %v8254_v58 = vld [vmem:[%s6848_s18 + $0x10] sm:$0xff] }
 0x377   : > { %v6695_v16 = vld [vmem:[%s6848_s18 + $0x30] sm:$0xff] }
 0x378   : > { %3104 = vrot.lane.b32.xlu0 %v8045_v41, %s6760_s17  ;;  %3448 = vrot.lane.b32.xlu1 %v8065_v37, %s6759_s16  ;;  %v8082_v62 = vmul.f32 %v3059_v22, %v9341_v18  ;;  %v8109_v36 = vmul.f32 %v3061_v14, %v9343_v15  ;;  %v8263_v22 = vld [vmem:[%s6848_s18 + $0x8] sm:$0xff] }
 0x379   : > { %9346 = vst [vmem:[#allocation11_spill] sm:$0xff] %v8263_v22 }
 0x37c   : > { %3314 = vrot.lane.b32.xlu0 %v8065_v37, %s6759_s16  ;;  %3374 = vrot.lane.b32.xlu1 %v8065_v37, %s6760_s17 }
 0x380   : > { %3180 = vrot.lane.b32.xlu0 %v8065_v37, %s6759_s16  ;;  %3240 = vrot.lane.b32.xlu1 %v8065_v37, %s6760_s17 }
 0x384   : > { %3450 = vrot.lane.b32.xlu0 %v8082_v62, %s6759_s16  ;;  %3106 = vrot.lane.b32.xlu1 %v8065_v37, %s6760_s17  ;;  %v3051_v0 = vpop.f32.mrf.mxu1 }
 0x385   : > { %v3052_v63 = vadd.f32 %v3051_v0, %v8025_v33 }
 0x386   : > { %v3053_v32 = vpop.f32.mrf.mxu1 }
 0x387   : > { %v3062_v17 = vmax.f32 %v3052_v63, 0.0  ;;  %v3054_v12 = vadd.f32 %v3053_v32, %v8025_v33  ;;  %v8214_v33 = vpop.permute.xlu0 %6658 }
 0x388   : > { %3376 = vrot.lane.b32.xlu1 %v8082_v62, %s6760_s17  ;;  %3452 = vrot.lane.b32.xlu0 %v8089_v24, %s6759_s16 }
 0x389   : > { %v8121_v19 = vmul.f32 %v3062_v17, %v9344_v35  ;;  %v3063_v23 = vmax.f32 %v3054_v12, 0.0 }
 0x38b   : > { %v8133_v48 = vmul.f32 %v3063_v23, %v9345_v51 }
 0x38c   : > { %3318 = vrot.lane.b32.xlu1 %v8089_v24, %s6759_s16  ;;  %3378 = vrot.lane.b32.xlu0 %v8089_v24, %s6760_s17 }
 0x390   : > { %3182 = vrot.lane.b32.xlu1 %v8082_v62, %s6759_s16  ;;  %3316 = vrot.lane.b32.xlu0 %v8082_v62, %s6759_s16 }
 0x394   : > { %3244 = vrot.lane.b32.xlu1 %v8089_v24, %s6760_s17  ;;  %3242 = vrot.lane.b32.xlu0 %v8082_v62, %s6760_s17 }
 0x398   : > { %3454 = vrot.lane.b32.xlu1 %v8109_v36, %s6759_s16  ;;  %3246 = vrot.lane.b32.xlu0 %v8109_v36, %s6760_s17 }
 0x39c   : > { %3184 = vrot.lane.b32.xlu1 %v8089_v24, %s6759_s16  ;;  %3186 = vrot.lane.b32.xlu0 %v8109_v36, %s6759_s16 }
 0x3a0   : > { %3380 = vrot.lane.b32.xlu1 %v8109_v36, %s6760_s17  ;;  %3456 = vrot.lane.b32.xlu0 %v8121_v19, %s6759_s16 }
 0x3a4   : > { %3320 = vrot.lane.b32.xlu1 %v8109_v36, %s6759_s16  ;;  %3382 = vrot.lane.b32.xlu0 %v8121_v19, %s6760_s17 }
 0x3a8   : > { %3458 = vrot.lane.b32.xlu1 %v8133_v48, %s6759_s16  ;;  %3322 = vrot.lane.b32.xlu0 %v8121_v19, %s6759_s16 }
 0x3ac   : > { %3248 = vrot.lane.b32.xlu1 %v8121_v19, %s6760_s17  ;;  %3110 = vrot.lane.b32.xlu0 %v8089_v24, %s6760_s17 }
 0x3b0   : > { %3384 = vrot.lane.b32.xlu1 %v8133_v48, %s6760_s17  ;;  %3324 = vrot.lane.b32.xlu0 %v8133_v48, %s6759_s16 }
 0x3b4   : > { %3188 = vrot.lane.b32.xlu1 %v8121_v19, %s6759_s16  ;;  %3250 = vrot.lane.b32.xlu0 %v8133_v48, %s6760_s17 }
 0x3b8   : > { %3108 = vrot.lane.b32.xlu1 %v8082_v62, %s6760_s17  ;;  %3190 = vrot.lane.b32.xlu0 %v8133_v48, %s6759_s16 }
 0x3bc   : > { %3112 = vrot.lane.b32.xlu1 %v8109_v36, %s6760_s17  ;;  %3114 = vrot.lane.b32.xlu0 %v8121_v19, %s6760_s17  ;;  %s8179_s17 = scalar_lea.vmem %s9222_s6, %s8170_s12 }
 0x3bd   : > { %v8182_v30 = vld [vmem:[%s8179_s17] sm:$0xff] }
 0x3c0   : > { %1979 = vperm.xlu0 %6641, %v1976_v53   ;;  %3566 = vperm.xlu1 %6662, %v6552_v31   ;;  %v4442_v31 = vld [vmem:[%s6848_s18] sm:$0xff] }
 0x3c4   : > { %4811 = vrot.lane.b32.xlu0 %v9324_v50, %s6761_s25  ;;  %3866 = vrot.lane.b32.xlu1 %v8182_v30, %s6761_s25  ;;  %v8188_v50 = vpop.permute.xlu1 %6648 }
 0x3c8   : > { %4809 = vrot.lane.b32.xlu0 %v8173_v45, %s6761_s25  ;;  %4813 = vrot.lane.b32.xlu1 %v8191_v43, %s6761_s25  ;;  %v8209_v54 = vpop.permute.xlu1 %6653 }
 0x3cc   : > { %4817 = vrot.lane.b32.xlu0 %v9323_v59, %s6761_s25  ;;  %4815 = vrot.lane.b32.xlu1 %v8203_v3, %s6761_s25 }
 0x3d0   : > { %4737 = vrot.lane.b32.xlu0 %v8200_v20, %s6762_s27  ;;  %4735 = vrot.lane.b32.xlu1 %v8173_v45, %s6762_s27 }
 0x3d4   : > { %4675 = vrot.lane.b32.xlu0 %v8212_v60, %s6761_s25  ;;  %4733 = vrot.lane.b32.xlu1 %v8212_v60, %s6762_s27 }
 0x3d6   : > { %v3371_v59 = vpop.permute.xlu0 %3370  ;;  %v3311_v13 = vpop.permute.xlu1 %3310 }
 0x3d8   : > { %4739 = vrot.lane.b32.xlu0 %v8191_v43, %s6762_s27  ;;  %4677 = vrot.lane.b32.xlu1 %v8173_v45, %s6761_s25 }
 0x3da   : > { %v8224_v25 = vpop.permute.xlu0 %3236  ;;  %v8226_v27 = vpop.permute.xlu1 %3176 }
 0x3dc   : > { %4673 = vrot.lane.b32.xlu0 %v7822_v10, %s6761_s25  ;;  %4741 = vrot.lane.b32.xlu1 %v8203_v3, %s6762_s27 }
 0x3de   : > { %v8232_v56 = vpop.permute.xlu0 %3102  ;;  %v3447_v52 = vpop.permute.xlu1 %3446 }
 0x3e0   : > { %4681 = vrot.lane.b32.xlu0 %v8191_v43, %s6761_s25  ;;  %4679 = vrot.lane.b32.xlu1 %v8200_v20, %s6761_s25 }
 0x3e2   : > { %v3373_v46 = vpop.permute.xlu0 %3372  ;;  %v3313_v26 = vpop.permute.xlu1 %3312 }
 0x3e3   : > { %v3328_v51 = vsel %vm2391_vm9, %v3311_v13, %v3313_v26 }
 0x3e4   : > { %4601 = vrot.lane.b32.xlu0 %v8212_v60, %s6762_s27  ;;  %4599 = vrot.lane.b32.xlu1 %v8243_v9, %s6762_s27 }
 0x3e6   : > { %v8245_v8 = vpop.permute.xlu0 %3178  ;;  %v8247_v38 = vpop.permute.xlu1 %3238 }
 0x3e8   : > { %4538 = vrot.lane.b32.xlu0 %v7857_v42, %s6761_s25  ;;  %4597 = vrot.lane.b32.xlu1 %v8254_v58, %s6762_s27 }
 0x3ea   : > { %v8256_v2 = vpop.permute.xlu0 %3104  ;;  %v3449_v6 = vpop.permute.xlu1 %3448 }
 0x3eb   : > { %v3464_v32 = vsel %vm2391_vm9, %v3447_v52, %v3449_v6 }
 0x3ec   : > { %4603 = vrot.lane.b32.xlu0 %v8173_v45, %s6762_s27  ;;  %4540 = vrot.lane.b32.xlu1 %v8243_v9, %s6761_s25 }
 0x3ee   : > { %v8265_v61 = vpop.permute.xlu0 %3314  ;;  %v8267_v28 = vpop.permute.xlu1 %3374 }
 0x3ef   : > { %v3389_v53 = vsel %vm2314_vm10, %v3373_v46, %v8267_v28  ;;  %v3329_v52 = vsel %vm2391_vm9, %v3313_v26, %v8265_v61 }
 0x3f0   : > { %4536 = vrot.lane.b32.xlu0 %v8263_v22, %s6761_s25  ;;  %4605 = vrot.lane.b32.xlu1 %v8200_v20, %s6762_s27 }
 0x3f2   : > { %v8273_v57 = vpop.permute.xlu0 %3180  ;;  %v8275_v14 = vpop.permute.xlu1 %3240 }
 0x3f4   : > { %4544 = vrot.lane.b32.xlu0 %v8173_v45, %s6761_s25  ;;  %4542 = vrot.lane.b32.xlu1 %v8212_v60, %s6761_s25 }
 0x3f6   : > { %v8281_v0 = vpop.permute.xlu0 %3450  ;;  %v8283_v63 = vpop.permute.xlu1 %3106 }
 0x3f7   : > { %v3465_v17 = vsel %vm2391_vm9, %v3449_v6, %v8281_v0  ;;  %v8307_v6 = vld [vmem:[%s6848_s18 + $0x50] sm:$0xff] }
 0x3f8   : > { %4464 = vrot.lane.b32.xlu0 %v7857_v42, %s6762_s27  ;;  %3586 = vmatprep.subr.mxu0 %v3465_v17  ;;  %v3388_v42 = vsel %vm2314_vm10, %v3371_v59, %v3373_v46  ;;  %9347 = vst [vmem:[#allocation10_spill] sm:$0xff] %v8307_v6  ;;  %v3253_v59 = vsel %vm2314_vm10, %v8224_v25, %v8247_v38  ;;  %v8324_v46 = vld [vmem:[%s6848_s18 + $0x60] sm:$0xff] }
 0x3f9   : > { %3587 = vmatpush1.msra.mxu0 %v3464_v32  ;;  %4462 = vrot.lane.b32.xlu1 %v8263_v22, %s6762_s27  ;;  %9348 = vst [vmem:[#allocation14_spill] sm:$0xff] %v8324_v46  ;;  %v6699_v22 = vld [vmem:[%s6848_s18 + $0x50] sm:$0xff] }
 0x3fa   : > { %v3453_v12 = vpop.permute.xlu0 %3452  ;;  %3588 = vmatprep.subr.mxu0 %v8065_v37  ;;  %v8293_v23 = vpop.permute.xlu1 %3376 }
 0x3fb   : > { %3589 = vmatpush1.msra.mxu0 %v8045_v41 }
 0x3fc   : > { %4466 = vrot.lane.b32.xlu0 %v7822_v10, %s6762_s27  ;;  %3590 = vmatprep.subr.mxu0 %v3389_v53  ;;  %v6645_v10 = vunpack.i.l.bf16 %v8195_v1 }
 0x3fd   : > { %3591 = vmatpush1.msra.mxu0 %v3388_v42  ;;  %4460 = vrot.lane.b32.xlu1 %v4442_v31, %s6762_s27  ;;  %v3193_v42 = vsel %vm2391_vm9, %v8226_v27, %v8245_v8  ;;  %v6646_v31 = vunpack.i.h.bf16 %v8195_v1  ;;  %v8351_v1 = vld [vmem:[%s6848_s18 + $0x58] sm:$0xff] }
 0x3fe   : > { %v8309_v17 = vpop.permute.xlu0 %3378  ;;  %3592 = vmatprep.subr.mxu0 %v3329_v52  ;;  %v8311_v32 = vpop.permute.xlu1 %3318  ;;  %v3252_v53 = vsel %vm2314_vm10, %v6645_v10, %v8224_v25  ;;  %v6655_v52 = vunpack.i.l.bf16 %v8209_v54  ;;  %v8343_v10 = vld [vmem:[%s6848_s18 + $0x48] sm:$0xff]  ;;  %9350 = vst [vmem:[#allocation26_spill] sm:$0xff] %v8351_v1 }
 0x3ff   : > { %3593 = vmatpush1.msra.mxu0 %v3328_v51  ;;  %v6650_v51 = vunpack.i.l.bf16 %v8188_v50  ;;  %9349 = vst [vmem:[#allocation12_spill] sm:$0xff] %v8343_v10  ;;  %v3117_v35 = vsel %vm2314_vm10, %v6646_v31, %v8232_v56 }
 0x400   : > { %4819 = vrot.lane.b32.xlu0 %v8307_v6, %s6761_s25  ;;  %3594 = vmatprep.subr.mxu0 %v8045_v41 }
 0x401   : > { %3595 = vmatpush1.msra.mxu0 %v8029_v44  ;;  %4468 = vrot.lane.b32.xlu1 %v8212_v60, %s6762_s27  ;;  %v3192_v25 = vsel %vm2391_vm9, %v6650_v51, %v8226_v27  ;;  %v3116_v27 = vsel %vm2314_vm10, %v6655_v52, %v6646_v31  ;;  %v4799_v51 = vld [vmem:[%s6848_s18 + $0x68] sm:$0xff] }
 0x402   : > { %v3317_v13 = vpop.permute.xlu0 %3316  ;;  %3596 = vmatprep.subr.mxu0 %v3253_v59  ;;  %v8327_v26 = vpop.permute.xlu1 %3182 }
 0x403   : > { %3597 = vmatpush1.msra.mxu0 %v3252_v53 }
 0x404   : > { %4823 = vrot.lane.b32.xlu0 %v8324_v46, %s6761_s25  ;;  %3598 = vmatprep.subr.mxu0 %v3193_v42  ;;  %v8357_v42 = vld [vmem:[%s7633_s21 + $0x8] sm:$0xff] }
 0x405   : > { %3599 = vmatpush1.msra.mxu0 %v3192_v25  ;;  %4821 = vrot.lane.b32.xlu1 %v8351_v1, %s6761_s25 }
 0x406   : > { %v8345_v59 = vpop.permute.xlu0 %3242  ;;  %v8347_v53 = vpop.permute.xlu1 %3244  ;;  %3600 = vmatprep.subr.mxu0 %v8029_v44 }
 0x407   : > { %3601 = vmatpush1.msra.mxu0 %v9317_v47 }
 0x408   : > { %4743 = vrot.lane.b32.xlu0 %v8343_v10, %s6762_s27  ;;  %3602 = vmatprep.subr.mxu0 %v3117_v35  ;;  %v3466_v35 = vsel %vm2391_vm9, %v8281_v0, %v3453_v12  ;;  %v3331_v0 = vsel %vm2391_vm9, %v3317_v13, %v8311_v32 }
 0x409   : > { %3603 = vmatpush1.msra.mxu0 %v3116_v27  ;;  %4825 = vrot.lane.b32.xlu1 %v4799_v51, %s6761_s25  ;;  %v3391_v27 = vsel %vm2314_vm10, %v8293_v23, %v8309_v17 }
 0x40a   : > { %v8365_v44 = vpop.permute.xlu0 %3246  ;;  %v3455_v25 = vpop.permute.xlu1 %3454  ;;  %6553 = vmatmul.mubr.msk.f32.vlgmr.msra.gmra.mxu0 %vm1054_vm8, %v8357_v42 }
 0x40b   : > { %v3467_v15 = vsel %vm2391_vm9, %v3453_v12, %v3455_v25  ;;  %3778 = vmatprep.mubr.f32.mxu0 %v9317_v47 }
 0x40c   : > { %4683 = vrot.lane.b32.xlu0 %v8203_v3, %s6761_s25  ;;  %3657 = vmatprep.subr.mxu1 %v3467_v15  ;;  %v3390_v15 = vsel %vm2314_vm10, %v8267_v28, %v8293_v23  ;;  %v3255_v28 = vsel %vm2314_vm10, %v8275_v14, %v8345_v59 }
 0x40d   : > { %3658 = vmatpush1.msra.mxu1 %v3466_v35  ;;  %4745 = vrot.lane.b32.xlu1 %v8307_v6, %s6762_s27  ;;  %v3330_v35 = vsel %vm2391_vm9, %v8265_v61, %v3317_v13  ;;  %v3254_v61 = vsel %vm2314_vm10, %v8247_v38, %v8275_v14  ;;  %v3195_v13 = vsel %vm2391_vm9, %v8273_v57, %v8327_v26  ;;  %v6651_v38 = vunpack.i.h.bf16 %v8188_v50 }
 0x40e   : > { %v8376_v31 = vpop.permute.xlu0 %3186  ;;  %3659 = vmatprep.subr.mxu1 %v8089_v24  ;;  %v8379_v52 = vpop.permute.xlu1 %3184 }
 0x40f   : > { %3660 = vmatpush1.msra.mxu1 %v8082_v62 }
 0x410   : > { %4747 = vrot.lane.b32.xlu0 %v8351_v1, %s6762_s27  ;;  %3661 = vmatprep.subr.mxu1 %v3391_v27 }
 0x411   : > { %3662 = vmatpush1.msra.mxu1 %v3390_v15  ;;  %4685 = vrot.lane.b32.xlu1 %v8343_v10, %s6761_s25  ;;  %v3194_v15 = vsel %vm2391_vm9, %v8245_v8, %v8273_v57 }
 0x412   : > { %v3457_v12 = vpop.permute.xlu0 %3456  ;;  %3663 = vmatprep.subr.mxu1 %v3331_v0  ;;  %v3381_v51 = vpop.permute.xlu1 %3380  ;;  %v6660_v0 = vunpack.i.l.bf16 %v8214_v33 }
 0x413   : > { %3664 = vmatpush1.msra.mxu1 %v3330_v35 }
 0x414   : > { %4687 = vrot.lane.b32.xlu0 %v8307_v6, %s6761_s25  ;;  %3665 = vmatprep.subr.mxu1 %v8082_v62  ;;  %v3471_v57 = vsel %vm2391_vm9, %v6651_v38, %v6660_v0 }
 0x415   : > { %3666 = vmatpush1.msra.mxu1 %v8065_v37  ;;  %4749 = vrot.lane.b32.xlu1 %v8324_v46, %s6762_s27  ;;  %v6696_v46 = vld [vmem:[%s6848_s18 + $0x28] sm:$0xff] }
 0x416   : > { %v3383_v23 = vpop.permute.xlu0 %3382  ;;  %3667 = vmatprep.subr.mxu1 %v3255_v28  ;;  %v3321_v27 = vpop.permute.xlu1 %3320  ;;  %v3119_v28 = vsel %vm2314_vm10, %v8256_v2, %v8283_v63 }
 0x417   : > { %3668 = vmatpush1.msra.mxu1 %v3254_v61 }
 0x418   : > { %4607 = vrot.lane.b32.xlu0 %v8191_v43, %s6762_s27  ;;  %3669 = vmatprep.subr.mxu1 %v3195_v13 }
 0x419   : > { %3670 = vmatpush1.msra.mxu1 %v3194_v15  ;;  %4689 = vrot.lane.b32.xlu1 %v8351_v1, %s6761_s25 }
 0x41a   : > { %v3323_v14 = vpop.permute.xlu0 %3322  ;;  %3671 = vmatprep.subr.mxu1 %v8065_v37  ;;  %v3459_v35 = vpop.permute.xlu1 %3458  ;;  %v3118_v37 = vsel %vm2314_vm10, %v8232_v56, %v8256_v2  ;;  %v3393_v56 = vsel %vm2314_vm10, %v3381_v51, %v3383_v23  ;;  %v6656_v2 = vunpack.i.h.bf16 %v8209_v54  ;;  %v3332_v54 = vsel %vm2391_vm9, %v8311_v32, %v3321_v27 }
 0x41b   : > { %3672 = vmatpush1.msra.mxu1 %v8045_v41  ;;  %v3469_v61 = vsel %vm2391_vm9, %v3457_v12, %v3459_v35  ;;  %v3468_v41 = vsel %vm2391_vm9, %v3455_v25, %v3457_v12  ;;  %v3470_v13 = vsel %vm2391_vm9, %v3459_v35, %v6651_v38  ;;  %v3392_v25 = vsel %vm2314_vm10, %v8309_v17, %v3381_v51 }
 0x41c   : > { %4546 = vrot.lane.b32.xlu0 %v8200_v20, %s6761_s25  ;;  %3673 = vmatprep.subr.mxu1 %v3119_v28  ;;  %v3333_v0 = vsel %vm2391_vm9, %v3321_v27, %v3323_v14  ;;  %v6661_v28 = vunpack.i.h.bf16 %v8214_v33  ;;  %v3257_v32 = vsel %vm2314_vm10, %v8347_v53, %v8365_v44  ;;  %v3256_v33 = vsel %vm2314_vm10, %v8345_v59, %v8347_v53 }
 0x41d   : > { %3728 = vmatprep.subr.mxu0 %v3469_v61  ;;  %3674 = vmatpush1.msra.mxu1 %v3118_v37  ;;  %v3197_v61 = vsel %vm2391_vm9, %v8379_v52, %v8376_v31  ;;  %v3196_v37 = vsel %vm2391_vm9, %v8327_v26, %v8379_v52 }
 0x41e   : > { %3729 = vmatpush1.msra.mxu0 %v3468_v41  ;;  %v8434_v50 = vpop.permute.xlu0 %3110  ;;  %6554 = vmatmul.mubr.msk.f32.vlgmr.msra.gmra.mxu1 %vm1054_vm8, %v8357_v42  ;;  %v3249_v8 = vpop.permute.xlu1 %3248 }
 0x41f   : > { %3730 = vmatprep.subr.mxu0 %v8121_v19  ;;  %3799 = vmatprep.subr.mxu1 %v3471_v57 }
 0x420   : > { %3731 = vmatpush1.msra.mxu0 %v8109_v36  ;;  %3800 = vmatpush1.msra.mxu1 %v3470_v13 }
 0x421   : > { %4611 = vrot.lane.b32.xlu0 %v8343_v10, %s6762_s27  ;;  %3732 = vmatprep.subr.mxu0 %v3393_v56  ;;  %v6566_v56 = vld [vmem:[%s7039_s15 + $0x10] sm:$0xff] }
 0x422   : > { %3801 = vmatprep.subr.mxu1 %v9317_v47  ;;  %3733 = vmatpush1.msra.mxu0 %v3392_v25  ;;  %v3325_v12 = vpop.permute.xlu0 %3324  ;;  %v3385_v15 = vpop.permute.xlu1 %3384 }
 0x423   : > { %3802 = vmatpush1.msra.mxu1 %v8133_v48  ;;  %3734 = vmatprep.subr.mxu0 %v3333_v0  ;;  %v3395_v38 = vsel %vm2314_vm10, %v3385_v15, %v6656_v2  ;;  %v3394_v35 = vsel %vm2314_vm10, %v3383_v23, %v3385_v15  ;;  %v3335_v23 = vsel %vm2391_vm9, %v3325_v12, %v6661_v28 }
 0x424   : > { %3735 = vmatpush1.msra.mxu0 %v3332_v54  ;;  %3803 = vmatprep.subr.mxu1 %v3395_v38  ;;  %v3334_v27 = vsel %vm2391_vm9, %v3323_v14, %v3325_v12 }
 0x425   : > { %4550 = vrot.lane.b32.xlu0 %v8203_v3, %s6761_s25  ;;  %3736 = vmatprep.subr.mxu0 %v8109_v36 }
 0x426   : > { %3737 = vmatpush1.msra.mxu0 %v8089_v24  ;;  %3804 = vmatpush1.msra.mxu1 %v3394_v35  ;;  %v3251_v17 = vpop.permute.xlu0 %3250  ;;  %v3189_v51 = vpop.permute.xlu1 %3188 }
 0x427   : > { %3738 = vmatprep.subr.mxu0 %v3257_v32  ;;  %3805 = vmatprep.subr.mxu1 %v3335_v23  ;;  %v3259_v14 = vsel %vm2314_vm10, %v3249_v8, %v3251_v17 }
 0x428   : > { %3739 = vmatpush1.msra.mxu0 %v3256_v33  ;;  %3806 = vmatpush1.msra.mxu1 %v3334_v27 }
 0x429   : > { %4470 = vrot.lane.b32.xlu0 %v8173_v45, %s6762_s27  ;;  %3740 = vmatprep.subr.mxu0 %v3197_v61 }
 0x42a   : > { %3807 = vmatprep.subr.mxu1 %v8133_v48  ;;  %3741 = vmatpush1.msra.mxu0 %v3196_v37  ;;  %v3191_v59 = vpop.permute.xlu0 %3190  ;;  %v3109_v53 = vpop.permute.xlu1 %3108  ;;  %v3258_v48 = vsel %vm2314_vm10, %v8365_v44, %v3249_v8 }
 0x42b   : > { %3808 = vmatpush1.msra.mxu1 %v8121_v19  ;;  %3742 = vmatprep.subr.mxu0 %v8089_v24  ;;  %v3121_v41 = vsel %vm2314_vm10, %v3109_v53, %v8434_v50  ;;  %v3199_v57 = vsel %vm2391_vm9, %v3189_v51, %v3191_v59  ;;  %v3120_v26 = vsel %vm2314_vm10, %v8283_v63, %v3109_v53 }
 0x42c   : > { %3809 = vmatprep.subr.mxu1 %v3259_v14  ;;  %3743 = vmatpush1.msra.mxu0 %v8082_v62  ;;  %v3198_v24 = vsel %vm2391_vm9, %v8376_v31, %v3189_v51 }
 0x42d   : > { %3810 = vmatpush1.msra.mxu1 %v3258_v48  ;;  %4474 = vrot.lane.b32.xlu0 %v8191_v43, %s6762_s27 }
 0x42e   : > { %3744 = vmatprep.subr.mxu0 %v3121_v41  ;;  %3811 = vmatprep.subr.mxu1 %v3199_v57  ;;  %v3115_v52 = vpop.permute.xlu0 %3114  ;;  %v3113_v13 = vpop.permute.xlu1 %3112 }
 0x42f   : > { %3745 = vmatpush1.msra.mxu0 %v3120_v26  ;;  %3812 = vmatpush1.msra.mxu1 %v3198_v24  ;;  %v3123_v62 = vsel %vm2314_vm10, %v3113_v13, %v3115_v52  ;;  %v3122_v63 = vsel %vm2314_vm10, %v8434_v50, %v3113_v13  ;;  %v6693_v24 = vld [vmem:[%s6848_s18 + $0x20] sm:$0xff]  ;;  %v6694_v13 = vld [vmem:[%s6848_s18 + $0x18] sm:$0xff] }
 0x430   : > { %6555 = vmatmul.mubr.msk.f32.vlgmr.msra.gmra.mxu0 %vm1054_vm8, %v8357_v42  ;;  %3813 = vmatprep.subr.mxu1 %v8121_v19 }
 0x431   : > { %3814 = vmatpush1.msra.mxu1 %v8109_v36  ;;  %4929 = vperm.xlu0 %6641, %v6566_v56  }
 0x432   : > { %3815 = vmatprep.subr.mxu1 %v3123_v62  ;;  %3849 = vmatprep.mubr.f32.mxu1 %v9317_v47 }
 0x433   : > { %3816 = vmatpush1.msra.mxu1 %v3122_v63  ;;  %4609 = vrot.lane.b32.xlu1 %v8203_v3, %s6762_s27 }
 0x434   : > { %6556 = vmatmul.mubr.msk.f32.vlgmr.msra.gmra.mxu1 %vm1054_vm8, %v8357_v42  ;;  %3935 = vmatprep.mubr.f32.mxu0 %v9317_v47 }
 0x435   : > { %4006 = vmatprep.mubr.f32.mxu1 %v9317_v47  ;;  %6664 = vrot.lane.b32.xlu0 %v9317_v47, %s6762_s27 }
 0x437   : > { %4548 = vrot.lane.b32.xlu1 %v8191_v43, %s6761_s25 }
 0x439   : > { %6684 = vrot.lane.b32.xlu0 %v9317_v47, %s6761_s25 }
 0x43b   : > { %4613 = vrot.lane.b32.xlu1 %v8307_v6, %s6762_s27  ;;  %v8517_v36 = vpop.permute.xlu1 %3566  ;;  %v8521_v42 = vpop.permute.xlu0 %1979 }
 0x43f   : > { %4552 = vrot.lane.b32.xlu1 %v8343_v10, %s6761_s25  ;;  %v8519_v19 = vpop.permute.xlu1 %3866  ;;  %v8525_v31 = vpop.permute.xlu0 %4811 }
 0x443   : > { %4472 = vrot.lane.b32.xlu1 %v8200_v20, %s6762_s27  ;;  %v8523_v44 = vpop.permute.xlu1 %4813  ;;  %v8529_v8 = vpop.permute.xlu0 %4809 }
 0x447   : > { %4476 = vrot.lane.b32.xlu1 %v8203_v3, %s6762_s27  ;;  %v8527_v50 = vpop.permute.xlu1 %4815  ;;  %v8533_v25 = vpop.permute.xlu0 %4817 }
 0x44b   : > { %v8531_v2 = vpop.permute.xlu1 %4735  ;;  %v8537_v15 = vpop.permute.xlu0 %4737  ;;  %6669 = vrot.lane.b32.xlu1 %v9317_v47, %s6761_s25 }
 0x44f   : > { %v8535_v12 = vpop.permute.xlu1 %4733  ;;  %v8541_v54 = vpop.permute.xlu0 %4675  ;;  %6674 = vrot.lane.b32.xlu1 %v9317_v47, %s6762_s27 }
 0x453   : > { %v8539_v0 = vpop.permute.xlu1 %4677  ;;  %v8545_v35 = vpop.permute.xlu0 %4739  ;;  %6679 = vrot.lane.b32.xlu1 %v9317_v47, %s6761_s25 }
 0x457   : > { %v8543_v38 = vpop.permute.xlu1 %4741  ;;  %v8549_v17 = vpop.permute.xlu0 %4673  ;;  %6689 = vrot.lane.b32.xlu1 %v9317_v47, %s6762_s27 }
 0x45b   : > { %v8547_v28 = vpop.permute.xlu1 %4679  ;;  %v8553_v32 = vpop.permute.xlu0 %4681 }
 0x45f   : > { %v8551_v51 = vpop.permute.xlu1 %4599  ;;  %v8557_v33 = vpop.permute.xlu0 %4601 }
 0x463   : > { %v8555_v23 = vpop.permute.xlu1 %4597  ;;  %v8561_v61 = vpop.permute.xlu0 %4538 }
 0x467   : > { %v8559_v27 = vpop.permute.xlu1 %4540  ;;  %v8565_v59 = vpop.permute.xlu0 %4603 }
 0x46b   : > { %v8563_v37 = vpop.permute.xlu1 %4605  ;;  %v8569_v41 = vpop.permute.xlu0 %4536 }
 0x46f   : > { %v8567_v14 = vpop.permute.xlu1 %4542  ;;  %v8577_v63 = vpop.permute.xlu0 %4544 }
 0x473   : > { %v8575_v62 = vpop.permute.xlu1 %4462 }
 0x474   : > { %9351 = vst [vmem:[#allocation31_spill] sm:$0xff] %v8575_v62 }
 0x4ca   : > { %v3638_v53 = vpop.f32.mrf.mxu0 }
 0x4cb   : > { %v3639_v57 = vadd.f32 %v3638_v53, %v8517_v36  ;;  %v8582_v53 = vpop.permute.xlu1 %4460 }
 0x4cc   : > { %v3640_v48 = vpop.f32.mrf.mxu0  ;;  %9352 = vst [vmem:[#allocation27_spill] sm:$0xff] %v8582_v53 }
 0x4cd   : > { %v3641_v26 = vadd.f32 %v3640_v48, %v8517_v36  ;;  %v3856_v56 = vadd.f32 %v6694_v13, %v3639_v57  ;;  %v8584_v48 = vpop.permute.xlu0 %4464 }
 0x4ce   : > { %9353 = vst [vmem:[#allocation28_spill] sm:$0xff] %v8584_v48 }
 0x4cf   : > { %v3857_v52 = vadd.f32 %v6693_v24, %v3641_v26  ;;  %v8586_v26 = vpop.permute.xlu1 %4468 }
 0x4d0   : > { %9354 = vst [vmem:[#allocation16_spill] sm:$0xff] %v8586_v26  ;;  %v2054_v26 = vadd.f32 %v8019_v39, %v8521_v42 }
 0x4d1   : > { %3901 = vmatprep.subr.mxu0 %v3857_v52  ;;  %v8588_v57 = vpop.permute.xlu0 %4466 }
 0x4d2   : > { %3902 = vmatpush1.msra.mxu0 %v3856_v56  ;;  %9355 = vst [vmem:[#allocation15_spill] sm:$0xff] %v8588_v57 }
 0x4d3   : > { %6557 = vmatmul.mubr.msk.f32.vlgmr.msra.gmra.mxu0 %vm3868_vm11, %v8519_v19  ;;  %v8592_v56 = vpop.permute.xlu1 %4821 }
 0x4d4   : > { %4077 = vmatprep.mubr.f32.mxu0 %v9317_v47  ;;  %9356 = vst [vmem:[#allocation20_spill] sm:$0xff] %v8592_v56 }
 0x4d5   : > { %v8595_v1 = vpop.permute.xlu0 %4819 }
 0x4d6   : > { %9357 = vst [vmem:[#allocation19_spill] sm:$0xff] %v8595_v1 }
 0x4d7   : > { %v8600_v6 = vpop.permute.xlu1 %4825 }
 0x4d8   : > { %9358 = vst [vmem:[#allocation18_spill] sm:$0xff] %v8600_v6  ;;  %v2052_v6 = vadd.f32 %v8017_v5, %v8521_v42  ;;  %v2270_v5 = vadd.f32 %v6693_v24, %v2054_v26 }
 0x4de   : > { %v3709_v49 = vpop.f32.mrf.mxu1 }
 0x4df   : > { %v3710_v52 = vadd.f32 %v3709_v49, %v8517_v36  ;;  %v8605_v49 = vpop.permute.xlu1 %4745 }
 0x4e0   : > { %v3711_v18 = vpop.f32.mrf.mxu1  ;;  %9360 = vst [vmem:[#allocation23_spill] sm:$0xff] %v8605_v49 }
 0x4e1   : > { %v3712_v34 = vadd.f32 %v3711_v18, %v8517_v36  ;;  %v3858_v10 = vadd.f32 %v6696_v46, %v3710_v52  ;;  %v8603_v18 = vpop.permute.xlu0 %4823 }
 0x4e2   : > { %9359 = vst [vmem:[#allocation17_spill] sm:$0xff] %v8603_v18  ;;  %v6697_v18 = vld [vmem:[%s6848_s18 + $0x40] sm:$0xff] }
 0x4e3   : > { %v3859_v40 = vadd.f32 %v6695_v16, %v3712_v34  ;;  %v8615_v56 = vpop.permute.xlu1 %4685 }
 0x4e4   : > { %9362 = vst [vmem:[#allocation25_spill] sm:$0xff] %v8615_v56  ;;  %v2269_v56 = vadd.f32 %v6694_v13, %v2052_v6 }
 0x4e5   : > { %3972 = vmatprep.subr.mxu1 %v3859_v40  ;;  %v8607_v34 = vpop.permute.xlu0 %4743 }
 0x4e6   : > { %3973 = vmatpush1.msra.mxu1 %v3858_v10  ;;  %9361 = vst [vmem:[#allocation22_spill] sm:$0xff] %v8607_v34  ;;  %v2196_v34 = vadd.f32 %v8023_v29, %v8521_v42  ;;  %v2194_v29 = vadd.f32 %v8021_v4, %v8521_v42 }
 0x4e7   : > { %6558 = vmatmul.mubr.msk.f32.vlgmr.msra.gmra.mxu1 %vm3868_vm11, %v8519_v19  ;;  %v8638_v6 = vpop.permute.xlu1 %4749 }
 0x4e8   : > { %4148 = vmatprep.mubr.f32.mxu1 %v9317_v47 }
 0x4e9   : > { %v8620_v53 = vpop.permute.xlu0 %4683 }
 0x4ea   : > { %9363 = vst [vmem:[#allocation24_spill] sm:$0xff] %v8620_v53 }
 0x4ed   : > { %v8640_v4 = vpop.permute.xlu0 %4747 }
 0x4f0   : > { %v3780_v57 = vpop.f32.mrf.mxu0 }
 0x4f1   : > { %v3781_v52 = vadd.f32 %v3780_v57, %v8517_v36  ;;  %v6698_v57 = vld [vmem:[%s6848_s18 + $0x38] sm:$0xff] }
 0x4f2   : > { %v3782_v40 = vpop.f32.mrf.mxu0 }
 0x4f3   : > { %v3783_v10 = vadd.f32 %v3782_v40, %v8517_v36  ;;  %v3860_v62 = vadd.f32 %v6698_v57, %v3781_v52 }
 0x4f4   : > { %v3851_v1 = vpop.f32.mrf.mxu1 }
 0x4f5   : > { %v3861_v49 = vadd.f32 %v6697_v18, %v3783_v10  ;;  %v3852_v40 = vadd.f32 %v3851_v1, %v8517_v36  ;;  %v2125_v10 = vadd.f32 %v8042_v21, %v8521_v42  ;;  %v2274_v1 = vadd.f32 %v6697_v18, %v2196_v34  ;;  %v8740_v34 = vld [vmem:[%s7119_s26 + $0x10] sm:$0xff] }
 0x4f6   : > { %v3853_v39 = vpop.f32.mrf.mxu1  ;;  %v2267_v21 = vadd.f32 %v8053_v11, %v8521_v42 }
 0x4f7   : > { %v3854_v48 = vadd.f32 %v3853_v39, %v8517_v36  ;;  %4043 = vmatprep.subr.mxu0 %v3861_v49  ;;  %v2123_v36 = vadd.f32 %v8036_v55, %v8521_v42  ;;  %v6700_v49 = vld [vmem:[%s6848_s18 + $0x48] sm:$0xff]  ;;  %v2272_v13 = vadd.f32 %v6695_v16, %v2125_v10  ;;  %v2265_v55 = vadd.f32 %v8047_v7, %v8521_v42  ;;  %v8652_v16 = vpop.permute.xlu1 %4689  ;;  %v9369_v39 = vld [vmem:[#allocation19_spill] sm:$0xff] }
 0x4f8   : > { %4044 = vmatpush1.msra.mxu0 %v3860_v62  ;;  %v3862_v24 = vadd.f32 %v6700_v49, %v3852_v40  ;;  %v2273_v62 = vadd.f32 %v6698_v57, %v2194_v29  ;;  %v4752_v42 = vsel %vm3868_vm11, %v8531_v2, %v8537_v15  ;;  %v9368_v40 = vld [vmem:[#allocation20_spill] sm:$0xff]  ;;  %v9371_v10 = vld [vmem:[#allocation15_spill] sm:$0xff] }
 0x4f9   : > { %v3863_v53 = vadd.f32 %v6699_v22, %v3854_v48  ;;  %6559 = vmatmul.mubr.msk.f32.vlgmr.msra.gmra.mxu0 %vm3868_vm11, %v8519_v19  ;;  %4188 = vmatprep.subr.mxu0 %v2270_v5  ;;  %v2271_v11 = vadd.f32 %v6696_v46, %v2123_v36  ;;  %v2276_v48 = vadd.f32 %v6699_v22, %v2267_v21  ;;  %v9370_v5 = vld [vmem:[#allocation16_spill] sm:$0xff] }
 0x4fa   : > { %4189 = vmatpush1.msra.mxu0 %v2269_v56  ;;  %4222 = vmatprep.mubr.f32.mxu0 %v9317_v47  ;;  %v2275_v7 = vadd.f32 %v6700_v49, %v2265_v55  ;;  %v4827_v46 = vsel %vm4554_vm12, %v8529_v8, %v8525_v31  ;;  %v4830_v22 = vsel %vm4554_vm12, %v8527_v50, %v8533_v25  ;;  %v9373_v36 = vld [vmem:[#allocation12_spill] sm:$0xff] }
 0x4fb   : > { %4114 = vmatprep.subr.mxu1 %v3863_v53  ;;  %4330 = vmatprep.subr.mxu0 %v2274_v1  ;;  %v4828_v53 = vsel %vm4554_vm12, %v8525_v31, %v8523_v44  ;;  %v4829_v31 = vsel %vm4554_vm12, %v8523_v44, %v8527_v50  ;;  %v4751_v8 = vsel %vm3868_vm11, %v8535_v12, %v8531_v2  ;;  %v8681_v26 = vpop.permute.xlu1 %4609 }
 0x4fc   : > { %4115 = vmatpush1.msra.mxu1 %v3862_v24  ;;  %v4692_v56 = vsel %vm4554_vm12, %v8541_v54, %v8539_v0  ;;  %v4754_v50 = vsel %vm3868_vm11, %v8545_v35, %v8543_v38  ;;  %v4753_v2 = vsel %vm3868_vm11, %v8537_v15, %v8545_v35  ;;  %v4694_v12 = vsel %vm4554_vm12, %v8547_v28, %v8553_v32 }
 0x4fd   : > { %6560 = vmatmul.mubr.msk.f32.vlgmr.msra.gmra.mxu1 %vm3868_vm11, %v8519_v19  ;;  %6561 = vmatmul.mubr.msk.f32.vlgmr.msra.gmra.mxu0 %vm3868_vm11, %v8182_v30  ;;  %v8660_v19 = vpop.permute.xlu0 %4687  ;;  %v4615_v15 = vsel %vm3868_vm11, %v8555_v23, %v8551_v51  ;;  %v4617_v23 = vsel %vm3868_vm11, %v8557_v33, %v8565_v59  ;;  %v4481_v29 = vsel %vm3868_vm11, %v9371_v10, %v9370_v5 }
 0x4fe   : > { %4259 = vmatprep.subr.mxu1 %v2272_v13  ;;  %4331 = vmatpush1.msra.mxu0 %v2273_v62  ;;  %v9376_v13 = vld [vmem:[#allocation18_spill] sm:$0xff]  ;;  %v9377_v62 = vld [vmem:[#allocation17_spill] sm:$0xff] }
 0x4ff   : > { %4260 = vmatpush1.msra.mxu1 %v2271_v11  ;;  %4949 = vmatprep.subr.mxu0 %v4828_v53  ;;  %v8713_v35 = vpop.permute.xlu1 %4548  ;;  %v4834_v55 = vsel %vm4554_vm12, %v9377_v62, %v9376_v13  ;;  %v4833_v53 = vsel %vm4554_vm12, %v9368_v40, %v9377_v62  ;;  %v9382_v13 = vld [vmem:[#allocation4_spill] sm:$0xff] }
 0x500   : > { %4401 = vmatprep.subr.mxu1 %v2276_v48  ;;  %4293 = vmatprep.mubr.f32.mxu1 %v9317_v47  ;;  %v9378_v48 = vld [vmem:[#allocation25_spill] sm:$0xff] }
 0x501   : > { %4364 = vmatprep.mubr.f32.mxu0 %v9317_v47  ;;  %6562 = vmatmul.mubr.msk.f32.vlgmr.msra.gmra.mxu1 %vm3868_vm11, %v8182_v30  ;;  %v8690_v44 = vpop.permute.xlu0 %4607 }
 0x502   : > { %6563 = vmatmul.mubr.msk.f32.vlgmr.msra.gmra.mxu0 %vm3868_vm11, %v8182_v30  ;;  %4402 = vmatpush1.msra.mxu1 %v2275_v7  ;;  %v9379_v7 = vld [vmem:[#allocation24_spill] sm:$0xff] }
 0x503   : > { %4950 = vmatpush1.msra.mxu0 %v4827_v46  ;;  %5020 = vmatprep.subr.mxu1 %v4830_v22  ;;  %v4614_v52 = vpop.permute.xlu1 %4613  ;;  %v4696_v46 = vsel %vm4554_vm12, %v9379_v7, %v9378_v48  ;;  %v4643_v22 = vld [vmem:[%s6848_s18 + $0x38] sm:$0xff] }
 0x504   : > { %4951 = vmatprep.subr.mxu0 %v8200_v20  ;;  %4435 = vmatprep.mubr.f32.mxu1 %v9317_v47 }
 0x505   : > { %4952 = vmatpush1.msra.mxu0 %v8173_v45  ;;  %6564 = vmatmul.mubr.msk.f32.vlgmr.msra.gmra.mxu1 %vm3868_vm11, %v8182_v30  ;;  %v4691_v30 = vsel %vm4554_vm12, %v8549_v17, %v8541_v54  ;;  %v4616_v54 = vsel %vm3868_vm11, %v8551_v51, %v8557_v33  ;;  %v8722_v17 = vpop.permute.xlu0 %4546  ;;  %v4618_v51 = vsel %vm3868_vm11, %v8565_v59, %v8563_v37 }
 0x506   : > { %4953 = vmatprep.subr.mxu0 %v4752_v42  ;;  %5021 = vmatpush1.msra.mxu1 %v4829_v31  ;;  %v4557_v33 = vsel %vm4554_vm12, %v8559_v27, %v8567_v14  ;;  %v9380_v42 = vld [vmem:[#allocation14_spill] sm:$0xff]  ;;  %v4620_v31 = vsel %vm3868_vm11, %v8690_v44, %v8681_v26 }
 0x507   : > { %4954 = vmatpush1.msra.mxu0 %v4751_v8  ;;  %5022 = vmatprep.subr.mxu1 %v8203_v3  ;;  %v4553_v24 = vpop.permute.xlu1 %4552  ;;  %v9381_v8 = vld [vmem:[#allocation26_spill] sm:$0xff] }
 0x508   : > { %4955 = vmatprep.subr.mxu0 %v4692_v56  ;;  %5023 = vmatpush1.msra.mxu1 %v8191_v43  ;;  %v4693_v43 = vsel %vm4554_vm12, %v8539_v0, %v8547_v28  ;;  %v4556_v0 = vsel %vm4554_vm12, %v8561_v61, %v8559_v27  ;;  %v4555_v28 = vsel %vm4554_vm12, %v8569_v41, %v8561_v61  ;;  %v9364_v61 = vld [vmem:[#allocation11_spill] sm:$0xff] }
 0x509   : > { %4956 = vmatpush1.msra.mxu0 %v4691_v30  ;;  %5024 = vmatprep.subr.mxu1 %v4754_v50  ;;  %v9366_v41 = vld [vmem:[#allocation31_spill] sm:$0xff]  ;;  %v4612_v57 = vpop.permute.xlu0 %4611  ;;  %v4832_v27 = vsel %vm4554_vm12, %v9369_v39, %v9368_v40  ;;  %v4758_v56 = vsel %vm3868_vm11, %v8640_v4, %v8638_v6  ;;  %v4560_v50 = vsel %vm4554_vm12, %v8722_v17, %v8713_v35 }
 0x50a   : > { %4957 = vmatprep.subr.mxu0 %v8212_v60  ;;  %5025 = vmatpush1.msra.mxu1 %v4753_v2  ;;  %v4619_v6 = vsel %vm3868_vm11, %v8563_v37, %v8690_v44  ;;  %v4621_v37 = vsel %vm3868_vm11, %v8681_v26, %v4612_v57 }
 0x50b   : > { %4958 = vmatpush1.msra.mxu0 %v8243_v9  ;;  %5026 = vmatprep.subr.mxu1 %v4694_v12  ;;  %v4473_v2 = vpop.permute.xlu1 %4472 }
 0x50c   : > { %4959 = vmatprep.subr.mxu0 %v4616_v54  ;;  %5027 = vmatpush1.msra.mxu1 %v4693_v43  ;;  %v4559_v43 = vsel %vm4554_vm12, %v8577_v63, %v8722_v17  ;;  %v4622_v54 = vsel %vm3868_vm11, %v4612_v57, %v4614_v52 }
 0x50d   : > { %4960 = vmatpush1.msra.mxu0 %v4615_v15  ;;  %5028 = vmatprep.subr.mxu1 %v8200_v20  ;;  %v4558_v20 = vsel %vm4554_vm12, %v8567_v14, %v8577_v63  ;;  %v4831_v14 = vsel %vm4554_vm12, %v8533_v25, %v9369_v39  ;;  %v9374_v25 = vld [vmem:[#allocation23_spill] sm:$0xff]  ;;  %v4551_v11 = vpop.permute.xlu0 %4550  ;;  %v4506_v15 = vld [vmem:[%s6848_s18 + $0x28] sm:$0xff] }
 0x50e   : > { %4961 = vmatprep.subr.mxu0 %v4556_v0  ;;  %5029 = vmatpush1.msra.mxu1 %v8173_v45  ;;  %v9365_v45 = vld [vmem:[#allocation28_spill] sm:$0xff]  ;;  %v4757_v30 = vsel %vm3868_vm11, %v9374_v25, %v8640_v4  ;;  %v4507_v4 = vld [vmem:[%s6848_s18 + $0x30] sm:$0xff]  ;;  %v4562_v44 = vsel %vm4554_vm12, %v4551_v11, %v4553_v24  ;;  %v4561_v63 = vsel %vm4554_vm12, %v8713_v35, %v4551_v11 }
 0x50f   : > { %4962 = vmatpush1.msra.mxu0 %v4555_v28  ;;  %5030 = vmatprep.subr.mxu1 %v4618_v51  ;;  %v4479_v18 = vsel %vm3868_vm11, %v9366_v41, %v9365_v45  ;;  %v4480_v1 = vsel %vm3868_vm11, %v9365_v45, %v9371_v10  ;;  %v4477_v0 = vpop.permute.xlu1 %4476 }
 0x510   : > { %4963 = vmatprep.subr.mxu0 %v8254_v58  ;;  %5031 = vmatpush1.msra.mxu1 %v4617_v23  ;;  %v9367_v58 = vld [vmem:[#allocation27_spill] sm:$0xff] }
 0x511   : > { %4964 = vmatpush1.msra.mxu0 %v9364_v61  ;;  %5032 = vmatprep.subr.mxu1 %v4558_v20  ;;  %v4478_v59 = vsel %vm3868_vm11, %v9367_v58, %v9366_v41  ;;  %v4471_v12 = vpop.permute.xlu0 %4470 }
 0x512   : > { %4965 = vmatprep.subr.mxu0 %v4479_v18  ;;  %4999 = vmatprep.mubr.f32.mxu0 %v9317_v47  ;;  %v4482_v28 = vsel %vm3868_vm11, %v9370_v5, %v4471_v12 }
 0x513   : > { %4966 = vmatpush1.msra.mxu0 %v4478_v59  ;;  %5033 = vmatpush1.msra.mxu1 %v4557_v33 }
 0x514   : > { %6567 = vmatmul.mubr.msk.f32.vlgmr.msra.gmra.mxu0 %vm1054_vm8, %v8740_v34  ;;  %5034 = vmatprep.subr.mxu1 %v8212_v60  ;;  %v9372_v60 = vld [vmem:[#allocation10_spill] sm:$0xff] }
 0x515   : > { %5091 = vmatprep.subr.mxu0 %v4832_v27  ;;  %5035 = vmatpush1.msra.mxu1 %v8243_v9  ;;  %v9375_v9 = vld [vmem:[#allocation22_spill] sm:$0xff]  ;;  %v4475_v26 = vpop.permute.xlu0 %4474 }
 0x516   : > { %5092 = vmatpush1.msra.mxu0 %v4831_v14  ;;  %5036 = vmatprep.subr.mxu1 %v4481_v29  ;;  %v4756_v49 = vsel %vm3868_vm11, %v9375_v9, %v9374_v25  ;;  %v4755_v21 = vsel %vm3868_vm11, %v8543_v38, %v9375_v9  ;;  %v4695_v38 = vsel %vm4554_vm12, %v8553_v32, %v9379_v7 }
 0x517   : > { %5093 = vmatprep.subr.mxu0 %v9372_v60  ;;  %5037 = vmatpush1.msra.mxu1 %v4480_v1  ;;  %v4698_v32 = vsel %vm4554_vm12, %v8660_v19, %v8652_v16  ;;  %v4697_v16 = vsel %vm4554_vm12, %v9378_v48, %v8660_v19  ;;  %v4483_v19 = vsel %vm3868_vm11, %v4471_v12, %v4473_v2 }
 0x518   : > { %5070 = vmatprep.mubr.f32.mxu1 %v9317_v47  ;;  %5094 = vmatpush1.msra.mxu0 %v9373_v36  ;;  %v4485_v17 = vsel %vm3868_vm11, %v4475_v26, %v4477_v0  ;;  %v4484_v51 = vsel %vm3868_vm11, %v4473_v2, %v4475_v26  ;;  %v9388_v0 = vld [vmem:[#allocation9_spill] sm:$0xff] }
 0x519   : > { %6568 = vmatmul.mubr.msk.f32.vlgmr.msra.gmra.mxu1 %vm1054_vm8, %v8740_v34  ;;  %5095 = vmatprep.subr.mxu0 %v4756_v49  ;;  %v4930_v25 = vpop.permute.xlu0 %4929 }
 0x51a   : > { %5162 = vmatprep.subr.mxu1 %v4834_v55  ;;  %5096 = vmatpush1.msra.mxu0 %v4755_v21 }
 0x51b   : > { %5163 = vmatpush1.msra.mxu1 %v4833_v53  ;;  %5097 = vmatprep.subr.mxu0 %v4696_v46  ;;  %v9383_v46 = vld [vmem:[#allocation5_spill] sm:$0xff] }
 0x51c   : > { %5164 = vmatprep.subr.mxu1 %v9380_v42  ;;  %5098 = vmatpush1.msra.mxu0 %v4695_v38 }
 0x51d   : > { %5165 = vmatpush1.msra.mxu1 %v9381_v8  ;;  %5099 = vmatprep.subr.mxu0 %v8203_v3 }
 0x51e   : > { %5166 = vmatprep.subr.mxu1 %v4758_v56  ;;  %5100 = vmatpush1.msra.mxu0 %v4643_v22 }
 0x51f   : > { %5167 = vmatpush1.msra.mxu1 %v4757_v30  ;;  %5101 = vmatprep.subr.mxu0 %v4620_v31 }
 0x520   : > { %5168 = vmatprep.subr.mxu1 %v4698_v32  ;;  %5102 = vmatpush1.msra.mxu0 %v4619_v6 }
 0x521   : > { %5169 = vmatpush1.msra.mxu1 %v4697_v16  ;;  %5103 = vmatprep.subr.mxu0 %v4560_v50  ;;  %v9385_v50 = vld [vmem:[#allocation7_spill] sm:$0xff]  ;;  %v9386_v16 = vld [vmem:[#allocation8_spill] sm:$0xff] }
 0x522   : > { %5170 = vmatprep.subr.mxu1 %v9372_v60  ;;  %5104 = vmatpush1.msra.mxu0 %v4559_v43 }
 0x523   : > { %5171 = vmatpush1.msra.mxu1 %v9373_v36  ;;  %5105 = vmatprep.subr.mxu0 %v4507_v4 }
 0x524   : > { %5172 = vmatprep.subr.mxu1 %v4622_v54  ;;  %5106 = vmatpush1.msra.mxu0 %v4506_v15 }
 0x525   : > { %5173 = vmatpush1.msra.mxu1 %v4621_v37  ;;  %5107 = vmatprep.subr.mxu0 %v4483_v19 }
 0x526   : > { %5174 = vmatprep.subr.mxu1 %v4562_v44  ;;  %5108 = vmatpush1.msra.mxu0 %v4482_v28  ;;  %v9387_v44 = vld [vmem:[#allocation13_spill] sm:$0xff] }
 0x527   : > { %5141 = vmatprep.mubr.f32.mxu0 %v9317_v47  ;;  %5175 = vmatpush1.msra.mxu1 %v4561_v63 }
 0x528   : > { %6569 = vmatmul.mubr.msk.f32.vlgmr.msra.gmra.mxu0 %vm1054_vm8, %v8740_v34  ;;  %5176 = vmatprep.subr.mxu1 %v8203_v3 }
 0x529   : > { %5177 = vmatpush1.msra.mxu1 %v4643_v22  ;;  %5212 = vmatprep.mubr.f32.mxu1 %v9317_v47  ;;  %v9384_v22 = vld [vmem:[#allocation6_spill] sm:$0xff] }
 0x52a   : > { %5178 = vmatprep.subr.mxu1 %v4485_v17  ;;  %5799 = vmatprep.mubr.f32.mxu0 %v9317_v47 }
 0x52b   : > { %5179 = vmatpush1.msra.mxu1 %v4484_v51 }
 0x52c   : > { %6570 = vmatmul.mubr.msk.f32.vlgmr.msra.gmra.mxu1 %vm1054_vm8, %v8740_v34 }
 0x52d   : > { %5870 = vmatprep.mubr.f32.mxu1 %v9317_v47 }
 0x593   : > { %v3937_v3 = vpop.f32.mrf.mxu0 }
 0x595   : > { %v3939_v35 = vpop.f32.mrf.mxu0 }
 0x5a7   : > { %v4008_v23 = vpop.f32.mrf.mxu1 }
 0x5a9   : > { %v4010_v61 = vpop.f32.mrf.mxu1 }
 0x5b9   : > { %v4079_v20 = vpop.f32.mrf.mxu0 }
 0x5bb   : > { %v4081_v45 = vpop.f32.mrf.mxu0 }
 0x5bd   : > { %v4150_v41 = vpop.f32.mrf.mxu1  ;;  %v4224_v18 = vpop.f32.mrf.mxu0 }
 0x5be   : > { %v8852_v34 = vadd.f32 %v4224_v18, %v3937_v3  ;;  %v9389_v3 = vld [vmem:[#allocation21_spill] sm:$0xff]  ;;  %v8986_v18 = vpop.permute.xlu0 %6664 }
 0x5bf   : > { %v4152_v33 = vpop.f32.mrf.mxu1  ;;  %v4226_v58 = vpop.f32.mrf.mxu0 }
 0x5c0   : > { %v8854_v59 = vadd.f32 %v4226_v58, %v3939_v35 }
 0x5c1   : > { %v4295_v52 = vpop.f32.mrf.mxu1 }
 0x5c2   : > { %v8856_v57 = vadd.f32 %v4295_v52, %v4008_v23  ;;  %v4366_v40 = vpop.f32.mrf.mxu0  ;;  %v6572_v23 = vld [vmem:[%s8159_s24 + $0x10] sm:$0xff]  ;;  %v8990_v58 = vpop.permute.xlu0 %6684 }
 0x5c3   : > { %v8858_v39 = vadd.f32 %v4366_v40, %v4079_v20  ;;  %v4297_v27 = vpop.f32.mrf.mxu1  ;;  %v6333_v20 = vld [vmem:[%s446_s13] sm:$0xff] }
 0x5c4   : > { %v8860_v14 = vadd.f32 %v4297_v27, %v4010_v61  ;;  %v4368_v5 = vpop.f32.mrf.mxu0  ;;  %v6027_v61 = vld [vmem:[%s8179_s17] sm:$0xff] }
 0x5c5   : > { %v8862_v10 = vadd.f32 %v4368_v5, %v4081_v45  ;;  %v4437_v29 = vpop.f32.mrf.mxu1  ;;  %v8982_v45 = vpop.permute.xlu1 %6669 }
 0x5c6   : > { %v8864_v1 = vadd.f32 %v4437_v29, %v4150_v41 }
 0x5c7   : > { %v4439_v60 = vpop.f32.mrf.mxu1 }
 0x5c8   : > { %v8866_v36 = vadd.f32 %v4439_v60, %v4152_v33 }
 0x5c9   : > { %v8984_v41 = vpop.permute.xlu1 %6674 }
 0x5cd   : > { %v8988_v33 = vpop.permute.xlu1 %6679 }
 0x5d1   : > { %v8992_v52 = vpop.permute.xlu1 %6689 }
 0x5d4   : > { %v5001_v9 = vpop.f32.mrf.mxu0 }
 0x5d5   : > { %v5002_v49 = vadd.f32 %v5001_v9, %v4930_v25 }
 0x5d6   : > { %v5003_v21 = vpop.f32.mrf.mxu0 }
 0x5d7   : > { %v5219_v24 = vmax.f32 %v5002_v49, 0.0  ;;  %v5004_v11 = vadd.f32 %v5003_v21, %v4930_v25 }
 0x5d9   : > { %v8869_v62 = vmul.f32 %v5219_v24, %v9382_v13  ;;  %v5072_v55 = vpop.f32.mrf.mxu1  ;;  %v5220_v7 = vmax.f32 %v5004_v11, 0.0 }
 0x5da   : > { %v5073_v53 = vadd.f32 %v5072_v55, %v4930_v25 }
 0x5db   : > { %5399 = vrot.lane.b32.xlu0 %v8869_v62, %s6762_s27  ;;  %5473 = vrot.lane.b32.xlu1 %v8869_v62, %s6761_s25  ;;  %v8883_v42 = vmul.f32 %v5220_v7, %v9384_v22  ;;  %v5074_v31 = vpop.f32.mrf.mxu1 }
 0x5dc   : > { %v5221_v48 = vmax.f32 %v5073_v53, 0.0  ;;  %v5075_v8 = vadd.f32 %v5074_v31, %v4930_v25 }
 0x5de   : > { %v8876_v38 = vmul.f32 %v5221_v48, %v9383_v46  ;;  %v5222_v56 = vmax.f32 %v5075_v8, 0.0 }
 0x5df   : > { %5341 = vrot.lane.b32.xlu0 %v8869_v62, %s6761_s25 }
 0x5e0   : > { %5609 = vrot.lane.b32.xlu1 %v8876_v38, %s6761_s25  ;;  %v8902_v2 = vmul.f32 %v5222_v56, %v9385_v50 }
 0x5e3   : > { %5267 = vrot.lane.b32.xlu0 %v8869_v62, %s6762_s27 }
 0x5e4   : > { %5475 = vrot.lane.b32.xlu1 %v8883_v42, %s6761_s25 }
 0x5e7   : > { %5535 = vrot.lane.b32.xlu0 %v8876_v38, %s6762_s27 }
 0x5e8   : > { %5401 = vrot.lane.b32.xlu1 %v8883_v42, %s6762_s27  ;;  %v5143_v32 = vpop.f32.mrf.mxu0 }
 0x5e9   : > { %v5144_v30 = vadd.f32 %v5143_v32, %v4930_v25 }
 0x5ea   : > { %v5145_v12 = vpop.f32.mrf.mxu0 }
 0x5eb   : > { %5533 = vrot.lane.b32.xlu0 %v8883_v42, %s6762_s27  ;;  %v5223_v6 = vmax.f32 %v5144_v30, 0.0  ;;  %v5146_v43 = vadd.f32 %v5145_v12, %v4930_v25 }
 0x5ec   : > { %5343 = vrot.lane.b32.xlu1 %v8883_v42, %s6761_s25  ;;  %v5214_v54 = vpop.f32.mrf.mxu1 }
 0x5ed   : > { %v8913_v4 = vmul.f32 %v5223_v6, %v9386_v16  ;;  %v5215_v15 = vadd.f32 %v5214_v54, %v4930_v25  ;;  %v5224_v37 = vmax.f32 %v5146_v43, 0.0  ;;  %v6672_v54 = vunpack.i.h.bf16 %v8982_v45 }
 0x5ee   : > { %v5216_v26 = vpop.f32.mrf.mxu1 }
 0x5ef   : > { %5477 = vrot.lane.b32.xlu0 %v8876_v38, %s6761_s25  ;;  %v5225_v19 = vmax.f32 %v5215_v15, 0.0  ;;  %v8924_v63 = vmul.f32 %v5224_v37, %v9387_v44  ;;  %v5217_v17 = vadd.f32 %v5216_v26, %v4930_v25  ;;  %v6671_v15 = vunpack.i.l.bf16 %v8982_v45 }
 0x5f0   : > { %5269 = vrot.lane.b32.xlu1 %v8883_v42, %s6762_s27  ;;  %v6666_v37 = vunpack.i.l.bf16 %v8986_v18  ;;  %v6676_v26 = vunpack.i.l.bf16 %v8984_v41 }
 0x5f1   : > { %v8931_v28 = vmul.f32 %v5225_v19, %v9388_v0  ;;  %v5226_v51 = vmax.f32 %v5217_v17, 0.0  ;;  %v6667_v17 = vunpack.i.h.bf16 %v8986_v18  ;;  %v5355_v45 = vsel %vm4554_vm12, %v6672_v54, %v6671_v15 }
 0x5f2   : > { %v6691_v54 = vunpack.i.l.bf16 %v8992_v52 }
 0x5f3   : > { %5403 = vrot.lane.b32.xlu0 %v8876_v38, %s6762_s27  ;;  %v8954_v35 = vmul.f32 %v5226_v51, %v9389_v3 }
 0x5f4   : > { %5611 = vrot.lane.b32.xlu1 %v8902_v2, %s6761_s25 }
 0x5f7   : > { %5345 = vrot.lane.b32.xlu0 %v8876_v38, %s6761_s25 }
 0x5f8   : > { %5537 = vrot.lane.b32.xlu1 %v8902_v2, %s6762_s27 }
 0x5fb   : > { %5613 = vrot.lane.b32.xlu0 %v8913_v4, %s6761_s25 }
 0x5fc   : > { %5479 = vrot.lane.b32.xlu1 %v8902_v2, %s6761_s25 }
 0x5ff   : > { %5539 = vrot.lane.b32.xlu0 %v8913_v4, %s6762_s27 }
 0x600   : > { %5405 = vrot.lane.b32.xlu1 %v8902_v2, %s6762_s27 }
 0x603   : > { %5481 = vrot.lane.b32.xlu0 %v8913_v4, %s6761_s25 }
 0x604   : > { %5615 = vrot.lane.b32.xlu1 %v8924_v63, %s6761_s25 }
 0x607   : > { %5617 = vrot.lane.b32.xlu0 %v8931_v28, %s6761_s25 }
 0x608   : > { %5541 = vrot.lane.b32.xlu1 %v8924_v63, %s6762_s27 }
 0x60b   : > { %5349 = vrot.lane.b32.xlu0 %v8913_v4, %s6761_s25 }
 0x60c   : > { %5407 = vrot.lane.b32.xlu1 %v8913_v4, %s6762_s27 }
 0x60f   : > { %5483 = vrot.lane.b32.xlu0 %v8924_v63, %s6761_s25 }
 0x610   : > { %5347 = vrot.lane.b32.xlu1 %v8902_v2, %s6761_s25 }
 0x613   : > { %5409 = vrot.lane.b32.xlu0 %v8924_v63, %s6762_s27 }
 0x614   : > { %5271 = vrot.lane.b32.xlu1 %v8876_v38, %s6762_s27 }
 0x617   : > { %5353 = vrot.lane.b32.xlu0 %v8931_v28, %s6761_s25 }
 0x618   : > { %5543 = vrot.lane.b32.xlu1 %v8931_v28, %s6762_s27 }
 0x61b   : > { %5619 = vrot.lane.b32.xlu0 %v8954_v35, %s6761_s25 }
 0x61c   : > { %5485 = vrot.lane.b32.xlu1 %v8931_v28, %s6761_s25 }
 0x61f   : > { %5545 = vrot.lane.b32.xlu0 %v8954_v35, %s6762_s27 }
 0x620   : > { %5411 = vrot.lane.b32.xlu1 %v8931_v28, %s6762_s27 }
 0x623   : > { %5487 = vrot.lane.b32.xlu0 %v8954_v35, %s6761_s25 }
 0x624   : > { %5351 = vrot.lane.b32.xlu1 %v8924_v63, %s6761_s25 }
 0x627   : > { %5413 = vrot.lane.b32.xlu0 %v8954_v35, %s6762_s27 }
 0x628   : > { %5275 = vrot.lane.b32.xlu1 %v8913_v4, %s6762_s27 }
 0x62b   : > { %5273 = vrot.lane.b32.xlu0 %v8902_v2, %s6762_s27 }
 0x62c   : > { %5729 = vperm.xlu1 %6662, %v6572_v23  }
 0x62f   : > { %5277 = vrot.lane.b32.xlu0 %v8924_v63, %s6762_s27 }
 0x630   : > { %6336 = vperm.xlu1 %6662, %v6333_v20   ;;  %v6677_v20 = vunpack.i.h.bf16 %v8984_v41  ;;  %v5280_v41 = vsel %vm3868_vm11, %v6667_v17, %v6676_v26 }
 0x633   : > { %6029 = vrot.lane.b32.xlu0 %v6027_v61, %s6763_s19 }
 0x64d   : > { %v5400_v40 = vpop.permute.xlu0 %5399  ;;  %v5474_v27 = vpop.permute.xlu1 %5473 }
 0x64e   : > { %v5415_v44 = vsel %vm3868_vm11, %v6666_v37, %v5400_v40 }
 0x651   : > { %v8994_v5 = vpop.permute.xlu0 %5341 }
 0x652   : > { %v5610_v29 = vpop.permute.xlu1 %5609  ;;  %v5356_v3 = vsel %vm4554_vm12, %v6671_v15, %v8994_v5 }
 0x655   : > { %v8996_v60 = vpop.permute.xlu0 %5267 }
 0x656   : > { %v5476_v25 = vpop.permute.xlu1 %5475 }
 0x657   : > { %v5491_v12 = vsel %vm4554_vm12, %v5474_v27, %v5476_v25 }
 0x659   : > { %v5536_v9 = vpop.permute.xlu0 %5535 }
 0x65a   : > { %v8998_v49 = vpop.permute.xlu1 %5401 }
 0x65b   : > { %v5416_v19 = vsel %vm3868_vm11, %v5400_v40, %v8998_v49 }
 0x65d   : > { %v5534_v24 = vpop.permute.xlu0 %5533 }
 0x65e   : > { %v9000_v21 = vpop.permute.xlu1 %5343  ;;  %v5551_v50 = vsel %vm3868_vm11, %v5534_v24, %v5536_v9 }
 0x661   : > { %v9002_v13 = vpop.permute.xlu0 %5477 }
 0x662   : > { %v9004_v55 = vpop.permute.xlu1 %5269  ;;  %v5492_v6 = vsel %vm4554_vm12, %v5476_v25, %v9002_v13 }
 0x665   : > { %v9006_v11 = vpop.permute.xlu0 %5403 }
 0x666   : > { %v5612_v53 = vpop.permute.xlu1 %5611 }
 0x667   : > { %v5627_v8 = vsel %vm4554_vm12, %v5610_v29, %v5612_v53  ;;  %v9056_v29 = vld [vmem:[%s7633_s21 + $0x10] sm:$0xff]  ;;  %s453_s21 = sadd.s32 %s6535_s20, %s8170_s12 }
 0x668   : > { %s6536_s22 = sshll.u32 %s453_s21, 3 }
 0x669   : > { %v9008_v48 = vpop.permute.xlu0 %5345  ;;  %s9185_s25 = scalar_lea.vmem %s9224_s8, %s6536_s22 }
 0x66a   : > { %v5538_v7 = vpop.permute.xlu1 %5537 }
 0x66b   : > { %v5552_v30 = vsel %vm3868_vm11, %v5536_v9, %v5538_v7  ;;  %v5279_v9 = vsel %vm3868_vm11, %v6677_v20, %v6667_v17 }
 0x66d   : > { %v5614_v46 = vpop.permute.xlu0 %5613 }
 0x66e   : > { %v5480_v22 = vpop.permute.xlu1 %5479  ;;  %v5628_v31 = vsel %vm4554_vm12, %v5612_v53, %v5614_v46 }
 0x66f   : > { %5749 = vmatprep.subr.mxu0 %v5628_v31  ;;  %v5493_v53 = vsel %vm4554_vm12, %v9002_v13, %v5480_v22  ;;  %v5417_v13 = vsel %vm3868_vm11, %v8998_v49, %v9006_v11  ;;  %v6681_v49 = vunpack.i.l.bf16 %v8988_v33 }
 0x670   : > { %5750 = vmatpush1.msra.mxu0 %v5627_v8 }
 0x671   : > { %v5540_v56 = vpop.permute.xlu0 %5539  ;;  %5751 = vmatprep.subr.mxu0 %v8902_v2 }
 0x672   : > { %v9013_v32 = vpop.permute.xlu1 %5405  ;;  %5752 = vmatpush1.msra.mxu0 %v8876_v38  ;;  %v5553_v25 = vsel %vm3868_vm11, %v5538_v7, %v5540_v56 }
 0x673   : > { %5753 = vmatprep.subr.mxu0 %v5552_v30  ;;  %v5418_v7 = vsel %vm3868_vm11, %v9006_v11, %v9013_v32  ;;  %v5357_v30 = vsel %vm4554_vm12, %v8994_v5, %v9000_v21  ;;  %v5281_v5 = vsel %vm3868_vm11, %v6676_v26, %v8996_v60 }
 0x674   : > { %5754 = vmatpush1.msra.mxu0 %v5551_v50  ;;  %v6682_v50 = vunpack.i.h.bf16 %v8988_v33 }
 0x675   : > { %v9021_v16 = vpop.permute.xlu0 %5481  ;;  %5755 = vmatprep.subr.mxu0 %v5492_v6  ;;  %v6686_v6 = vunpack.i.l.bf16 %v8990_v58 }
 0x676   : > { %v5616_v43 = vpop.permute.xlu1 %5615  ;;  %5756 = vmatpush1.msra.mxu0 %v5491_v12  ;;  %v5494_v24 = vsel %vm4554_vm12, %v5480_v22, %v9021_v16 }
 0x677   : > { %5757 = vmatprep.subr.mxu0 %v8883_v42  ;;  %v5629_v61 = vsel %vm4554_vm12, %v5614_v46, %v5616_v43  ;;  %v5634_v33 = vsel %vm4554_vm12, %v6682_v50, %v6686_v6 }
 0x678   : > { %5758 = vmatpush1.msra.mxu0 %v8869_v62 }
 0x679   : > { %v9031_v0 = vpop.permute.xlu0 %5617  ;;  %5759 = vmatprep.subr.mxu0 %v5416_v19 }
 0x67a   : > { %v9035_v51 = vpop.permute.xlu1 %5541  ;;  %5760 = vmatpush1.msra.mxu0 %v5415_v44  ;;  %v5630_v23 = vsel %vm4554_vm12, %v5616_v43, %v9031_v0  ;;  %v5282_v43 = vsel %vm3868_vm11, %v8996_v60, %v9004_v55 }
 0x67b   : > { %5761 = vmatprep.subr.mxu0 %v5356_v3  ;;  %5820 = vmatprep.subr.mxu1 %v5630_v23  ;;  %v5554_v27 = vsel %vm3868_vm11, %v5540_v56, %v9035_v51  ;;  %v5358_v56 = vsel %vm4554_vm12, %v9000_v21, %v9008_v48  ;;  %v6692_v21 = vunpack.i.h.bf16 %v8992_v52  ;;  %v6687_v3 = vunpack.i.h.bf16 %v8990_v58 }
 0x67c   : > { %5762 = vmatpush1.msra.mxu0 %v5355_v45  ;;  %5821 = vmatpush1.msra.mxu1 %v5629_v61 }
 0x67d   : > { %v9044_v18 = vpop.permute.xlu0 %5349  ;;  %5763 = vmatprep.subr.mxu0 %v9317_v47  ;;  %5822 = vmatprep.subr.mxu1 %v8924_v63  ;;  %v5558_v52 = vsel %vm3868_vm11, %v6691_v54, %v6692_v21 }
 0x67e   : > { %v9048_v40 = vpop.permute.xlu1 %5407  ;;  %5764 = vmatpush1.msra.mxu0 %v9317_v47  ;;  %5823 = vmatpush1.msra.mxu1 %v8913_v4 }
 0x67f   : > { %5765 = vmatprep.subr.mxu0 %v5280_v41  ;;  %5824 = vmatprep.subr.mxu1 %v5554_v27 }
 0x680   : > { %5766 = vmatpush1.msra.mxu0 %v5279_v9  ;;  %5825 = vmatpush1.msra.mxu1 %v5553_v25 }
 0x681   : > { %v5484_v46 = vpop.permute.xlu0 %5483  ;;  %6573 = vmatmul.mubr.msk.f32.vlgmr.msra.gmra.mxu0 %vm1054_vm8, %v9056_v29  ;;  %5826 = vmatprep.subr.mxu1 %v5494_v24 }
 0x682   : > { %v9066_v31 = vpop.permute.xlu1 %5347  ;;  %5827 = vmatpush1.msra.mxu1 %v5493_v53  ;;  %5941 = vmatprep.mubr.f32.mxu0 %v9317_v47  ;;  %v5495_v20 = vsel %vm4554_vm12, %v9021_v16, %v5484_v46  ;;  %v5419_v16 = vsel %vm3868_vm11, %v9013_v32, %v9048_v40 }
 0x683   : > { %5828 = vmatprep.subr.mxu1 %v8902_v2  ;;  %v5360_v25 = vsel %vm4554_vm12, %v9066_v31, %v9044_v18  ;;  %v5359_v24 = vsel %vm4554_vm12, %v9008_v48, %v9066_v31 }
 0x684   : > { %5829 = vmatpush1.msra.mxu1 %v8876_v38 }
 0x685   : > { %v9077_v22 = vpop.permute.xlu0 %5409  ;;  %5830 = vmatprep.subr.mxu1 %v5418_v7 }
 0x686   : > { %v9079_v8 = vpop.permute.xlu1 %5271  ;;  %5831 = vmatpush1.msra.mxu1 %v5417_v13  ;;  %v5420_v58 = vsel %vm3868_vm11, %v9048_v40, %v9077_v22  ;;  %v6701_v13 = vld [vmem:[%s6848_s18 + $0x20] sm:$0xff] }
 0x687   : > { %5832 = vmatprep.subr.mxu1 %v5358_v56  ;;  %v5283_v53 = vsel %vm3868_vm11, %v9004_v55, %v9079_v8 }
 0x688   : > { %5833 = vmatpush1.msra.mxu1 %v5357_v30 }
 0x689   : > { %v9090_v11 = vpop.permute.xlu0 %5353  ;;  %5834 = vmatprep.subr.mxu1 %v8883_v42 }
 0x68a   : > { %v5544_v12 = vpop.permute.xlu1 %5543  ;;  %5835 = vmatpush1.msra.mxu1 %v8869_v62  ;;  %v5633_v62 = vsel %vm4554_vm12, %v6681_v49, %v6682_v50 }
 0x68b   : > { %5836 = vmatprep.subr.mxu1 %v5282_v43  ;;  %v5555_v26 = vsel %vm3868_vm11, %v9035_v51, %v5544_v12  ;;  %v6704_v43 = vld [vmem:[%s6848_s18 + $0x28] sm:$0xff] }
 0x68c   : > { %5837 = vmatpush1.msra.mxu1 %v5281_v5 }
 0x68d   : > { %v5620_v15 = vpop.permute.xlu0 %5619  ;;  %6574 = vmatmul.mubr.msk.f32.vlgmr.msra.gmra.mxu1 %vm1054_vm8, %v9056_v29  ;;  %5962 = vmatprep.subr.mxu1 %v5634_v33 }
 0x68e   : > { %v5631_v42 = vsel %vm4554_vm12, %v9031_v0, %v5620_v15  ;;  %v5486_v37 = vpop.permute.xlu1 %5485  ;;  %5963 = vmatpush1.msra.mxu1 %v5633_v62  ;;  %v5632_v60 = vsel %vm4554_vm12, %v5620_v15, %v6681_v49  ;;  %6012 = vmatprep.mubr.f32.mxu1 %v9317_v47 }
 0x68f   : > { %5891 = vmatprep.subr.mxu0 %v5632_v60  ;;  %5964 = vmatprep.subr.mxu1 %v9317_v47  ;;  %v5496_v23 = vsel %vm4554_vm12, %v5484_v46, %v5486_v37  ;;  %v6706_v60 = vld [vmem:[%s6848_s18 + $0x38] sm:$0xff] }
 0x690   : > { %5892 = vmatpush1.msra.mxu0 %v5631_v42  ;;  %5965 = vmatpush1.msra.mxu1 %v9317_v47  ;;  %v6705_v42 = vld [vmem:[%s6848_s18 + $0x40] sm:$0xff] }
 0x691   : > { %v5546_v19 = vpop.permute.xlu0 %5545  ;;  %5893 = vmatprep.subr.mxu0 %v8954_v35  ;;  %5966 = vmatprep.subr.mxu1 %v5558_v52 }
 0x692   : > { %v5557_v44 = vsel %vm3868_vm11, %v5546_v19, %v6691_v54  ;;  %5894 = vmatpush1.msra.mxu0 %v8931_v28  ;;  %v5556_v0 = vsel %vm3868_vm11, %v5544_v12, %v5546_v19  ;;  %v5412_v17 = vpop.permute.xlu1 %5411 }
 0x693   : > { %5895 = vmatprep.subr.mxu0 %v5556_v0  ;;  %5967 = vmatpush1.msra.mxu1 %v5557_v44  ;;  %v5421_v32 = vsel %vm3868_vm11, %v9077_v22, %v5412_v17 }
 0x694   : > { %5896 = vmatpush1.msra.mxu0 %v5555_v26  ;;  %v6707_v26 = vld [vmem:[%s6848_s18 + $0x50] sm:$0xff] }
 0x695   : > { %v5488_v61 = vpop.permute.xlu0 %5487  ;;  %5897 = vmatprep.subr.mxu0 %v5496_v23 }
 0x696   : > { %v5497_v45 = vsel %vm4554_vm12, %v5486_v37, %v5488_v61  ;;  %5898 = vmatpush1.msra.mxu0 %v5495_v20  ;;  %v5498_v41 = vsel %vm4554_vm12, %v5488_v61, %v6687_v3  ;;  %v5352_v51 = vpop.permute.xlu1 %5351 }
 0x697   : > { %5899 = vmatprep.subr.mxu0 %v8924_v63  ;;  %5968 = vmatprep.subr.mxu1 %v5498_v41 }
 0x698   : > { %5900 = vmatpush1.msra.mxu0 %v8913_v4  ;;  %5969 = vmatpush1.msra.mxu1 %v5497_v45 }
 0x699   : > { %v5414_v27 = vpop.permute.xlu0 %5413  ;;  %5901 = vmatprep.subr.mxu0 %v5420_v58  ;;  %5970 = vmatprep.subr.mxu1 %v8954_v35  ;;  %v5361_v35 = vsel %vm4554_vm12, %v9044_v18, %v5352_v51 }
 0x69a   : > { %5902 = vmatpush1.msra.mxu0 %v5419_v16  ;;  %5971 = vmatpush1.msra.mxu1 %v8931_v28  ;;  %v5422_v9 = vsel %vm3868_vm11, %v5412_v17, %v5414_v27  ;;  %v5362_v28 = vsel %vm4554_vm12, %v5352_v51, %v9090_v11  ;;  %v5276_v18 = vpop.permute.xlu1 %5275  ;;  %v6703_v11 = vld [vmem:[%s6848_s18 + $0x30] sm:$0xff] }
 0x69b   : > { %5903 = vmatprep.subr.mxu0 %v5360_v25  ;;  %5972 = vmatprep.subr.mxu1 %v5422_v9 }
 0x69c   : > { %5904 = vmatpush1.msra.mxu0 %v5359_v24  ;;  %5973 = vmatpush1.msra.mxu1 %v5421_v32 }
 0x69d   : > { %v5274_v40 = vpop.permute.xlu0 %5273  ;;  %5905 = vmatprep.subr.mxu0 %v8902_v2  ;;  %5974 = vmatprep.subr.mxu1 %v5362_v28 }
 0x69e   : > { %5906 = vmatpush1.msra.mxu0 %v8876_v38  ;;  %5975 = vmatpush1.msra.mxu1 %v5361_v35  ;;  %v5284_v48 = vsel %vm3868_vm11, %v9079_v8, %v5274_v40  ;;  %v5285_v46 = vsel %vm3868_vm11, %v5274_v40, %v5276_v18  ;;  %v6702_v8 = vld [vmem:[%s6848_s18 + $0x18] sm:$0xff] }
 0x69f   : > { %5907 = vmatprep.subr.mxu0 %v5284_v48  ;;  %5976 = vmatprep.subr.mxu1 %v8924_v63 }
 0x6a0   : > { %5908 = vmatpush1.msra.mxu0 %v5283_v53  ;;  %5977 = vmatpush1.msra.mxu1 %v8913_v4 }
 0x6a1   : > { %v5278_v2 = vpop.permute.xlu0 %5277  ;;  %6575 = vmatmul.mubr.msk.f32.vlgmr.msra.gmra.mxu0 %vm1054_vm8, %v9056_v29 }
 0x6a2   : > { %v5286_v38 = vsel %vm3868_vm11, %v5276_v18, %v5278_v2  ;;  %6097 = vmatprep.mubr.f32.mxu0 %v9317_v47 }
 0x6a3   : > { %5978 = vmatprep.subr.mxu1 %v5286_v38 }
 0x6a4   : > { %5979 = vmatpush1.msra.mxu1 %v5285_v46 }
 0x6a5   : > { %6576 = vmatmul.mubr.msk.f32.vlgmr.msra.gmra.mxu1 %vm1054_vm8, %v9056_v29  ;;  %v6030_v30 = vpop.permute.xlu0 %6029 }
 0x6a6   : > { %6168 = vmatprep.mubr.f32.mxu1 %v9317_v47 }
 0x6a7   : > { %v5730_v63 = vpop.permute.xlu1 %5729 }
 0x6ab   : > { %v6337_v58 = vpop.permute.xlu1 %6336 }
 0x741   : > { %v5801_v4 = vpop.f32.mrf.mxu0 }
 0x742   : > { %v5802_v55 = vadd.f32 %v5801_v4, %v5730_v63 }
 0x743   : > { %v5803_v31 = vpop.f32.mrf.mxu0 }
 0x744   : > { %v5804_v7 = vadd.f32 %v5803_v31, %v5730_v63  ;;  %v6019_v56 = vadd.f32 %v6702_v8, %v5802_v55 }
 0x746   : > { %v6020_v22 = vadd.f32 %v6701_v13, %v5804_v7 }
 0x748   : > { %6063 = vmatprep.subr.mxu0 %v6020_v22 }
 0x749   : > { %6064 = vmatpush1.msra.mxu0 %v6019_v56 }
 0x74a   : > { %6577 = vmatmul.mubr.msk.f32.vlgmr.msra.gmra.mxu0 %vm3868_vm11, %v6030_v30 }
 0x74b   : > { %6239 = vmatprep.mubr.f32.mxu0 %v9317_v47 }
 0x74d   : > { %v5872_v29 = vpop.f32.mrf.mxu1 }
 0x74e   : > { %v5873_v50 = vadd.f32 %v5872_v29, %v5730_v63 }
 0x74f   : > { %v5874_v6 = vpop.f32.mrf.mxu1 }
 0x750   : > { %v5875_v49 = vadd.f32 %v5874_v6, %v5730_v63  ;;  %v6021_v5 = vadd.f32 %v6704_v43, %v5873_v50 }
 0x752   : > { %v6022_v12 = vadd.f32 %v6703_v11, %v5875_v49 }
 0x754   : > { %6134 = vmatprep.subr.mxu1 %v6022_v12 }
 0x755   : > { %6135 = vmatpush1.msra.mxu1 %v6021_v5 }
 0x756   : > { %6578 = vmatmul.mubr.msk.f32.vlgmr.msra.gmra.mxu1 %vm3868_vm11, %v6030_v30 }
 0x757   : > { %6310 = vmatprep.mubr.f32.mxu1 %v9317_v47  ;;  %v6708_v47 = vld [vmem:[%s6848_s18 + $0x48] sm:$0xff] }
 0x761   : > { %v5943_v21 = vpop.f32.mrf.mxu0 }
 0x762   : > { %v5944_v54 = vadd.f32 %v5943_v21, %v5730_v63 }
 0x763   : > { %v5945_v33 = vpop.f32.mrf.mxu0 }
 0x764   : > { %v5946_v15 = vadd.f32 %v5945_v33, %v5730_v63  ;;  %v6023_v52 = vadd.f32 %v6706_v60, %v5944_v54 }
 0x765   : > { %v6014_v62 = vpop.f32.mrf.mxu1 }
 0x766   : > { %v6024_v37 = vadd.f32 %v6705_v42, %v5946_v15  ;;  %v6015_v19 = vadd.f32 %v6014_v62, %v5730_v63 }
 0x767   : > { %v6016_v44 = vpop.f32.mrf.mxu1 }
 0x768   : > { %v6017_v0 = vadd.f32 %v6016_v44, %v5730_v63  ;;  %6205 = vmatprep.subr.mxu0 %v6024_v37  ;;  %v6025_v3 = vadd.f32 %v6708_v47, %v6015_v19 }
 0x769   : > { %6206 = vmatpush1.msra.mxu0 %v6023_v52 }
 0x76a   : > { %v6026_v17 = vadd.f32 %v6707_v26, %v6017_v0  ;;  %6579 = vmatmul.mubr.msk.f32.vlgmr.msra.gmra.mxu0 %vm3868_vm11, %v6030_v30 }
 0x76c   : > { %6276 = vmatprep.subr.mxu1 %v6026_v17 }
 0x76d   : > { %6277 = vmatpush1.msra.mxu1 %v6025_v3 }
 0x76e   : > { %6580 = vmatmul.mubr.msk.f32.vlgmr.msra.gmra.mxu1 %vm3868_vm11, %v6030_v30 }
 0x80a   : > { %v6099_v23 = vpop.f32.mrf.mxu0 }
 0x80b   : > { %v6317_v20 = vadd.f32 %v6099_v23, %v8852_v34 }
 0x80c   : > { %v6101_v61 = vpop.f32.mrf.mxu0 }
 0x80d   : > { %v6325_v45 = vadd.f32 %v6702_v8, %v6317_v20  ;;  %v6318_v41 = vadd.f32 %v6101_v61, %v8854_v59 }
 0x80f   : > { %v6339_v16 = vadd.f32 %v6337_v58, %v6325_v45  ;;  %v6326_v51 = vadd.f32 %v6701_v13, %v6318_v41 }
 0x811   : > { %6347 = vst [vmem:[%s9185_s25] sm:$0xff] %v6339_v16  ;;  %v6340_v27 = vadd.f32 %v6337_v58, %v6326_v51 }
 0x813   : > { %6348 = vst [vmem:[%s9185_s25 + $0x8] sm:$0xff] %v6340_v27 }
 0x816   : > { %v6170_v34 = vpop.f32.mrf.mxu1 }
 0x817   : > { %v6319_v25 = vadd.f32 %v6170_v34, %v8856_v57 }
 0x818   : > { %v6172_v9 = vpop.f32.mrf.mxu1 }
 0x819   : > { %v6327_v59 = vadd.f32 %v6704_v43, %v6319_v25  ;;  %v6320_v24 = vadd.f32 %v6172_v9, %v8860_v14 }
 0x81b   : > { %v6341_v32 = vadd.f32 %v6337_v58, %v6327_v59  ;;  %v6328_v28 = vadd.f32 %v6703_v11, %v6320_v24 }
 0x81d   : > { %6349 = vst [vmem:[%s9185_s25 + $0x10] sm:$0xff] %v6341_v32  ;;  %v6342_v35 = vadd.f32 %v6337_v58, %v6328_v28 }
 0x81f   : > { %6350 = vst [vmem:[%s9185_s25 + $0x18] sm:$0xff] %v6342_v35 }
 0x82a   : > { %v6241_v40 = vpop.f32.mrf.mxu0 }
 0x82b   : > { %v6321_v48 = vadd.f32 %v6241_v40, %v8858_v39 }
 0x82c   : > { %v6243_v53 = vpop.f32.mrf.mxu0 }
 0x82d   : > { %v6329_v18 = vadd.f32 %v6706_v60, %v6321_v48  ;;  %v6322_v57 = vadd.f32 %v6243_v53, %v8862_v10 }
 0x82e   : > { %v6312_v2 = vpop.f32.mrf.mxu1 }
 0x82f   : > { %v6343_v38 = vadd.f32 %v6337_v58, %v6329_v18  ;;  %v6330_v46 = vadd.f32 %v6705_v42, %v6322_v57  ;;  %v6323_v14 = vadd.f32 %v6312_v2, %v8864_v1 }
 0x830   : > { %v6314_v4 = vpop.f32.mrf.mxu1 }
 0x831   : > { %6351 = vst [vmem:[%s9185_s25 + $0x20] sm:$0xff] %v6343_v38  ;;  %v6344_v63 = vadd.f32 %v6337_v58, %v6330_v46  ;;  %v6331_v55 = vadd.f32 %v6708_v47, %v6323_v14  ;;  %v6324_v31 = vadd.f32 %v6314_v4, %v8866_v36 }
 0x833   : > { %6352 = vst [vmem:[%s9185_s25 + $0x28] sm:$0xff] %v6344_v63  ;;  %v6345_v7 = vadd.f32 %v6337_v58, %v6331_v55  ;;  %v6332_v39 = vadd.f32 %v6707_v26, %v6324_v31 }
 0x835   : > { %6353 = vst [vmem:[%s9185_s25 + $0x30] sm:$0xff] %v6345_v7  ;;  %v6346_v13 = vadd.f32 %v6337_v58, %v6332_v39 }
 0x837   : > { %6354 = vst [vmem:[%s9185_s25 + $0x38] sm:$0xff] %v6346_v13 }
 0x838 PF: > { %s18_s9 = sadd.s32 1, %s6747_s9   ;;  %s9390_s27 = smov %s6739_s29 }
 0x839   : > { %p15_p7 = scmp.ge.s32.totalorder %s18_s9, 10   ;;  %s9391_s28 = smov %s6743_s30 }
 0x83a   : > { %s9392_s29 = smov %s9395_s10  ;;  %s9393_s30 = smov %s9399_s11 }
 0x83b   :  { %17 = sbr.rel (!%p15_p7) target bundleno = 3 (0x3), region = 108 }

</bundles_post_ra>
